<compile_context>
chip_gen: v5e
topology: v5e:2x2
jax: 0.10.0
libtpu: 0.0.40
codegen_flags: <defaults>
</compile_context>

<pallas_src>
import jax
import jax.numpy as jnp
from jax.experimental import pallas as pl
from jax.experimental.pallas import tpu as pltpu

C_IN = 1824
C_OUT = 192


def relu_conv1x1_kernel(w_ref, x_ref, o_ref):
    # w_ref: (co_blk, C_IN) bf16 conv weight tile (used as-is, no transpose)
    # x_ref: (C_IN, HW)     f32 flattened NCHW activations (N=1)
    # o_ref: (co_blk, HW)   f32 output tile
    x = jnp.maximum(x_ref[...], 0.0).astype(jnp.bfloat16)   # fused ReLU (VPU) + cast
    o_ref[...] = jnp.dot(                                    # 1x1 conv == matmul (MXU)
        w_ref[...], x, preferred_element_type=jnp.float32
    ).astype(o_ref.dtype)


def _default_cout_shards() -> int:
    """2-way C_OUT split only on v7x (2 TensorCores); 1 elsewhere."""
    try:
        kind = jax.devices()[0].device_kind.lower()
    except Exception:
        return 1
    return 2 if "v7" in kind else 1


def relu_conv1x1(x_nchw: jax.Array, w_oihw: jax.Array, *, shards: int | None = None) -> jax.Array:
    """x_nchw: (1, C_IN, H, W) f32; w_oihw: (C_OUT, C_IN, 1, 1) -> (1, C_OUT, H, W) f32."""
    n, c, h, w = x_nchw.shape
    assert n == 1 and c == C_IN, "module is specified for N=1, C_IN=1824"
    assert w_oihw.shape == (C_OUT, C_IN, 1, 1)
    hw = h * w

    if shards is None:
        shards = _default_cout_shards()
    assert C_OUT % shards == 0 and (C_OUT // shards) % 8 == 0
    co_blk = C_OUT // shards

    # Free reshapes only — no transposes.  Weight consumed as bf16 (no-op if
    # the caller already stores it in bf16).
    x_mat = x_nchw.reshape(C_IN, hw)                               # (1824, 49) f32
    w_mat = w_oihw.reshape(C_OUT, C_IN).astype(jnp.bfloat16)       # (192, 1824) bf16

    flops = 2 * C_OUT * C_IN * hw
    bytes_accessed = 2 * C_OUT * C_IN + 4 * C_IN * hw + 4 * C_OUT * hw
    cost = pl.CostEstimate(flops=flops, transcendentals=0, bytes_accessed=bytes_accessed)
    out_shape = jax.ShapeDtypeStruct((C_OUT, hw), x_nchw.dtype)

    if shards == 1:
        # v5e / v6e: single TensorCore -> gridless single-shot call, whole
        # problem in one VMEM tile, no per-step pipeline overhead.
        out_mat = pl.pallas_call(
            relu_conv1x1_kernel,
            out_shape=out_shape,
            in_specs=[
                pl.BlockSpec((C_OUT, C_IN), lambda: (0, 0)),
                pl.BlockSpec((C_IN, hw), lambda: (0, 0)),
            ],
            out_specs=pl.BlockSpec((C_OUT, hw), lambda: (0, 0)),
            cost_estimate=cost,
        )(w_mat, x_mat)
    else:
        # v7x: split C_OUT across the two TensorCores; each core fetches half
        # the weight and produces half the output channels.
        out_mat = pl.pallas_call(
            relu_conv1x1_kernel,
            out_shape=out_shape,
            grid=(shards,),
            in_specs=[
                pl.BlockSpec((co_blk, C_IN), lambda i: (i, 0)),
                pl.BlockSpec((C_IN, hw), lambda i: (0, 0)),   # X shared, fetched once
            ],
            out_specs=pl.BlockSpec((co_blk, hw), lambda i: (i, 0)),
            compiler_params=pltpu.CompilerParams(
                dimension_semantics=("parallel",)
            ),
            cost_estimate=cost,
        )(w_mat, x_mat)

    # Free reshape back to NCHW.
    return out_mat.reshape(1, C_OUT, h, w)


if __name__ == "__main__":
    key = jax.random.PRNGKey(0)
    kx, kw = jax.random.split(key)

    # Shapes exactly as the module implies: x511 = (1, 1824, 7, 7), f32.
    x = jax.random.normal(kx, (1, C_IN, 7, 7), dtype=jnp.float32)
    # Deterministic synthetic conv weight, (192, 1824, 1, 1), no bias.
    w_f32 = jax.random.normal(kw, (C_OUT, C_IN, 1, 1), dtype=jnp.float32) * 0.02
    # In deployment the weight would be stored pre-cast; simulate that here.
    w_bf16 = w_f32.astype(jnp.bfloat16)

    run = jax.jit(relu_conv1x1)
    out = run(x, w_bf16)
    jax.block_until_ready(out)
    assert out.shape == (1, C_OUT, 7, 7)

    x_mat = jnp.maximum(x.reshape(C_IN, 49), 0.0)

    # Reference with identical math (bf16 inputs, f32 accumulation): tight check.
    ref_bf16 = jnp.dot(
        w_bf16.reshape(C_OUT, C_IN),
        x_mat.astype(jnp.bfloat16),
        preferred_element_type=jnp.float32,
    ).reshape(1, C_OUT, 7, 7)
    assert jnp.allclose(out, ref_bf16, atol=1e-3, rtol=1e-3)

    # Reference against the original f32 module math: loose (bf16-weight) check.
    ref_f32 = jnp.dot(
        w_f32.reshape(C_OUT, C_IN), x_mat, preferred_element_type=jnp.float32
    ).reshape(1, C_OUT, 7, 7)
    assert jnp.allclose(out, ref_f32, atol=5e-2, rtol=5e-2)

    print("KERNEL_OK")
</pallas_src>

<mosaic_0001>
module attributes {stable_mosaic.version = 11 : i64} {
  func.func @relu_conv1x1_kernel(%arg0: memref<192x1824xbf16, #tpu.memory_space<vmem>>, %arg1: memref<1824x49xf32, #tpu.memory_space<vmem>>, %arg2: memref<192x49xf32, #tpu.memory_space<vmem>>) attributes {dimension_semantics = [], scalar_prefetch = 0 : i64, scratch_operands = 0 : i64, tpu.core_type = #tpu.core_type<tc>} {
    %c0 = arith.constant 0 : index
    %c0_0 = arith.constant 0 : index
    %0 = vector.load %arg1[%c0, %c0_0] : memref<1824x49xf32, #tpu.memory_space<vmem>>, vector<1824x49xf32>
    %cst = arith.constant 0.000000e+00 : f32
    %1 = vector.broadcast %cst : f32 to vector<1824x49xf32>
    %2 = arith.maximumf %0, %1 : vector<1824x49xf32>
    %3 = arith.truncf %2 : vector<1824x49xf32> to vector<1824x49xbf16>
    %c0_1 = arith.constant 0 : index
    %c0_2 = arith.constant 0 : index
    %4 = vector.load %arg0[%c0_1, %c0_2] : memref<192x1824xbf16, #tpu.memory_space<vmem>>, vector<192x1824xbf16>
    %cst_3 = arith.constant dense<0.000000e+00> : vector<192x49xf32>
    %5 = tpu.matmul %4, %3, %cst_3 {dimension_numbers = #tpu.dot_dimension_numbers<[1], [0], [0], [1], [0, 0, 1, 1], [], []>} : vector<192x1824xbf16>, vector<1824x49xbf16>, vector<192x49xf32> -> vector<192x49xf32>
    %c0_4 = arith.constant 0 : index
    %c0_5 = arith.constant 0 : index
    %6 = vector.load %arg2[%c0_4, %c0_5] : memref<192x49xf32, #tpu.memory_space<vmem>>, vector<192x49xf32>
    tpu.vector_store %arg2[%c0_4, %c0_5], %5 {strides = array<i32>} : memref<192x49xf32, #tpu.memory_space<vmem>>, vector<192x49xf32>,
    return
  }
}

</mosaic_0001>

<bundles_post_ra>
// kernel: relu_conv1x1.1
= control target key start
LH: loop header
LB: loop body
LE: loop exit
PB: predicated region body
PF: predicated region fallthrough
CT: control target
= control target key end

     0   :  { %vm1674_vm0 = vcmask 261120   ;;  %vm2746_vm1 = vcmask 400384   ;;  %s5914_s1 = inlined_call_operand.vmem [shape: f32[1824,49], index: 1, kind: input, shape index: {}]   ;;  %s5915_s0 = inlined_call_operand.vmem [shape: bf16[192,1824], index: 0, kind: input, shape index: {}]   ;;  %s5916_s2 = inlined_call_operand.vmem [shape: f32[192,49], index: 2, kind: output, shape index: {}]  }
   0x1   :  { %v26_v0 = vld [vmem:[%s5914_s1 + $0x70] sm:$0xff]  ;;  %v27_v1 = vld [vmem:[%s5914_s1 + $0x78] sm:$0xff]  ;;  %v24_v12 = vld [vmem:[%s5914_s1 + $0x60] sm:$0xff] }
   0x2   :  { %v42_v2 = vld [vmem:[%s5914_s1 + $0xf0] sm:$0xff]  ;;  %v254_v3 = vmax.f32 %v26_v0, 0.0  ;;  %v255_v4 = vmax.f32 %v27_v1, 0.0  ;;  %v43_v5 = vld [vmem:[%s5914_s1 + $0xf8] sm:$0xff]  ;;  %v25_v13 = vld [vmem:[%s5914_s1 + $0x68] sm:$0xff]  ;;  %v252_v16 = vmax.f32 %v24_v12, 0.0 }
   0x3   :  { %v270_v6 = vmax.f32 %v42_v2, 0.0  ;;  %v58_v7 = vld [vmem:[%s5914_s1 + $0x170] sm:$0xff]  ;;  %v59_v8 = vld [vmem:[%s5914_s1 + $0x178] sm:$0xff]  ;;  %v271_v9 = vmax.f32 %v43_v5, 0.0  ;;  %v40_v14 = vld [vmem:[%s5914_s1 + $0xe0] sm:$0xff]  ;;  %v253_v17 = vmax.f32 %v25_v13, 0.0 }
   0x4   :  { %v286_v10 = vmax.f32 %v58_v7, 0.0  ;;  %v287_v11 = vmax.f32 %v59_v8, 0.0  ;;  %v475_v15 = vpack.c.bf16 %v255_v4, %v254_v3  ;;  %v41_v18 = vld [vmem:[%s5914_s1 + $0xe8] sm:$0xff]  ;;  %v268_v19 = vmax.f32 %v40_v14, 0.0  ;;  %v56_v20 = vld [vmem:[%s5914_s1 + $0x160] sm:$0xff]  ;;  %v22_v26 = vld [vmem:[%s5914_s1 + $0x50] sm:$0xff] }
   0x5   :  { %v57_v21 = vld [vmem:[%s5914_s1 + $0x168] sm:$0xff]  ;;  %v3762_v22 = vpack.c.bf16 %v271_v9, %v270_v6  ;;  %v269_v24 = vmax.f32 %v41_v18, 0.0  ;;  %v284_v25 = vmax.f32 %v56_v20, 0.0  ;;  %v23_v27 = vld [vmem:[%s5914_s1 + $0x58] sm:$0xff]  ;;  %v38_v28 = vld [vmem:[%s5914_s1 + $0xd0] sm:$0xff]  ;;  %v474_v29 = vpack.c.bf16 %v253_v17, %v252_v16 }
   0x6   :  { %v3764_v23 = vpack.c.bf16 %v287_v11, %v286_v10  ;;  %1711 = vmatpush.bf16.msra.mxu0 %v475_v15  ;;  %3687 = vmatpush.bf16.msra.mxu3 %v475_v15  ;;  %v285_v30 = vmax.f32 %v57_v21, 0.0  ;;  %v250_v31 = vmax.f32 %v22_v26, 0.0  ;;  %v251_v32 = vmax.f32 %v23_v27, 0.0  ;;  %v39_v33 = vld [vmem:[%s5914_s1 + $0xd8] sm:$0xff]  ;;  %v54_v34 = vld [vmem:[%s5914_s1 + $0x150] sm:$0xff]  ;;  %v20_v40 = vld [vmem:[%s5914_s1 + $0x40] sm:$0xff] }
   0x7   :  { %v55_v35 = vld [vmem:[%s5914_s1 + $0x158] sm:$0xff]  ;;  %1780 = vmatpush.bf16.msra.mxu1 %v3762_v22  ;;  %v3786_v36 = vpack.c.bf16 %v269_v24, %v268_v19  ;;  %v266_v37 = vmax.f32 %v38_v28, 0.0  ;;  %v267_v38 = vmax.f32 %v39_v33, 0.0  ;;  %v282_v39 = vmax.f32 %v54_v34, 0.0  ;;  %v21_v41 = vld [vmem:[%s5914_s1 + $0x48] sm:$0xff]  ;;  %v36_v42 = vld [vmem:[%s5914_s1 + $0xc0] sm:$0xff] }
   0x8   :  { %1849 = vmatpush.bf16.msra.mxu2 %v3764_v23  ;;  %v3797_v43 = vpack.c.bf16 %v285_v30, %v284_v25  ;;  %v283_v44 = vmax.f32 %v55_v35, 0.0  ;;  %v37_v45 = vld [vmem:[%s5914_s1 + $0xc8] sm:$0xff]  ;;  %v52_v46 = vld [vmem:[%s5914_s1 + $0x140] sm:$0xff]  ;;  %v473_v48 = vpack.c.bf16 %v251_v32, %v250_v31  ;;  %v248_v49 = vmax.f32 %v20_v40, 0.0  ;;  %v18_v53 = vld [vmem:[%s5914_s1 + $0x30] sm:$0xff] }
   0x9   :  { %v53_v47 = vld [vmem:[%s5914_s1 + $0x148] sm:$0xff]  ;;  %v249_v50 = vmax.f32 %v21_v41, 0.0  ;;  %v264_v51 = vmax.f32 %v36_v42, 0.0  ;;  %v265_v52 = vmax.f32 %v37_v45, 0.0  ;;  %v19_v54 = vld [vmem:[%s5914_s1 + $0x38] sm:$0xff]  ;;  %v3816_v55 = vpack.c.bf16 %v267_v38, %v266_v37  ;;  %v34_v59 = vld [vmem:[%s5914_s1 + $0xb0] sm:$0xff] }
   0xa   :  { %1712 = vmatpush.bf16.msra.mxu0 %v474_v29  ;;  %3688 = vmatpush.bf16.msra.mxu3 %v474_v29  ;;  %v3818_v56 = vpack.c.bf16 %v283_v44, %v282_v39  ;;  %v280_v57 = vmax.f32 %v52_v46, 0.0  ;;  %v281_v58 = vmax.f32 %v53_v47, 0.0  ;;  %v35_v60 = vld [vmem:[%s5914_s1 + $0xb8] sm:$0xff]  ;;  %v50_v61 = vld [vmem:[%s5914_s1 + $0x130] sm:$0xff]  ;;  %v246_v63 = vmax.f32 %v18_v53, 0.0  ;;  %v16_v4 = vld [vmem:[%s5914_s1 + $0x20] sm:$0xff] }
   0xb   :  { %1781 = vmatpush.bf16.msra.mxu1 %v3786_v36  ;;  %v51_v62 = vld [vmem:[%s5914_s1 + $0x138] sm:$0xff]  ;;  %v247_v0 = vmax.f32 %v19_v54, 0.0  ;;  %v472_v1 = vpack.c.bf16 %v249_v50, %v248_v49  ;;  %v3832_v2 = vpack.c.bf16 %v265_v52, %v264_v51  ;;  %v262_v3 = vmax.f32 %v34_v59, 0.0  ;;  %v17_v9 = vld [vmem:[%s5914_s1 + $0x28] sm:$0xff]  ;;  %v32_v10 = vld [vmem:[%s5914_s1 + $0xa0] sm:$0xff] }
   0xc   :  { %1850 = vmatpush.bf16.msra.mxu2 %v3797_v43  ;;  %v3839_v5 = vpack.c.bf16 %v281_v58, %v280_v57  ;;  %v263_v6 = vmax.f32 %v35_v60, 0.0  ;;  %v278_v7 = vmax.f32 %v50_v61, 0.0  ;;  %v279_v8 = vmax.f32 %v51_v62, 0.0  ;;  %v33_v11 = vld [vmem:[%s5914_s1 + $0xa8] sm:$0xff]  ;;  %v48_v12 = vld [vmem:[%s5914_s1 + $0x120] sm:$0xff]  ;;  %v14_v19 = vld [vmem:[%s5914_s1 + $0x10] sm:$0xff] }
   0xd   :  { %v49_v13 = vld [vmem:[%s5914_s1 + $0x128] sm:$0xff]  ;;  %v471_v14 = vpack.c.bf16 %v247_v0, %v246_v63  ;;  %v244_v15 = vmax.f32 %v16_v4, 0.0  ;;  %v245_v16 = vmax.f32 %v17_v9, 0.0  ;;  %v260_v17 = vmax.f32 %v32_v10, 0.0  ;;  %v15_v20 = vld [vmem:[%s5914_s1 + $0x18] sm:$0xff]  ;;  %v30_v27 = vld [vmem:[%s5914_s1 + $0x90] sm:$0xff] }
   0xe   :  { %1713 = vmatpush.bf16.msra.mxu0 %v473_v48  ;;  %3689 = vmatpush.bf16.msra.mxu3 %v473_v48  ;;  %v261_v18 = vmax.f32 %v33_v11, 0.0  ;;  %v3864_v21 = vpack.c.bf16 %v263_v6, %v262_v3  ;;  %v3866_v24 = vpack.c.bf16 %v279_v8, %v278_v7  ;;  %v276_v25 = vmax.f32 %v48_v12, 0.0  ;;  %v31_v28 = vld [vmem:[%s5914_s1 + $0x98] sm:$0xff]  ;;  %v46_v29 = vld [vmem:[%s5914_s1 + $0x110] sm:$0xff]  ;;  %v12_v37 = vld [vmem:[%s5914_s1] sm:$0xff] }
   0xf   :  { %1782 = vmatpush.bf16.msra.mxu1 %v3816_v55  ;;  %v277_v26 = vmax.f32 %v49_v13, 0.0  ;;  %v47_v30 = vld [vmem:[%s5914_s1 + $0x118] sm:$0xff]  ;;  %v242_v31 = vmax.f32 %v14_v19, 0.0  ;;  %v243_v32 = vmax.f32 %v15_v20, 0.0  ;;  %v470_v33 = vpack.c.bf16 %v245_v16, %v244_v15  ;;  %v13_v38 = vld [vmem:[%s5914_s1 + $0x8] sm:$0xff]  ;;  %v28_v39 = vld [vmem:[%s5914_s1 + $0x80] sm:$0xff] }
  0x10   :  { %1851 = vmatpush.bf16.msra.mxu2 %v3818_v56  ;;  %v3880_v34 = vpack.c.bf16 %v261_v18, %v260_v17  ;;  %v258_v35 = vmax.f32 %v30_v27, 0.0  ;;  %v259_v41 = vmax.f32 %v31_v28, 0.0  ;;  %v274_v42 = vmax.f32 %v46_v29, 0.0  ;;  %v29_v45 = vld [vmem:[%s5914_s1 + $0x88] sm:$0xff]  ;;  %v44_v46 = vld [vmem:[%s5914_s1 + $0x100] sm:$0xff]  ;;  %v122_v51 = vld [vmem:[%s5914_s1 + $0x370] sm:$0xff] }
  0x11   :  { %v3893_v40 = vpack.c.bf16 %v277_v26, %v276_v25  ;;  %v275_v44 = vmax.f32 %v47_v30, 0.0  ;;  %v45_v47 = vld [vmem:[%s5914_s1 + $0x108] sm:$0xff]  ;;  %v469_v48 = vpack.c.bf16 %v243_v32, %v242_v31  ;;  %v240_v49 = vmax.f32 %v12_v37, 0.0  ;;  %v123_v52 = vld [vmem:[%s5914_s1 + $0x378] sm:$0xff]  ;;  %v90_v61 = vld [vmem:[%s5914_s1 + $0x270] sm:$0xff] }
  0x12   :  { %1714 = vmatpush.bf16.msra.mxu0 %v472_v1  ;;  %3690 = vmatpush.bf16.msra.mxu3 %v472_v1  ;;  %v241_v50 = vmax.f32 %v13_v38, 0.0  ;;  %v256_v53 = vmax.f32 %v28_v39, 0.0  ;;  %v257_v54 = vmax.f32 %v29_v45, 0.0  ;;  %v272_v57 = vmax.f32 %v44_v46, 0.0  ;;  %v2777_v62 = vld [vmem:[%s5915_s0] sm:$0xf] }
  0x13   :  { %1783 = vmatpush.bf16.msra.mxu1 %v3832_v2  ;;  %v273_v58 = vmax.f32 %v45_v47, 0.0  ;;  %v3912_v59 = vpack.c.bf16 %v259_v41, %v258_v35  ;;  %v3914_v60 = vpack.c.bf16 %v275_v44, %v274_v42  ;;  %v3514_v63 = vld [vmem:[%s5915_s0 + $0x38] sm:$0xf0]  ;;  %v3317_v0 = vld [vmem:[%s5915_s0 + $0x438] sm:$0xf]  ;;  %v350_v3 = vmax.f32 %v122_v51, 0.0 }
  0x14   :  { %1852 = vmatpush.bf16.msra.mxu2 %v3839_v5  ;;  %v3649_v1 = vld [vmem:[%s5915_s0 + $0x470] sm:$0xf0]  ;;  %v351_v4 = vmax.f32 %v123_v52, 0.0  ;;  %v91_v6 = vld [vmem:[%s5914_s1 + $0x278] sm:$0xff]  ;;  %v3507_v9 = vld [vmem:[%s5915_s0 + $0x4] sm:$0xf]  ;;  %v468_v12 = vpack.c.bf16 %v241_v50, %v240_v49  ;;  %v3949_v13 = vpack.c.bf16 %v257_v54, %v256_v53 }
  0x15   :  { %v106_v7 = vld [vmem:[%s5914_s1 + $0x2f0] sm:$0xff]  ;;  %v107_v8 = vld [vmem:[%s5914_s1 + $0x2f8] sm:$0xff]  ;;  %v120_v10 = vld [vmem:[%s5914_s1 + $0x360] sm:$0xff]  ;;  %v318_v18 = vmax.f32 %v90_v61, 0.0  ;;  %v319_v19 = vmax.f32 %v91_v6, 0.0  ;;  %v3318_v35 = vor.u32 %v3649_v1, %v3317_v0 }
  0x16   :  { %1715 = vmatpush.bf16.msra.mxu0 %v471_v14  ;;  %3691 = vmatpush.bf16.msra.mxu3 %v471_v14  ;;  %v121_v11 = vld [vmem:[%s5914_s1 + $0x368] sm:$0xff]  ;;  %v3951_v14 = vpack.c.bf16 %v273_v58, %v272_v57  ;;  %v2779_v15 = vld [vmem:[%s5915_s0 + $0x3c] sm:$0xf0]  ;;  %v3515_v17 = vld [vmem:[%s5915_s0 + $0x40] sm:$0xf0]  ;;  %v334_v20 = vmax.f32 %v106_v7, 0.0  ;;  %v523_v28 = vpack.c.bf16 %v351_v4, %v350_v3 }
  0x17   :  { %1784 = vmatpush.bf16.msra.mxu1 %v3864_v21  ;;  %v2785_v16 = vld [vmem:[%s5915_s0 + $0x8] sm:$0xf]  ;;  %v335_v25 = vmax.f32 %v107_v8, 0.0  ;;  %v88_v26 = vld [vmem:[%s5914_s1 + $0x260] sm:$0xff]  ;;  %v348_v29 = vmax.f32 %v120_v10, 0.0  ;;  %v349_v30 = vmax.f32 %v121_v11, 0.0  ;;  %v2782_v37 = vor.u32 %v3507_v9, %v2779_v15 }
  0x18   :  { %1853 = vmatpush.bf16.msra.mxu2 %v3866_v24  ;;  %v89_v27 = vld [vmem:[%s5914_s1 + $0x268] sm:$0xff]  ;;  %v104_v31 = vld [vmem:[%s5914_s1 + $0x2e0] sm:$0xff]  ;;  %v2786_v38 = vor.u32 %v3515_v17, %v2785_v16  ;;  %v316_v39 = vmax.f32 %v88_v26, 0.0  ;;  %v507_v42 = vpack.c.bf16 %v319_v19, %v318_v18  ;;  %v118_v49 = vld [vmem:[%s5914_s1 + $0x350] sm:$0xff] }
  0x19   :  { %v105_v32 = vld [vmem:[%s5914_s1 + $0x2e8] sm:$0xff]  ;;  %v317_v41 = vmax.f32 %v89_v27, 0.0  ;;  %v515_v44 = vpack.c.bf16 %v335_v25, %v334_v20  ;;  %v332_v45 = vmax.f32 %v104_v31, 0.0  ;;  %v522_v47 = vpack.c.bf16 %v349_v30, %v348_v29  ;;  %v119_v50 = vld [vmem:[%s5914_s1 + $0x358] sm:$0xff]  ;;  %v86_v51 = vld [vmem:[%s5914_s1 + $0x250] sm:$0xff] }
  0x1a   :  { %1716 = vmatpush.bf16.msra.mxu0 %v470_v33  ;;  %3692 = vmatpush.bf16.msra.mxu3 %v470_v33  ;;  %v2778_v33 = vor.u32 %v3514_v63, %v2777_v62  ;;  %v333_v46 = vmax.f32 %v105_v32, 0.0  ;;  %v346_v52 = vmax.f32 %v118_v49, 0.0  ;;  %v347_v53 = vmax.f32 %v119_v50, 0.0  ;;  %v87_v54 = vld [vmem:[%s5914_s1 + $0x258] sm:$0xff]  ;;  %v102_v58 = vld [vmem:[%s5914_s1 + $0x2d0] sm:$0xff]  ;;  %v116_v18 = vld [vmem:[%s5914_s1 + $0x340] sm:$0xff] }
  0x1b   :  { %1785 = vmatpush.bf16.msra.mxu1 %v3880_v34  ;;  %v314_v57 = vmax.f32 %v86_v51, 0.0  ;;  %v103_v61 = vld [vmem:[%s5914_s1 + $0x2d8] sm:$0xff]  ;;  %v315_v62 = vmax.f32 %v87_v54, 0.0  ;;  %v330_v63 = vmax.f32 %v102_v58, 0.0  ;;  %v3377_v7 = vld [vmem:[%s5915_s0 + $0x4b0] sm:$0xf] }
  0x1c   :  { %1854 = vmatpush.bf16.msra.mxu2 %v3893_v40  ;;  %v331_v0 = vmax.f32 %v103_v61, 0.0  ;;  %v521_v1 = vpack.c.bf16 %v347_v53, %v346_v52  ;;  %v2837_v6 = vld [vmem:[%s5915_s0 + $0x78] sm:$0xf]  ;;  %v3664_v8 = vld [vmem:[%s5915_s0 + $0x4e8] sm:$0xf0]  ;;  %v344_v20 = vmax.f32 %v116_v18, 0.0 }
  0x1d   :  { %v505_v3 = vpack.c.bf16 %v315_v62, %v314_v57  ;;  %v2839_v9 = vld [vmem:[%s5915_s0 + $0xb4] sm:$0xf0]  ;;  %v2845_v10 = vld [vmem:[%s5915_s0 + $0x80] sm:$0xf]  ;;  %v3530_v11 = vld [vmem:[%s5915_s0 + $0xb8] sm:$0xf0]  ;;  %v3378_v15 = vor.u32 %v3664_v8, %v3377_v7 }
  0x1e   :  { %1717 = vmatpush.bf16.msra.mxu0 %v469_v48  ;;  %3693 = vmatpush.bf16.msra.mxu3 %v469_v48  ;;  %v506_v48 = vpack.c.bf16 %v317_v41, %v316_v39  ;;  %v513_v4 = vpack.c.bf16 %v331_v0, %v330_v63  ;;  %v2846_v17 = vor.u32 %v3530_v11, %v2845_v10  ;;  %v117_v19 = vld [vmem:[%s5914_s1 + $0x348] sm:$0xff]  ;;  %v2897_v30 = vld [vmem:[%s5915_s0 + $0xf0] sm:$0xf]  ;;  %v3642_v53 = vld [vmem:[%s5915_s0 + $0x43c] sm:$0xf] }
  0x1f   :  { %1786 = vmatpush.bf16.msra.mxu1 %v3912_v59  ;;  %v345_v25 = vmax.f32 %v117_v19, 0.0  ;;  %v3544_v31 = vld [vmem:[%s5915_s0 + $0x128] sm:$0xf0]  ;;  %v3437_v32 = vld [vmem:[%s5915_s0 + $0x528] sm:$0xf] }
  0x20   :  { %1855 = vmatpush.bf16.msra.mxu2 %v3914_v60  ;;  %v3552_v52 = vld [vmem:[%s5915_s0 + $0x16c] sm:$0xf]  ;;  %v2959_v54 = vld [vmem:[%s5915_s0 + $0x1a4] sm:$0xf0]  ;;  %v2965_v57 = vld [vmem:[%s5915_s0 + $0x170] sm:$0xf] }
  0x21   :  { %v3560_v58 = vld [vmem:[%s5915_s0 + $0x1a8] sm:$0xf0]  ;;  %v2962_v63 = vor.u32 %v3552_v52, %v2959_v54  ;;  %v3567_v10 = vld [vmem:[%s5915_s0 + $0x1e4] sm:$0xf]  ;;  %v3657_v11 = vld [vmem:[%s5915_s0 + $0x4b4] sm:$0xf] }
  0x22   :  { %1718 = vmatpush.bf16.msra.mxu0 %v468_v12  ;;  %3694 = vmatpush.bf16.msra.mxu3 %v468_v12  ;;  %v2966_v0 = vor.u32 %v3560_v58, %v2965_v57  ;;  %v3672_v52 = vld [vmem:[%s5915_s0 + $0x52c] sm:$0xf]  ;;  %v3085_v54 = vld [vmem:[%s5915_s0 + $0x260] sm:$0xf]  ;;  %v3590_v57 = vld [vmem:[%s5915_s0 + $0x298] sm:$0xf0] }
  0x23   :  { %1787 = vmatpush.bf16.msra.mxu1 %v3949_v13 }
  0x24   :  { %1856 = vmatpush.bf16.msra.mxu2 %v3951_v14 }
  0x25   :  { %1719 = vmatmul.bf16.vlgmr.msra.gmra.mxu0 %v2778_v33  ;;  %1764 = vmatmul.bf16.vlgmr.msra.gmra.mxu3 %v3318_v35  ;;  %v2899_v33 = vld [vmem:[%s5915_s0 + $0x12c] sm:$0xf0]  ;;  %v2905_v35 = vld [vmem:[%s5915_s0 + $0xf8] sm:$0xf] }
  0x26   :  { %3695 = vmatpush.bf16.msrb.mxu3 %v3762_v22  ;;  %1788 = vmatmul.bf16.vlgmr.msra.gmra.mxu1 %v2782_v37  ;;  %v514_v22 = vpack.c.bf16 %v333_v46, %v332_v45  ;;  %v3545_v37 = vld [vmem:[%s5915_s0 + $0x130] sm:$0xf0]  ;;  %v101_v45 = vld [vmem:[%s5914_s1 + $0x2c8] sm:$0xff] }
  0x27   :  { %1857 = vmatmul.bf16.vlgmr.msra.gmra.mxu2 %v2786_v38  ;;  %1987 = vmatpush.bf16.msrb.mxu0 %v507_v42  ;;  %v2898_v38 = vor.u32 %v3544_v31, %v2897_v30  ;;  %v2906_v42 = vor.u32 %v3545_v37, %v2905_v35  ;;  %v329_v46 = vmax.f32 %v101_v45, 0.0  ;;  %v81_v30 = vld [vmem:[%s5914_s1 + $0x228] sm:$0xff]  ;;  %v72_v35 = vld [vmem:[%s5914_s1 + $0x1e0] sm:$0xff]  ;;  %v71_v45 = vld [vmem:[%s5914_s1 + $0x1d8] sm:$0xff] }
  0x28   :  { %2125 = vmatpush.bf16.msrb.mxu2 %v523_v28  ;;  %2056 = vmatpush.bf16.msrb.mxu1 %v515_v44  ;;  %v520_v28 = vpack.c.bf16 %v345_v25, %v344_v20  ;;  %v100_v44 = vld [vmem:[%s5914_s1 + $0x2c0] sm:$0xff]  ;;  %v74_v20 = vld [vmem:[%s5914_s1 + $0x1f0] sm:$0xff]  ;;  %v75_v25 = vld [vmem:[%s5914_s1 + $0x1f8] sm:$0xff] }
  0x2a   :  { %3696 = vmatpush.bf16.msrb.mxu3 %v3786_v36  ;;  %v3529_v36 = vld [vmem:[%s5915_s0 + $0xb0] sm:$0xf0] }
  0x2b   :  { %1988 = vmatpush.bf16.msrb.mxu0 %v506_v48  ;;  %v2838_v12 = vor.u32 %v3529_v36, %v2837_v6  ;;  %v99_v6 = vld [vmem:[%s5914_s1 + $0x2b8] sm:$0xff] }
  0x2c   :  { %2126 = vmatpush.bf16.msrb.mxu2 %v522_v47  ;;  %2057 = vmatpush.bf16.msrb.mxu1 %v514_v22  ;;  %v115_v47 = vld [vmem:[%s5914_s1 + $0x338] sm:$0xff]  ;;  %v2957_v22 = vld [vmem:[%s5915_s0 + $0x168] sm:$0xf]  ;;  %v327_v7 = vmax.f32 %v99_v6, 0.0 }
  0x2d   :  { %v343_v49 = vmax.f32 %v115_v47, 0.0  ;;  %v111_v6 = vld [vmem:[%s5914_s1 + $0x318] sm:$0xff] }
  0x2e   :  { %3697 = vmatpush.bf16.msrb.mxu3 %v3816_v55  ;;  %v3522_v55 = vld [vmem:[%s5915_s0 + $0x7c] sm:$0xf] }
  0x2f   :  { %1989 = vmatpush.bf16.msrb.mxu0 %v505_v3  ;;  %v2842_v16 = vor.u32 %v3522_v55, %v2839_v9  ;;  %v83_v3 = vld [vmem:[%s5914_s1 + $0x238] sm:$0xff]  ;;  %v3017_v9 = vld [vmem:[%s5915_s0 + $0x1e0] sm:$0xf] }
  0x30   :  { %2127 = vmatpush.bf16.msrb.mxu2 %v521_v1  ;;  %2058 = vmatpush.bf16.msrb.mxu1 %v513_v4  ;;  %v82_v1 = vld [vmem:[%s5914_s1 + $0x230] sm:$0xff] }
  0x31   :  { %v310_v4 = vmax.f32 %v82_v1, 0.0  ;;  %v68_v1 = vld [vmem:[%s5914_s1 + $0x1c0] sm:$0xff] }
  0x32   :  { %3698 = vmatpush.bf16.msrb.mxu3 %v3832_v2  ;;  %v84_v2 = vld [vmem:[%s5914_s1 + $0x240] sm:$0xff] }
  0x33   :  { %v312_v26 = vmax.f32 %v84_v2, 0.0 }
  0x34   :  { %2128 = vmatpush.bf16.msrb.mxu2 %v520_v28 }
  0x35   :  { %1724 = vmatmul.bf16.gmra.mxu0 %v2838_v12  ;;  %1769 = vmatmul.bf16.gmra.mxu3 %v3378_v15  ;;  %v3019_v12 = vld [vmem:[%s5915_s0 + $0x21c] sm:$0xf0]  ;;  %v3025_v15 = vld [vmem:[%s5915_s0 + $0x1e8] sm:$0xf] }
  0x36   :  { %3699 = vmatpush.bf16.msrb.mxu3 %v3864_v21  ;;  %1793 = vmatmul.bf16.gmra.mxu1 %v2842_v16  ;;  %v85_v21 = vld [vmem:[%s5914_s1 + $0x248] sm:$0xff]  ;;  %v3575_v16 = vld [vmem:[%s5915_s0 + $0x220] sm:$0xf0]  ;;  %v3022_v19 = vor.u32 %v3567_v10, %v3019_v12  ;;  %v94_v10 = vld [vmem:[%s5914_s1 + $0x290] sm:$0xff] }
  0x37   :  { %1862 = vmatmul.bf16.gmra.mxu2 %v2846_v17  ;;  %v313_v27 = vmax.f32 %v85_v21, 0.0  ;;  %v3026_v2 = vor.u32 %v3575_v16, %v3025_v15  ;;  %v302_v21 = vmax.f32 %v74_v20, 0.0  ;;  %v322_v15 = vmax.f32 %v94_v10, 0.0 }
  0x39   :  { %v504_v29 = vpack.c.bf16 %v313_v27, %v312_v26  ;;  %v303_v26 = vmax.f32 %v75_v25, 0.0  ;;  %v113_v27 = vld [vmem:[%s5914_s1 + $0x328] sm:$0xff] }
  0x3a   :  { %3700 = vmatpush.bf16.msrb.mxu3 %v3880_v34  ;;  %v3679_v34 = vld [vmem:[%s5915_s0 + $0x560] sm:$0xf0]  ;;  %v341_v31 = vmax.f32 %v113_v27, 0.0  ;;  %v3597_v27 = vld [vmem:[%s5915_s0 + $0x2d4] sm:$0xf] }
  0x3b   :  { %1990 = vmatpush.bf16.msrb.mxu0 %v504_v29  ;;  %v3438_v39 = vor.u32 %v3679_v34, %v3437_v32  ;;  %v80_v29 = vld [vmem:[%s5914_s1 + $0x220] sm:$0xff]  ;;  %v309_v34 = vmax.f32 %v81_v30, 0.0  ;;  %v499_v37 = vpack.c.bf16 %v303_v26, %v302_v21  ;;  %v3137_v21 = vld [vmem:[%s5915_s0 + $0x2d0] sm:$0xf]  ;;  %v3604_v26 = vld [vmem:[%s5915_s0 + $0x308] sm:$0xf0] }
  0x3c   :  { %v308_v32 = vmax.f32 %v80_v29, 0.0  ;;  %v3650_v29 = vld [vmem:[%s5915_s0 + $0x478] sm:$0xf0]  ;;  %v3139_v30 = vld [vmem:[%s5915_s0 + $0x30c] sm:$0xf0] }
  0x3e   :  { %3701 = vmatpush.bf16.msrb.mxu3 %v3912_v59  ;;  %v3537_v59 = vld [vmem:[%s5915_s0 + $0xf4] sm:$0xf] }
  0x3f   :  { %v2902_v41 = vor.u32 %v3537_v59, %v2899_v33  ;;  %v96_v59 = vld [vmem:[%s5914_s1 + $0x2a0] sm:$0xff]  ;;  %v97_v33 = vld [vmem:[%s5914_s1 + $0x2a8] sm:$0xff] }
  0x42   :  { %3702 = vmatpush.bf16.msrb.mxu3 %v3949_v13  ;;  %v114_v13 = vld [vmem:[%s5914_s1 + $0x330] sm:$0xff] }
  0x43   :  { %v342_v48 = vmax.f32 %v114_v13, 0.0 }
  0x45   :  { %1729 = vmatmul.bf16.gmra.mxu0 %v2898_v38  ;;  %1774 = vmatmul.bf16.gmra.mxu3 %v3438_v39  ;;  %v519_v51 = vpack.c.bf16 %v343_v49, %v342_v48  ;;  %v324_v38 = vmax.f32 %v96_v59, 0.0  ;;  %v325_v39 = vmax.f32 %v97_v33, 0.0  ;;  %v299_v49 = vmax.f32 %v71_v45, 0.0  ;;  %v63_v45 = vld [vmem:[%s5914_s1 + $0x198] sm:$0xff] }
  0x46   :  { %3703 = vmatpush.bf16.msra.mxu3 %v3764_v23  ;;  %1798 = vmatmul.bf16.gmra.mxu1 %v2902_v41  ;;  %v328_v23 = vmax.f32 %v100_v44, 0.0  ;;  %v73_v41 = vld [vmem:[%s5914_s1 + $0x1e8] sm:$0xff]  ;;  %v70_v44 = vld [vmem:[%s5914_s1 + $0x1d0] sm:$0xff]  ;;  %v3142_v33 = vor.u32 %v3597_v27, %v3139_v30 }
  0x47   :  { %1867 = vmatmul.bf16.gmra.mxu2 %v2906_v42  ;;  %v300_v42 = vmax.f32 %v72_v35, 0.0  ;;  %v510_v47 = vpack.c.bf16 %v325_v39, %v324_v38  ;;  %v298_v48 = vmax.f32 %v70_v44, 0.0  ;;  %v65_v38 = vld [vmem:[%s5914_s1 + $0x1a8] sm:$0xff]  ;;  %v62_v44 = vld [vmem:[%s5914_s1 + $0x190] sm:$0xff] }
  0x48   :  { %v512_v50 = vpack.c.bf16 %v329_v46, %v328_v23  ;;  %2129 = vmatpush.bf16.msrb.mxu2 %v519_v51  ;;  %v502_v23 = vpack.c.bf16 %v309_v34, %v308_v32  ;;  %v301_v46 = vmax.f32 %v73_v41, 0.0  ;;  %v3077_v51 = vld [vmem:[%s5915_s0 + $0x258] sm:$0xf]  ;;  %v3605_v32 = vld [vmem:[%s5915_s0 + $0x310] sm:$0xf0]  ;;  %v3138_v34 = vor.u32 %v3604_v26, %v3137_v21 }
  0x49   :  { %v497_v58 = vpack.c.bf16 %v299_v49, %v298_v48  ;;  %v293_v41 = vmax.f32 %v65_v38, 0.0  ;;  %v3197_v49 = vld [vmem:[%s5915_s0 + $0x348] sm:$0xf]  ;;  %v154_v21 = vld [vmem:[%s5914_s1 + $0x470] sm:$0xff]  ;;  %v3627_v26 = vld [vmem:[%s5915_s0 + $0x3c4] sm:$0xf] }
  0x4a   :  { %3704 = vmatpush.bf16.msra.mxu3 %v3797_v43  ;;  %2059 = vmatpush.bf16.msrb.mxu1 %v512_v50  ;;  %v3559_v43 = vld [vmem:[%s5915_s0 + $0x1a0] sm:$0xf0]  ;;  %v498_v50 = vpack.c.bf16 %v301_v46, %v300_v42  ;;  %v291_v46 = vmax.f32 %v63_v45, 0.0  ;;  %v382_v30 = vmax.f32 %v154_v21, 0.0  ;;  %v3265_v38 = vld [vmem:[%s5915_s0 + $0x3c8] sm:$0xf] }
  0x4b   :  { %v2958_v61 = vor.u32 %v3559_v43, %v2957_v22  ;;  %v3589_v22 = vld [vmem:[%s5915_s0 + $0x290] sm:$0xf0]  ;;  %v3582_v43 = vld [vmem:[%s5915_s0 + $0x25c] sm:$0xf]  ;;  %v169_v21 = vld [vmem:[%s5914_s1 + $0x4e8] sm:$0xff] }
  0x4e   :  { %3705 = vmatpush.bf16.msra.mxu3 %v3818_v56  ;;  %v3319_v56 = vld [vmem:[%s5915_s0 + $0x474] sm:$0xf0] }
  0x4f   :  { %v3322_v62 = vor.u32 %v3642_v53, %v3319_v56  ;;  %v3439_v53 = vld [vmem:[%s5915_s0 + $0x564] sm:$0xf0]  ;;  %v3079_v56 = vld [vmem:[%s5915_s0 + $0x294] sm:$0xf0] }
  0x52   :  { %3706 = vmatpush.bf16.msra.mxu3 %v3839_v5  ;;  %v98_v5 = vld [vmem:[%s5914_s1 + $0x2b0] sm:$0xff] }
  0x53   :  { %v326_v36 = vmax.f32 %v98_v5, 0.0  ;;  %v110_v5 = vld [vmem:[%s5914_s1 + $0x310] sm:$0xff] }
  0x55   :  { %1734 = vmatmul.bf16.gmra.mxu0 %v2958_v61  ;;  %1833 = vmatmul.bf16.vlgmr.msrb.gmra.mxu3 %v3322_v62  ;;  %v511_v55 = vpack.c.bf16 %v327_v7, %v326_v36  ;;  %v3078_v61 = vor.u32 %v3589_v22, %v3077_v51  ;;  %v3442_v62 = vor.u32 %v3672_v52, %v3439_v53  ;;  %v338_v36 = vmax.f32 %v110_v5, 0.0  ;;  %v78_v7 = vld [vmem:[%s5914_s1 + $0x210] sm:$0xff]  ;;  %v3385_v51 = vld [vmem:[%s5915_s0 + $0x4b8] sm:$0xf]  ;;  %v77_v52 = vld [vmem:[%s5914_s1 + $0x208] sm:$0xff] }
  0x56   :  { %3707 = vmatpush.bf16.msra.mxu3 %v3866_v24  ;;  %1803 = vmatmul.bf16.gmra.mxu1 %v2962_v63  ;;  %v311_v24 = vmax.f32 %v83_v3, 0.0  ;;  %v3082_v63 = vor.u32 %v3582_v43, %v3079_v56  ;;  %v69_v3 = vld [vmem:[%s5914_s1 + $0x1c8] sm:$0xff]  ;;  %v76_v43 = vld [vmem:[%s5914_s1 + $0x200] sm:$0xff] }
  0x57   :  { %1872 = vmatmul.bf16.gmra.mxu2 %v2966_v0  ;;  %2060 = vmatpush.bf16.msrb.mxu1 %v511_v55  ;;  %v3086_v0 = vor.u32 %v3590_v57, %v3085_v54  ;;  %v339_v55 = vmax.f32 %v111_v6, 0.0  ;;  %v92_v53 = vld [vmem:[%s5914_s1 + $0x280] sm:$0xff]  ;;  %v3612_v56 = vld [vmem:[%s5915_s0 + $0x34c] sm:$0xf]  ;;  %v304_v57 = vmax.f32 %v76_v43, 0.0 }
  0x58   :  { %v503_v8 = vpack.c.bf16 %v311_v24, %v310_v4  ;;  %v296_v4 = vmax.f32 %v68_v1, 0.0  ;;  %v297_v24 = vmax.f32 %v69_v3, 0.0  ;;  %v3665_v1 = vld [vmem:[%s5915_s0 + $0x4f0] sm:$0xf0]  ;;  %v3199_v6 = vld [vmem:[%s5915_s0 + $0x384] sm:$0xf0] }
  0x59   :  { %v3386_v10 = vor.u32 %v3665_v1, %v3385_v51  ;;  %v2801_v1 = vld [vmem:[%s5915_s0 + $0x18] sm:$0xf] }
  0x5a   :  { %3708 = vmatpush.bf16.msra.mxu3 %v3893_v40  ;;  %1991 = vmatpush.bf16.msrb.mxu0 %v503_v8  ;;  %v3574_v40 = vld [vmem:[%s5915_s0 + $0x218] sm:$0xf0]  ;;  %v496_v12 = vpack.c.bf16 %v297_v24, %v296_v4 }
  0x5b   :  { %v3018_v17 = vor.u32 %v3574_v40, %v3017_v9  ;;  %2061 = vmatpush.bf16.msrb.mxu1 %v510_v47  ;;  %v79_v8 = vld [vmem:[%s5914_s1 + $0x218] sm:$0xff]  ;;  %v306_v9 = vmax.f32 %v78_v7, 0.0  ;;  %v109_v47 = vld [vmem:[%s5914_s1 + $0x308] sm:$0xff] }
  0x5c   :  { %v307_v40 = vmax.f32 %v79_v8, 0.0  ;;  %v337_v22 = vmax.f32 %v109_v47, 0.0  ;;  %v3620_v7 = vld [vmem:[%s5915_s0 + $0x388] sm:$0xf0] }
  0x5e   :  { %3709 = vmatpush.bf16.msra.mxu3 %v3914_v60  ;;  %v3379_v60 = vld [vmem:[%s5915_s0 + $0x4ec] sm:$0xf0]  ;;  %1992 = vmatpush.bf16.msrb.mxu0 %v502_v23  ;;  %v290_v23 = vmax.f32 %v62_v44, 0.0 }
  0x5f   :  { %v3382_v18 = vor.u32 %v3657_v11, %v3379_v60  ;;  %v95_v11 = vld [vmem:[%s5914_s1 + $0x298] sm:$0xff]  ;;  %v66_v60 = vld [vmem:[%s5914_s1 + $0x1b0] sm:$0xff] }
  0x60   :  { %v323_v16 = vmax.f32 %v95_v11, 0.0  ;;  %v493_v54 = vpack.c.bf16 %v291_v46, %v290_v23  ;;  %v3202_v11 = vor.u32 %v3612_v56, %v3199_v6  ;;  %v136_v56 = vld [vmem:[%s5914_s1 + $0x3e0] sm:$0xff] }
  0x62   :  { %3710 = vmatpush.bf16.msra.mxu3 %v3951_v14  ;;  %v112_v14 = vld [vmem:[%s5914_s1 + $0x320] sm:$0xff]  ;;  %v509_v25 = vpack.c.bf16 %v323_v16, %v322_v15  ;;  %v139_v15 = vld [vmem:[%s5914_s1 + $0x3f8] sm:$0xff] }
  0x63   :  { %v340_v28 = vmax.f32 %v112_v14, 0.0 }
  0x64   :  { %2062 = vmatpush.bf16.msrb.mxu1 %v509_v25  ;;  %v186_v25 = vld [vmem:[%s5914_s1 + $0x570] sm:$0xff] }
  0x65   :  { %1739 = vmatmul.bf16.gmra.mxu0 %v3018_v17  ;;  %1838 = vmatmul.bf16.gmra.mxu3 %v3382_v18  ;;  %v518_v13 = vpack.c.bf16 %v341_v31, %v340_v28  ;;  %v67_v17 = vld [vmem:[%s5914_s1 + $0x1b8] sm:$0xff]  ;;  %v294_v18 = vmax.f32 %v66_v60, 0.0  ;;  %v3325_v28 = vld [vmem:[%s5915_s0 + $0x440] sm:$0xf]  ;;  %v414_v27 = vmax.f32 %v186_v25, 0.0 }
  0x66   :  { %1808 = vmatmul.bf16.gmra.mxu1 %v3022_v19  ;;  %1918 = vmatpush.bf16.msrb.mxu3 %v499_v37  ;;  %v517_v19 = vpack.c.bf16 %v339_v55, %v338_v36  ;;  %v295_v20 = vmax.f32 %v67_v17, 0.0  ;;  %v3145_v31 = vld [vmem:[%s5915_s0 + $0x2d8] sm:$0xf]  ;;  %v3326_v59 = vor.u32 %v3650_v29, %v3325_v28  ;;  %v64_v37 = vld [vmem:[%s5914_s1 + $0x1a0] sm:$0xff]  ;;  %v3205_v36 = vld [vmem:[%s5915_s0 + $0x350] sm:$0xf] }
  0x67   :  { %1877 = vmatmul.bf16.gmra.mxu2 %v3026_v2  ;;  %v501_v2 = vpack.c.bf16 %v307_v40, %v306_v9  ;;  %v3146_v35 = vor.u32 %v3605_v32, %v3145_v31  ;;  %v292_v39 = vmax.f32 %v64_v37, 0.0  ;;  %v3206_v60 = vor.u32 %v3620_v7, %v3205_v36  ;;  %v155_v29 = vld [vmem:[%s5914_s1 + $0x478] sm:$0xff]  ;;  %v170_v31 = vld [vmem:[%s5914_s1 + $0x4f0] sm:$0xff]  ;;  %v3259_v37 = vld [vmem:[%s5915_s0 + $0x3fc] sm:$0xf0] }
  0x68   :  { %2130 = vmatpush.bf16.msrb.mxu2 %v518_v13  ;;  %v495_v14 = vpack.c.bf16 %v295_v20, %v294_v18  ;;  %v108_v13 = vld [vmem:[%s5914_s1 + $0x300] sm:$0xff]  ;;  %v367_v17 = vmax.f32 %v139_v15, 0.0  ;;  %v3445_v20 = vld [vmem:[%s5915_s0 + $0x530] sm:$0xf]  ;;  %v171_v32 = vld [vmem:[%s5914_s1 + $0x4f8] sm:$0xff]  ;;  %v3262_v46 = vor.u32 %v3627_v26, %v3259_v37 }
  0x69   :  { %1993 = vmatpush.bf16.msrb.mxu0 %v501_v2  ;;  %v494_v42 = vpack.c.bf16 %v293_v41, %v292_v39  ;;  %v336_v48 = vmax.f32 %v108_v13, 0.0  ;;  %v3634_v2 = vld [vmem:[%s5915_s0 + $0x3f8] sm:$0xf0]  ;;  %v3635_v39 = vld [vmem:[%s5915_s0 + $0x400] sm:$0xf0]  ;;  %v185_v15 = vld [vmem:[%s5914_s1 + $0x568] sm:$0xff] }
  0x6a   :  { %1919 = vmatpush.bf16.msrb.mxu3 %v498_v50  ;;  %v3619_v50 = vld [vmem:[%s5915_s0 + $0x380] sm:$0xf0]  ;;  %v3266_v47 = vor.u32 %v3635_v39, %v3265_v38  ;;  %v2847_v37 = vld [vmem:[%s5915_s0 + $0xbc] sm:$0xf0]  ;;  %v2853_v38 = vld [vmem:[%s5915_s0 + $0x88] sm:$0xf] }
  0x6b   :  { %v516_v3 = vpack.c.bf16 %v337_v22, %v336_v48  ;;  %v3198_v40 = vor.u32 %v3619_v50, %v3197_v49  ;;  %v3531_v39 = vld [vmem:[%s5915_s0 + $0xc0] sm:$0xf0] }
  0x6c   :  { %2131 = vmatpush.bf16.msrb.mxu2 %v517_v19  ;;  %v3257_v19 = vld [vmem:[%s5915_s0 + $0x3c0] sm:$0xf] }
  0x6d   :  { %v3258_v45 = vor.u32 %v3634_v2, %v3257_v19  ;;  %v153_v19 = vld [vmem:[%s5914_s1 + $0x468] sm:$0xff] }
  0x6e   :  { %1920 = vmatpush.bf16.msrb.mxu3 %v497_v58  ;;  %v305_v58 = vmax.f32 %v77_v52, 0.0  ;;  %v381_v25 = vmax.f32 %v153_v19, 0.0 }
  0x70   :  { %v500_v8 = vpack.c.bf16 %v305_v58, %v304_v57  ;;  %2132 = vmatpush.bf16.msrb.mxu2 %v516_v3  ;;  %v3508_v57 = vld [vmem:[%s5915_s0 + $0xc] sm:$0xf]  ;;  %v2787_v58 = vld [vmem:[%s5915_s0 + $0x44] sm:$0xf0]  ;;  %v3517_v3 = vld [vmem:[%s5915_s0 + $0x50] sm:$0xf0] }
  0x71   :  { %v2790_v7 = vor.u32 %v3508_v57, %v2787_v58 }
  0x72   :  { %1921 = vmatpush.bf16.msrb.mxu3 %v496_v12  ;;  %1994 = vmatpush.bf16.msrb.mxu0 %v500_v8  ;;  %v138_v12 = vld [vmem:[%s5914_s1 + $0x3f0] sm:$0xff] }
  0x73   :  { %v366_v16 = vmax.f32 %v138_v12, 0.0  ;;  %v184_v12 = vld [vmem:[%s5914_s1 + $0x560] sm:$0xff] }
  0x75   :  { %1744 = vmatmul.bf16.gmra.mxu0 %v3078_v61  ;;  %1843 = vmatmul.bf16.gmra.mxu3 %v3442_v62  ;;  %v93_v61 = vld [vmem:[%s5914_s1 + $0x288] sm:$0xff]  ;;  %v320_v62 = vmax.f32 %v92_v53, 0.0  ;;  %v531_v18 = vpack.c.bf16 %v367_v17, %v366_v16  ;;  %v412_v16 = vmax.f32 %v184_v12, 0.0  ;;  %v413_v17 = vmax.f32 %v185_v15, 0.0  ;;  %v166_v15 = vld [vmem:[%s5914_s1 + $0x4d0] sm:$0xff] }
  0x76   :  { %1813 = vmatmul.bf16.gmra.mxu1 %v3082_v63  ;;  %1922 = vmatpush.bf16.msrb.mxu3 %v495_v14  ;;  %v60_v63 = vld [vmem:[%s5914_s1 + $0x180] sm:$0xff]  ;;  %v321_v5 = vmax.f32 %v93_v61, 0.0  ;;  %v187_v14 = vld [vmem:[%s5914_s1 + $0x578] sm:$0xff]  ;;  %v364_v61 = vmax.f32 %v136_v56, 0.0  ;;  %v134_v56 = vld [vmem:[%s5914_s1 + $0x3d0] sm:$0xff]  ;;  %v394_v19 = vmax.f32 %v166_v15, 0.0 }
  0x77   :  { %1882 = vmatmul.bf16.gmra.mxu2 %v3086_v0  ;;  %v61_v0 = vld [vmem:[%s5914_s1 + $0x188] sm:$0xff]  ;;  %v288_v4 = vmax.f32 %v60_v63, 0.0  ;;  %v415_v28 = vmax.f32 %v187_v14, 0.0  ;;  %v2793_v63 = vld [vmem:[%s5915_s0 + $0x10] sm:$0xf]  ;;  %v554_v2 = vpack.c.bf16 %v413_v17, %v412_v16  ;;  %v168_v14 = vld [vmem:[%s5914_s1 + $0x4e0] sm:$0xff] }
  0x78   :  { %v289_v24 = vmax.f32 %v61_v0, 0.0  ;;  %v508_v55 = vpack.c.bf16 %v321_v5, %v320_v62  ;;  %v3516_v0 = vld [vmem:[%s5915_s0 + $0x48] sm:$0xf0]  ;;  %v3509_v5 = vld [vmem:[%s5915_s0 + $0x14] sm:$0xf]  ;;  %v362_v57 = vmax.f32 %v134_v56, 0.0 }
  0x79   :  { %v555_v41 = vpack.c.bf16 %v415_v28, %v414_v27  ;;  %v2794_v8 = vor.u32 %v3516_v0, %v2793_v63  ;;  %v396_v27 = vmax.f32 %v168_v14, 0.0  ;;  %v397_v28 = vmax.f32 %v169_v21, 0.0  ;;  %v167_v16 = vld [vmem:[%s5914_s1 + $0x4d8] sm:$0xff]  ;;  %v2921_v17 = vld [vmem:[%s5915_s0 + $0x108] sm:$0xf] }
  0x7a   :  { %1923 = vmatpush.bf16.msrb.mxu3 %v494_v42  ;;  %v492_v9 = vpack.c.bf16 %v289_v24, %v288_v4  ;;  %2063 = vmatpush.bf16.msrb.mxu1 %v508_v55  ;;  %v2795_v4 = vld [vmem:[%s5915_s0 + $0x4c] sm:$0xf0]  ;;  %v2915_v14 = vld [vmem:[%s5915_s0 + $0x13c] sm:$0xf0]  ;;  %v2973_v56 = vld [vmem:[%s5915_s0 + $0x178] sm:$0xf] }
  0x7b   :  { %2401 = vmatpush.bf16.msra.mxu2 %v555_v41  ;;  %v2861_v41 = vld [vmem:[%s5915_s0 + $0x90] sm:$0xf] }
  0x7e   :  { %1924 = vmatpush.bf16.msrb.mxu3 %v493_v54  ;;  %v137_v54 = vld [vmem:[%s5914_s1 + $0x3e8] sm:$0xff] }
  0x7f   :  { %v365_v62 = vmax.f32 %v137_v54, 0.0  ;;  %2402 = vmatpush.bf16.msra.mxu2 %v554_v2  ;;  %v135_v54 = vld [vmem:[%s5914_s1 + $0x3d8] sm:$0xff]  ;;  %v395_v2 = vmax.f32 %v167_v16, 0.0  ;;  %v148_v16 = vld [vmem:[%s5914_s1 + $0x440] sm:$0xff] }
  0x80   :  { %v363_v58 = vmax.f32 %v135_v54, 0.0  ;;  %v3561_v54 = vld [vmem:[%s5915_s0 + $0x1b0] sm:$0xf0] }
  0x81   :  { %v530_v24 = vpack.c.bf16 %v365_v62, %v364_v61 }
  0x82   :  { %1925 = vmatpush.bf16.msrb.mxu3 %v492_v9  ;;  %v529_v63 = vpack.c.bf16 %v363_v58, %v362_v57  ;;  %v2981_v57 = vld [vmem:[%s5915_s0 + $0x180] sm:$0xf]  ;;  %v3562_v58 = vld [vmem:[%s5915_s0 + $0x1b8] sm:$0xf0] }
  0x85   :  { %1749 = vmatmul.bf16.gmra.mxu0 %v3138_v34  ;;  %1902 = vmatmul.bf16.vlgmr.msra.gmra.mxu3 %v3326_v59  ;;  %v3680_v34 = vld [vmem:[%s5915_s0 + $0x568] sm:$0xf0]  ;;  %v383_v59 = vmax.f32 %v155_v29, 0.0 }
  0x86   :  { %1818 = vmatmul.bf16.gmra.mxu1 %v3142_v33  ;;  %2194 = vmatpush.bf16.msra.mxu3 %v531_v18  ;;  %v398_v33 = vmax.f32 %v170_v31, 0.0  ;;  %v3446_v13 = vor.u32 %v3680_v34, %v3445_v20  ;;  %v152_v18 = vld [vmem:[%s5914_s1 + $0x460] sm:$0xff]  ;;  %v546_v34 = vpack.c.bf16 %v397_v28, %v396_v27 }
  0x87   :  { %1887 = vmatmul.bf16.gmra.mxu2 %v3146_v35  ;;  %v399_v35 = vmax.f32 %v171_v32, 0.0  ;;  %v539_v42 = vpack.c.bf16 %v383_v59, %v382_v30  ;;  %v380_v20 = vmax.f32 %v152_v18, 0.0 }
  0x89   :  { %v547_v44 = vpack.c.bf16 %v399_v35, %v398_v33  ;;  %2263 = vmatpush.bf16.msra.mxu0 %v539_v42  ;;  %v538_v30 = vpack.c.bf16 %v381_v25, %v380_v20  ;;  %v3523_v35 = vld [vmem:[%s5915_s0 + $0x84] sm:$0xf]  ;;  %v3532_v42 = vld [vmem:[%s5915_s0 + $0xc8] sm:$0xf0] }
  0x8a   :  { %2195 = vmatpush.bf16.msra.mxu3 %v530_v24  ;;  %v2907_v24 = vld [vmem:[%s5915_s0 + $0x134] sm:$0xf0]  ;;  %v3547_v20 = vld [vmem:[%s5915_s0 + $0x140] sm:$0xf0] }
  0x8b   :  { %2332 = vmatpush.bf16.msra.mxu1 %v547_v44  ;;  %v3524_v44 = vld [vmem:[%s5915_s0 + $0x8c] sm:$0xf]  ;;  %v3539_v25 = vld [vmem:[%s5915_s0 + $0x104] sm:$0xf] }
  0x8d   :  { %2264 = vmatpush.bf16.msra.mxu0 %v538_v30 }
  0x8e   :  { %2196 = vmatpush.bf16.msra.mxu3 %v529_v63  ;;  %v2975_v63 = vld [vmem:[%s5915_s0 + $0x1b4] sm:$0xf0] }
  0x8f   :  { %2333 = vmatpush.bf16.msra.mxu1 %v546_v34 }
  0x95   :  { %1754 = vmatmul.bf16.gmra.mxu0 %v3198_v40  ;;  %1907 = vmatmul.bf16.gmra.mxu3 %v3386_v10  ;;  %v2802_v40 = vor.u32 %v3517_v3, %v2801_v1  ;;  %v2798_v10 = vor.u32 %v3509_v5, %v2795_v4  ;;  %v3538_v4 = vld [vmem:[%s5915_s0 + $0xfc] sm:$0xf] }
  0x96   :  { %1823 = vmatmul.bf16.gmra.mxu1 %v3202_v11 }
  0x97   :  { %1892 = vmatmul.bf16.gmra.mxu2 %v3206_v60 }
  0xa2   :  { %v1720_v23 = vpop.f32.mrf.mxu0 }
  0xa3   :  { %v1789_v48 = vpop.f32.mrf.mxu1 }
  0xa4   :  { %v1790_v49 = vadd.f32 %v1789_v48, %v1720_v23 }
  0xa5   :  { %1759 = vmatmul.bf16.gmra.mxu0 %v3258_v45  ;;  %1912 = vmatmul.bf16.gmra.mxu3 %v3446_v13  ;;  %v2855_v45 = vld [vmem:[%s5915_s0 + $0xc4] sm:$0xf0] }
  0xa6   :  { %1828 = vmatmul.bf16.gmra.mxu1 %v3262_v46  ;;  %v2850_v46 = vor.u32 %v3523_v35, %v2847_v37  ;;  %v2922_v35 = vor.u32 %v3547_v20, %v2921_v17  ;;  %v2918_v37 = vor.u32 %v3539_v25, %v2915_v14  ;;  %v149_v17 = vld [vmem:[%s5914_s1 + $0x448] sm:$0xff]  ;;  %v164_v20 = vld [vmem:[%s5914_s1 + $0x4c0] sm:$0xff] }
  0xa7   :  { %1897 = vmatmul.bf16.gmra.mxu2 %v3266_v47  ;;  %v2854_v47 = vor.u32 %v3531_v39, %v2853_v38  ;;  %v165_v25 = vld [vmem:[%s5914_s1 + $0x4c8] sm:$0xff] }
  0xa8   :  { %v4366_v50 = vpop.f32.mrf.mxu3 }
  0xaa   :  { %v1858_v51 = vpop.f32.mrf.mxu2  ;;  %v1722_v43 = vpop.f32.mrf.mxu0 }
  0xab   :  { %v4368_v22 = vadd.f32 %v1858_v51, %v1790_v49  ;;  %v1791_v52 = vpop.f32.mrf.mxu1  ;;  %v2862_v51 = vor.u32 %v3532_v42, %v2861_v41 }
  0xac   :  { %v1792_v53 = vadd.f32 %v1791_v52, %v1722_v43  ;;  %v2858_v43 = vor.u32 %v3524_v44, %v2855_v45 }
  0xb0   :  { %v4400_v6 = vpop.f32.mrf.mxu3 }
  0xb2   :  { %v1860_v36 = vpop.f32.mrf.mxu2  ;;  %v1725_v9 = vpop.f32.mrf.mxu0 }
  0xb3   :  { %v4402_v55 = vadd.f32 %v1860_v36, %v1792_v53  ;;  %v1794_v11 = vpop.f32.mrf.mxu1  ;;  %v2913_v36 = vld [vmem:[%s5915_s0 + $0x100] sm:$0xf] }
  0xb4   :  { %v1795_v60 = vadd.f32 %v1794_v11, %v1725_v9  ;;  %v183_v9 = vld [vmem:[%s5914_s1 + $0x558] sm:$0xff] }
  0xb5   :  { %1926 = vmatmul.bf16.vlgmr.msrb.gmra.mxu3 %v2790_v7  ;;  %1995 = vmatmul.bf16.vlgmr.msrb.gmra.mxu0 %v2794_v8  ;;  %v3546_v7 = vld [vmem:[%s5915_s0 + $0x138] sm:$0xf0]  ;;  %v182_v8 = vld [vmem:[%s5914_s1 + $0x550] sm:$0xff]  ;;  %v411_v11 = vmax.f32 %v183_v9, 0.0  ;;  %v2982_v9 = vor.u32 %v3562_v58, %v2981_v57 }
  0xb6   :  { %2064 = vmatmul.bf16.vlgmr.msrb.gmra.mxu1 %v2798_v10  ;;  %v410_v10 = vmax.f32 %v182_v8, 0.0  ;;  %v2914_v34 = vor.u32 %v3546_v7, %v2913_v36  ;;  %v2974_v36 = vor.u32 %v3561_v54, %v2973_v56 }
  0xb7   :  { %2133 = vmatmul.bf16.vlgmr.msrb.gmra.mxu2 %v2802_v40  ;;  %v150_v40 = vld [vmem:[%s5914_s1 + $0x450] sm:$0xff] }
  0xb8   :  { %v4422_v26 = vpop.f32.mrf.mxu3  ;;  %v378_v12 = vmax.f32 %v150_v40, 0.0  ;;  %v553_v21 = vpack.c.bf16 %v411_v11, %v410_v10 }
  0xba   :  { %v1863_v29 = vpop.f32.mrf.mxu2  ;;  %v1727_v32 = vpop.f32.mrf.mxu0  ;;  %2403 = vmatpush.bf16.msra.mxu2 %v553_v21  ;;  %v392_v21 = vmax.f32 %v164_v20, 0.0  ;;  %v147_v20 = vld [vmem:[%s5914_s1 + $0x438] sm:$0xff] }
  0xbb   :  { %v4424_v31 = vadd.f32 %v1863_v29, %v1795_v60  ;;  %v1796_v59 = vpop.f32.mrf.mxu1  ;;  %v151_v60 = vld [vmem:[%s5914_s1 + $0x458] sm:$0xff]  ;;  %v545_v29 = vpack.c.bf16 %v395_v2, %v394_v19  ;;  %v376_v19 = vmax.f32 %v148_v16, 0.0  ;;  %v377_v2 = vmax.f32 %v149_v17, 0.0  ;;  %v178_v16 = vld [vmem:[%s5914_s1 + $0x530] sm:$0xff] }
  0xbc   :  { %v1797_v33 = vadd.f32 %v1796_v59, %v1727_v32  ;;  %v379_v18 = vmax.f32 %v151_v60, 0.0  ;;  %v2910_v32 = vor.u32 %v3538_v4, %v2907_v24  ;;  %v180_v60 = vld [vmem:[%s5914_s1 + $0x540] sm:$0xff]  ;;  %v179_v17 = vld [vmem:[%s5914_s1 + $0x538] sm:$0xff] }
  0xbd   :  { %2334 = vmatpush.bf16.msra.mxu1 %v545_v29 }
  0xbe   :  { %v537_v28 = vpack.c.bf16 %v379_v18, %v378_v12  ;;  %v408_v12 = vmax.f32 %v180_v60, 0.0 }
  0xc0   :  { %v4450_v13 = vpop.f32.mrf.mxu3  ;;  %2265 = vmatpush.bf16.msra.mxu0 %v537_v28  ;;  %v393_v28 = vmax.f32 %v165_v25, 0.0 }
  0xc2   :  { %v1865_v23 = vpop.f32.mrf.mxu2  ;;  %v1730_v49 = vpop.f32.mrf.mxu0 }
  0xc3   :  { %v4452_v48 = vadd.f32 %v1865_v23, %v1797_v33  ;;  %v1799_v52 = vpop.f32.mrf.mxu1 }
  0xc4   :  { %v1800_v53 = vadd.f32 %v1799_v52, %v1730_v49  ;;  %v132_v49 = vld [vmem:[%s5914_s1 + $0x3c0] sm:$0xff] }
  0xc5   :  { %1931 = vmatmul.bf16.gmra.mxu3 %v2850_v46  ;;  %2000 = vmatmul.bf16.gmra.mxu0 %v2854_v47  ;;  %v360_v52 = vmax.f32 %v132_v49, 0.0  ;;  %v3035_v49 = vld [vmem:[%s5915_s0 + $0x22c] sm:$0xf0] }
  0xc6   :  { %2069 = vmatmul.bf16.gmra.mxu1 %v2858_v43  ;;  %v3553_v43 = vld [vmem:[%s5915_s0 + $0x174] sm:$0xf] }
  0xc7   :  { %2138 = vmatmul.bf16.gmra.mxu2 %v2862_v51  ;;  %v133_v51 = vld [vmem:[%s5914_s1 + $0x3c8] sm:$0xff] }
  0xc8   :  { %v4460_v61 = vpop.f32.mrf.mxu3 }
  0xca   :  { %v1868_v62 = vpop.f32.mrf.mxu2  ;;  %v1732_v1 = vpop.f32.mrf.mxu0 }
  0xcb   :  { %v4462_v0 = vadd.f32 %v1868_v62, %v1800_v53  ;;  %v1801_v3 = vpop.f32.mrf.mxu1  ;;  %v361_v53 = vmax.f32 %v133_v51, 0.0  ;;  %v3554_v62 = vld [vmem:[%s5915_s0 + $0x17c] sm:$0xf] }
  0xcc   :  { %v1802_v5 = vadd.f32 %v1801_v3, %v1732_v1  ;;  %v2978_v40 = vor.u32 %v3554_v62, %v2975_v63 }
  0xcd   :  { %v528_v1 = vpack.c.bf16 %v361_v53, %v360_v52 }
  0xcf   :  { %2197 = vmatpush.bf16.msra.mxu3 %v528_v1  ;;  %v130_v1 = vld [vmem:[%s5914_s1 + $0x3b0] sm:$0xff] }
  0xd0   :  { %v4506_v27 = vpop.f32.mrf.mxu3 }
  0xd2   :  { %v1870_v30 = vpop.f32.mrf.mxu2  ;;  %v1735_v33 = vpop.f32.mrf.mxu0 }
  0xd3   :  { %v4508_v59 = vadd.f32 %v1870_v30, %v1802_v5  ;;  %v1804_v38 = vpop.f32.mrf.mxu1 }
  0xd4   :  { %v1805_v39 = vadd.f32 %v1804_v38, %v1735_v33 }
  0xd5   :  { %1936 = vmatmul.bf16.gmra.mxu3 %v2910_v32  ;;  %2005 = vmatmul.bf16.gmra.mxu0 %v2914_v34  ;;  %v536_v32 = vpack.c.bf16 %v377_v2, %v376_v19  ;;  %v406_v19 = vmax.f32 %v178_v16, 0.0  ;;  %v407_v2 = vmax.f32 %v179_v17, 0.0 }
  0xd6   :  { %2074 = vmatmul.bf16.gmra.mxu1 %v2918_v37 }
  0xd7   :  { %2143 = vmatmul.bf16.gmra.mxu2 %v2922_v35  ;;  %v544_v35 = vpack.c.bf16 %v393_v28, %v392_v21  ;;  %2266 = vmatpush.bf16.msra.mxu0 %v536_v32  ;;  %v163_v21 = vld [vmem:[%s5914_s1 + $0x4b8] sm:$0xff]  ;;  %v3101_v28 = vld [vmem:[%s5915_s0 + $0x270] sm:$0xf] }
  0xd8   :  { %v1834_v41 = vpop.f32.mrf.mxu3 }
  0xd9   :  { %v4511_v42 = vadd.f32 %v1834_v41, %v4366_v50  ;;  %v2967_v50 = vld [vmem:[%s5915_s0 + $0x1ac] sm:$0xf0]  ;;  %2335 = vmatpush.bf16.msra.mxu1 %v544_v35  ;;  %v3592_v35 = vld [vmem:[%s5915_s0 + $0x2a8] sm:$0xf0] }
  0xda   :  { %v1873_v44 = vpop.f32.mrf.mxu2  ;;  %v1737_v23 = vpop.f32.mrf.mxu0  ;;  %v2970_v24 = vor.u32 %v3553_v43, %v2967_v50  ;;  %v3033_v41 = vld [vmem:[%s5915_s0 + $0x1f0] sm:$0xf] }
  0xdb   :  { %v4513_v45 = vadd.f32 %v1873_v44, %v1805_v39  ;;  %v1806_v46 = vpop.f32.mrf.mxu1  ;;  %v3568_v39 = vld [vmem:[%s5915_s0 + $0x1ec] sm:$0xf] }
  0xdc   :  { %v1807_v47 = vadd.f32 %v1806_v46, %v1737_v23  ;;  %v3576_v44 = vld [vmem:[%s5915_s0 + $0x228] sm:$0xf0]  ;;  %v3041_v23 = vld [vmem:[%s5915_s0 + $0x1f8] sm:$0xf]  ;;  %v3577_v46 = vld [vmem:[%s5915_s0 + $0x230] sm:$0xf0] }
  0xdd   :  { %v3034_v53 = vor.u32 %v3576_v44, %v3033_v41  ;;  %v3042_v57 = vor.u32 %v3577_v46, %v3041_v23 }
  0xe0   :  { %v1836_v3 = vpop.f32.mrf.mxu3 }
  0xe1   :  { %v4546_v5 = vadd.f32 %v1836_v3, %v4400_v6  ;;  %v181_v6 = vld [vmem:[%s5914_s1 + $0x548] sm:$0xff]  ;;  %v358_v3 = vmax.f32 %v130_v1, 0.0 }
  0xe2   :  { %v1875_v4 = vpop.f32.mrf.mxu2  ;;  %v1740_v8 = vpop.f32.mrf.mxu0  ;;  %v409_v15 = vmax.f32 %v181_v6, 0.0  ;;  %v3583_v6 = vld [vmem:[%s5915_s0 + $0x264] sm:$0xf] }
  0xe3   :  { %v4548_v7 = vadd.f32 %v1875_v4, %v1807_v47  ;;  %v1809_v10 = vpop.f32.mrf.mxu1  ;;  %v3569_v47 = vld [vmem:[%s5915_s0 + $0x1f4] sm:$0xf] }
  0xe4   :  { %v1810_v11 = vadd.f32 %v1809_v10, %v1740_v8  ;;  %v552_v18 = vpack.c.bf16 %v409_v15, %v408_v12  ;;  %v3038_v58 = vor.u32 %v3569_v47, %v3035_v49  ;;  %v3087_v12 = vld [vmem:[%s5915_s0 + $0x29c] sm:$0xf0]  ;;  %v3591_v15 = vld [vmem:[%s5915_s0 + $0x2a0] sm:$0xf0] }
  0xe5   :  { %1941 = vmatmul.bf16.gmra.mxu3 %v2970_v24  ;;  %2010 = vmatmul.bf16.gmra.mxu0 %v2974_v36  ;;  %v3090_v47 = vor.u32 %v3583_v6, %v3087_v12  ;;  %v3161_v6 = vld [vmem:[%s5915_s0 + $0x2e8] sm:$0xf]  ;;  %v3607_v12 = vld [vmem:[%s5915_s0 + $0x320] sm:$0xf0] }
  0xe6   :  { %2079 = vmatmul.bf16.gmra.mxu1 %v2978_v40  ;;  %2404 = vmatpush.bf16.msra.mxu2 %v552_v18  ;;  %v146_v18 = vld [vmem:[%s5914_s1 + $0x430] sm:$0xff] }
  0xe7   :  { %2148 = vmatmul.bf16.gmra.mxu2 %v2982_v9  ;;  %v374_v25 = vmax.f32 %v146_v18, 0.0 }
  0xe8   :  { %v1839_v14 = vpop.f32.mrf.mxu3 }
  0xe9   :  { %v4569_v29 = vadd.f32 %v1839_v14, %v4422_v26  ;;  %v3027_v26 = vld [vmem:[%s5915_s0 + $0x224] sm:$0xf0]  ;;  %v162_v14 = vld [vmem:[%s5914_s1 + $0x4b0] sm:$0xff] }
  0xea   :  { %v1878_v30 = vpop.f32.mrf.mxu2  ;;  %v1742_v33 = vpop.f32.mrf.mxu0  ;;  %v3030_v52 = vor.u32 %v3568_v39, %v3027_v26  ;;  %v390_v32 = vmax.f32 %v162_v14, 0.0  ;;  %v551_v39 = vpack.c.bf16 %v407_v2, %v406_v19 }
  0xeb   :  { %v4571_v34 = vadd.f32 %v1878_v30, %v1810_v11  ;;  %v1811_v37 = vpop.f32.mrf.mxu1  ;;  %v375_v30 = vmax.f32 %v147_v20, 0.0 }
  0xec   :  { %v1812_v38 = vadd.f32 %v1811_v37, %v1742_v33  ;;  %v391_v33 = vmax.f32 %v163_v21, 0.0  ;;  %v3584_v37 = vld [vmem:[%s5915_s0 + $0x26c] sm:$0xf]  ;;  %2405 = vmatpush.bf16.msra.mxu2 %v551_v39  ;;  %v3162_v21 = vor.u32 %v3607_v12, %v3161_v6  ;;  %v144_v39 = vld [vmem:[%s5914_s1 + $0x420] sm:$0xff] }
  0xed   :  { %v535_v41 = vpack.c.bf16 %v375_v30, %v374_v25  ;;  %v176_v30 = vld [vmem:[%s5914_s1 + $0x520] sm:$0xff] }
  0xee   :  { %v543_v44 = vpack.c.bf16 %v391_v33, %v390_v32  ;;  %v177_v32 = vld [vmem:[%s5914_s1 + $0x528] sm:$0xff] }
  0xef   :  { %2267 = vmatpush.bf16.msra.mxu0 %v535_v41  ;;  %v160_v41 = vld [vmem:[%s5914_s1 + $0x4a0] sm:$0xff] }
  0xf0   :  { %v1841_v51 = vpop.f32.mrf.mxu3  ;;  %2336 = vmatpush.bf16.msra.mxu1 %v543_v44  ;;  %v372_v44 = vmax.f32 %v144_v39, 0.0 }
  0xf1   :  { %v4598_v43 = vadd.f32 %v1841_v51, %v4450_v13  ;;  %v131_v13 = vld [vmem:[%s5914_s1 + $0x3b8] sm:$0xff] }
  0xf2   :  { %v1880_v50 = vpop.f32.mrf.mxu2  ;;  %v1745_v54 = vpop.f32.mrf.mxu0  ;;  %v359_v4 = vmax.f32 %v131_v13, 0.0 }
  0xf3   :  { %v4600_v56 = vadd.f32 %v1880_v50, %v1812_v38  ;;  %v1814_v62 = vpop.f32.mrf.mxu1  ;;  %v3095_v38 = vld [vmem:[%s5915_s0 + $0x2a4] sm:$0xf0] }
  0xf4   :  { %v1815_v63 = vadd.f32 %v1814_v62, %v1745_v54  ;;  %v527_v9 = vpack.c.bf16 %v359_v4, %v358_v3  ;;  %v128_v4 = vld [vmem:[%s5914_s1 + $0x3a0] sm:$0xff] }
  0xf5   :  { %1946 = vmatmul.bf16.gmra.mxu3 %v3030_v52  ;;  %2015 = vmatmul.bf16.gmra.mxu0 %v3034_v53  ;;  %v3102_v52 = vor.u32 %v3592_v35, %v3101_v28  ;;  %v3098_v53 = vor.u32 %v3584_v37, %v3095_v38  ;;  %v404_v35 = vmax.f32 %v176_v30, 0.0 }
  0xf6   :  { %2084 = vmatmul.bf16.gmra.mxu1 %v3038_v58  ;;  %2198 = vmatpush.bf16.msra.mxu3 %v527_v9  ;;  %v356_v9 = vmax.f32 %v128_v4, 0.0  ;;  %v3613_v4 = vld [vmem:[%s5915_s0 + $0x354] sm:$0xf] }
  0xf7   :  { %2153 = vmatmul.bf16.gmra.mxu2 %v3042_v57 }
  0xf8   :  { %v1844_v24 = vpop.f32.mrf.mxu3 }
  0xf9   :  { %v4609_v36 = vadd.f32 %v1844_v24, %v4460_v61  ;;  %v3093_v61 = vld [vmem:[%s5915_s0 + $0x268] sm:$0xf] }
  0xfa   :  { %v1883_v8 = vpop.f32.mrf.mxu2  ;;  %v1747_v10 = vpop.f32.mrf.mxu0  ;;  %v3094_v49 = vor.u32 %v3591_v15, %v3093_v61  ;;  %v129_v24 = vld [vmem:[%s5914_s1 + $0x3a8] sm:$0xff]  ;;  %v3599_v61 = vld [vmem:[%s5915_s0 + $0x2e4] sm:$0xf]  ;;  %v3155_v15 = vld [vmem:[%s5915_s0 + $0x31c] sm:$0xf0] }
  0xfb   :  { %v4611_v40 = vadd.f32 %v1883_v8, %v1815_v63  ;;  %v1816_v11 = vpop.f32.mrf.mxu1  ;;  %v3598_v8 = vld [vmem:[%s5915_s0 + $0x2dc] sm:$0xf]  ;;  %v3158_v28 = vor.u32 %v3599_v61, %v3155_v15 }
  0xfc   :  { %v1817_v60 = vadd.f32 %v1816_v11, %v1747_v10  ;;  %v357_v10 = vmax.f32 %v129_v24, 0.0  ;;  %v3153_v11 = vld [vmem:[%s5915_s0 + $0x2e0] sm:$0xf]  ;;  %v3207_v24 = vld [vmem:[%s5915_s0 + $0x38c] sm:$0xf0] }
  0xfd   :  { %v3210_v61 = vor.u32 %v3613_v4, %v3207_v24 }
  0xfe   :  { %v526_v16 = vpack.c.bf16 %v357_v10, %v356_v9  ;;  %v3622_v9 = vld [vmem:[%s5915_s0 + $0x398] sm:$0xf0] }
  0xff   :  { %v3614_v10 = vld [vmem:[%s5915_s0 + $0x35c] sm:$0xf] }
 0x100   :  { %v1846_v26 = vpop.f32.mrf.mxu3  ;;  %2199 = vmatpush.bf16.msra.mxu3 %v526_v16 }
 0x101   :  { %v4656_v23 = vadd.f32 %v1846_v26, %v4506_v27  ;;  %v145_v26 = vld [vmem:[%s5914_s1 + $0x428] sm:$0xff] }
 0x102   :  { %v1885_v46 = vpop.f32.mrf.mxu2  ;;  %v1750_v50 = vpop.f32.mrf.mxu0 }
 0x103   :  { %v4658_v51 = vadd.f32 %v1885_v46, %v1817_v60  ;;  %v1819_v54 = vpop.f32.mrf.mxu1  ;;  %v3606_v60 = vld [vmem:[%s5915_s0 + $0x318] sm:$0xf0]  ;;  %v373_v46 = vmax.f32 %v145_v26, 0.0 }
 0x104   :  { %v1820_v57 = vadd.f32 %v1819_v54, %v1750_v50  ;;  %v3154_v20 = vor.u32 %v3606_v60, %v3153_v11  ;;  %v3215_v11 = vld [vmem:[%s5915_s0 + $0x394] sm:$0xf0] }
 0x105   :  { %1951 = vmatmul.bf16.gmra.mxu3 %v3090_v47  ;;  %2020 = vmatmul.bf16.gmra.mxu0 %v3094_v49  ;;  %v161_v47 = vld [vmem:[%s5914_s1 + $0x4a8] sm:$0xff]  ;;  %v388_v49 = vmax.f32 %v160_v41, 0.0 }
 0x106   :  { %2089 = vmatmul.bf16.gmra.mxu1 %v3098_v53  ;;  %v3628_v41 = vld [vmem:[%s5915_s0 + $0x3cc] sm:$0xf] }
 0x107   :  { %2158 = vmatmul.bf16.gmra.mxu2 %v3102_v52  ;;  %v389_v52 = vmax.f32 %v161_v47, 0.0  ;;  %v3281_v47 = vld [vmem:[%s5915_s0 + $0x3d8] sm:$0xf] }
 0x108   :  { %v1903_v58 = vpop.f32.mrf.mxu3 }
 0x109   :  { %v4661_v62 = vadd.f32 %v1903_v58, %v4511_v42  ;;  %v3147_v42 = vld [vmem:[%s5915_s0 + $0x314] sm:$0xf0] }
 0x10a   :  { %v1888_v27 = vpop.f32.mrf.mxu2  ;;  %v1752_v1 = vpop.f32.mrf.mxu0  ;;  %v3150_v2 = vor.u32 %v3598_v8, %v3147_v42  ;;  %v3621_v8 = vld [vmem:[%s5915_s0 + $0x390] sm:$0xf0]  ;;  %v3221_v42 = vld [vmem:[%s5915_s0 + $0x360] sm:$0xf] }
 0x10b   :  { %v4663_v63 = vadd.f32 %v1888_v27, %v1820_v57  ;;  %v1821_v13 = vpop.f32.mrf.mxu1  ;;  %v534_v57 = vpack.c.bf16 %v373_v46, %v372_v44  ;;  %v3267_v44 = vld [vmem:[%s5915_s0 + $0x404] sm:$0xf0]  ;;  %v3636_v46 = vld [vmem:[%s5915_s0 + $0x408] sm:$0xf0] }
 0x10c   :  { %v1822_v3 = vadd.f32 %v1821_v13, %v1752_v1  ;;  %v542_v1 = vpack.c.bf16 %v389_v52, %v388_v49  ;;  %v3637_v49 = vld [vmem:[%s5915_s0 + $0x410] sm:$0xf0]  ;;  %v3275_v52 = vld [vmem:[%s5915_s0 + $0x40c] sm:$0xf0] }
 0x10d   :  { %2268 = vmatpush.bf16.msra.mxu0 %v534_v57  ;;  %v174_v57 = vld [vmem:[%s5914_s1 + $0x510] sm:$0xff] }
 0x10e   :  { %2337 = vmatpush.bf16.msra.mxu1 %v542_v1  ;;  %v142_v1 = vld [vmem:[%s5914_s1 + $0x410] sm:$0xff]  ;;  %v402_v4 = vmax.f32 %v174_v57, 0.0 }
 0x110   :  { %v1905_v17 = vpop.f32.mrf.mxu3 }
 0x111   :  { %v4696_v19 = vadd.f32 %v1905_v17, %v4546_v5  ;;  %v405_v5 = vmax.f32 %v177_v32, 0.0 }
 0x112   :  { %v1890_v18 = vpop.f32.mrf.mxu2  ;;  %v1755_v14 = vpop.f32.mrf.mxu0 }
 0x113   :  { %v4698_v25 = vadd.f32 %v1890_v18, %v1822_v3  ;;  %v1824_v33 = vpop.f32.mrf.mxu1  ;;  %v550_v38 = vpack.c.bf16 %v405_v5, %v404_v35  ;;  %v3222_v18 = vor.u32 %v3622_v9, %v3221_v42  ;;  %v158_v42 = vld [vmem:[%s5914_s1 + $0x490] sm:$0xff]  ;;  %v159_v9 = vld [vmem:[%s5914_s1 + $0x498] sm:$0xff] }
 0x114   :  { %v1825_v37 = vadd.f32 %v1824_v33, %v1755_v14 }
 0x115   :  { %1956 = vmatmul.bf16.gmra.mxu3 %v3150_v2  ;;  %2025 = vmatmul.bf16.gmra.mxu0 %v3154_v20  ;;  %v3218_v2 = vor.u32 %v3614_v10, %v3215_v11 }
 0x116   :  { %2094 = vmatmul.bf16.gmra.mxu1 %v3158_v28  ;;  %2406 = vmatpush.bf16.msra.mxu2 %v550_v38 }
 0x117   :  { %2163 = vmatmul.bf16.gmra.mxu2 %v3162_v21  ;;  %v126_v21 = vld [vmem:[%s5914_s1 + $0x390] sm:$0xff] }
 0x118   :  { %v1908_v50 = vpop.f32.mrf.mxu3  ;;  %v354_v30 = vmax.f32 %v126_v21, 0.0 }
 0x119   :  { %v4719_v54 = vadd.f32 %v1908_v50, %v4569_v29  ;;  %v3213_v29 = vld [vmem:[%s5915_s0 + $0x358] sm:$0xf]  ;;  %v3629_v50 = vld [vmem:[%s5915_s0 + $0x3d4] sm:$0xf] }
 0x11a   :  { %v1893_v53 = vpop.f32.mrf.mxu2  ;;  %v1757_v27 = vpop.f32.mrf.mxu0  ;;  %v3214_v15 = vor.u32 %v3621_v8, %v3213_v29  ;;  %v143_v29 = vld [vmem:[%s5914_s1 + $0x418] sm:$0xff]  ;;  %v370_v8 = vmax.f32 %v142_v1, 0.0 }
 0x11b   :  { %v4721_v58 = vadd.f32 %v1893_v53, %v1825_v37  ;;  %v1826_v13 = vpop.f32.mrf.mxu1  ;;  %v3270_v53 = vor.u32 %v3628_v41, %v3267_v44  ;;  %v3333_v41 = vld [vmem:[%s5915_s0 + $0x448] sm:$0xf]  ;;  %v3341_v44 = vld [vmem:[%s5915_s0 + $0x450] sm:$0xf] }
 0x11c   :  { %v1827_v3 = vadd.f32 %v1826_v13, %v1757_v27  ;;  %v175_v27 = vld [vmem:[%s5914_s1 + $0x518] sm:$0xff] }
 0x11d   :  { %v403_v24 = vmax.f32 %v175_v27, 0.0 }
 0x120   :  { %v1910_v60 = vpop.f32.mrf.mxu3 }
 0x121   :  { %v4748_v12 = vadd.f32 %v1910_v60, %v4598_v43  ;;  %v127_v43 = vld [vmem:[%s5914_s1 + $0x398] sm:$0xff]  ;;  %v371_v60 = vmax.f32 %v143_v29, 0.0 }
 0x122   :  { %v1895_v6 = vpop.f32.mrf.mxu2  ;;  %v1760_v17 = vpop.f32.mrf.mxu0  ;;  %v355_v32 = vmax.f32 %v127_v43, 0.0 }
 0x123   :  { %v4750_v16 = vadd.f32 %v1895_v6, %v1827_v3  ;;  %v1829_v20 = vpop.f32.mrf.mxu1  ;;  %v386_v6 = vmax.f32 %v158_v42, 0.0  ;;  %v533_v21 = vpack.c.bf16 %v371_v60, %v370_v8 }
 0x124   :  { %v1830_v14 = vadd.f32 %v1829_v20, %v1760_v17  ;;  %v525_v38 = vpack.c.bf16 %v355_v32, %v354_v30  ;;  %v549_v20 = vpack.c.bf16 %v403_v24, %v402_v4 }
 0x125   :  { %1961 = vmatmul.bf16.gmra.mxu3 %v3210_v61  ;;  %2030 = vmatmul.bf16.gmra.mxu0 %v3214_v15  ;;  %v387_v61 = vmax.f32 %v159_v9, 0.0 }
 0x126   :  { %2099 = vmatmul.bf16.gmra.mxu1 %v3218_v2  ;;  %2200 = vmatpush.bf16.msra.mxu3 %v525_v38  ;;  %v3278_v2 = vor.u32 %v3629_v50, %v3275_v52  ;;  %v3643_v38 = vld [vmem:[%s5915_s0 + $0x444] sm:$0xf]  ;;  %v125_v52 = vld [vmem:[%s5914_s1 + $0x388] sm:$0xff] }
 0x127   :  { %2168 = vmatmul.bf16.gmra.mxu2 %v3222_v18  ;;  %v3282_v18 = vor.u32 %v3637_v49, %v3281_v47  ;;  %v541_v43 = vpack.c.bf16 %v387_v61, %v386_v6  ;;  %2269 = vmatpush.bf16.msra.mxu0 %v533_v21  ;;  %v3335_v49 = vld [vmem:[%s5915_s0 + $0x484] sm:$0xf0]  ;;  %v124_v50 = vld [vmem:[%s5914_s1 + $0x380] sm:$0xff]  ;;  %v353_v27 = vmax.f32 %v125_v52, 0.0 }
 0x128   :  { %v1913_v28 = vpop.f32.mrf.mxu3  ;;  %2407 = vmatpush.bf16.msra.mxu2 %v549_v20  ;;  %v352_v57 = vmax.f32 %v124_v50, 0.0  ;;  %v173_v61 = vld [vmem:[%s5914_s1 + $0x508] sm:$0xff]  ;;  %v3666_v50 = vld [vmem:[%s5915_s0 + $0x4f8] sm:$0xf0] }
 0x129   :  { %v4759_v35 = vadd.f32 %v1913_v28, %v4609_v36  ;;  %v3273_v36 = vld [vmem:[%s5915_s0 + $0x3d0] sm:$0xf]  ;;  %2338 = vmatpush.bf16.msra.mxu1 %v541_v43  ;;  %v401_v20 = vmax.f32 %v173_v61, 0.0  ;;  %v156_v43 = vld [vmem:[%s5914_s1 + $0x480] sm:$0xff]  ;;  %v3401_v52 = vld [vmem:[%s5915_s0 + $0x4c8] sm:$0xf] }
 0x12a   :  { %v1898_v33 = vpop.f32.mrf.mxu2  ;;  %v1762_v37 = vpop.f32.mrf.mxu0  ;;  %v3274_v3 = vor.u32 %v3636_v46, %v3273_v36  ;;  %v3652_v36 = vld [vmem:[%s5915_s0 + $0x488] sm:$0xf0]  ;;  %v524_v42 = vpack.c.bf16 %v353_v27, %v352_v57  ;;  %v3667_v57 = vld [vmem:[%s5915_s0 + $0x500] sm:$0xf0] }
 0x12b   :  { %v4761_v5 = vadd.f32 %v1898_v33, %v1830_v14  ;;  %v1831_v39 = vpop.f32.mrf.mxu1  ;;  %v3644_v46 = vld [vmem:[%s5915_s0 + $0x44c] sm:$0xf]  ;;  %v3342_v29 = vor.u32 %v3652_v36, %v3341_v44  ;;  %v3659_v27 = vld [vmem:[%s5915_s0 + $0x4c4] sm:$0xf] }
 0x12c   :  { %v1832_v26 = vadd.f32 %v1831_v39, %v1762_v37  ;;  %v3338_v8 = vor.u32 %v3644_v46, %v3335_v49  ;;  %2201 = vmatpush.bf16.msra.mxu3 %v524_v42  ;;  %v3658_v46 = vld [vmem:[%s5915_s0 + $0x4bc] sm:$0xf]  ;;  %v3393_v49 = vld [vmem:[%s5915_s0 + $0x4c0] sm:$0xf]  ;;  %v3402_v42 = vor.u32 %v3667_v57, %v3401_v52 }
 0x130   :  { %v1915_v13 = vpop.f32.mrf.mxu3 }
 0x131   :  { %v4806_v11 = vadd.f32 %v1915_v13, %v4656_v23 }
 0x132   :  { %v1900_v10 = vpop.f32.mrf.mxu2  ;;  %v1996_v17 = vpop.f32.mrf.mxu0 }
 0x133   :  { %v4808_v15 = vadd.f32 %v1900_v10, %v1832_v26  ;;  %v2065_v14 = vpop.f32.mrf.mxu1  ;;  %v3327_v26 = vld [vmem:[%s5915_s0 + $0x47c] sm:$0xf0] }
 0x135   :  { %1966 = vmatmul.bf16.gmra.mxu3 %v3270_v53  ;;  %2035 = vmatmul.bf16.gmra.mxu0 %v3274_v3  ;;  %v3330_v3 = vor.u32 %v3643_v38, %v3327_v26 }
 0x136   :  { %2104 = vmatmul.bf16.gmra.mxu1 %v3278_v2 }
 0x137   :  { %2173 = vmatmul.bf16.gmra.mxu2 %v3282_v18 }
 0x138   :  { %v1927_v23 = vpop.f32.mrf.mxu3 }
 0x139   :  { %v1928_v28 = vadd.f32 %v1927_v23, %v4368_v22  ;;  %v3651_v22 = vld [vmem:[%s5915_s0 + $0x480] sm:$0xf0]  ;;  %v157_v23 = vld [vmem:[%s5914_s1 + $0x488] sm:$0xff] }
 0x13a   :  { %v2134_v30 = vpop.f32.mrf.mxu2  ;;  %v1998_v32 = vpop.f32.mrf.mxu0  ;;  %v3334_v4 = vor.u32 %v3651_v22, %v3333_v41 }
 0x13b   :  { %v1997_v33 = vadd.f32 %v1996_v17, %v1928_v28  ;;  %v2067_v37 = vpop.f32.mrf.mxu1  ;;  %v140_v17 = vld [vmem:[%s5914_s1 + $0x400] sm:$0xff] }
 0x13c   :  { %v368_v21 = vmax.f32 %v140_v17, 0.0  ;;  %v202_v17 = vld [vmem:[%s5914_s1 + $0x5f0] sm:$0xff] }
 0x13d   :  { %v2066_v39 = vadd.f32 %v2065_v14, %v1997_v33  ;;  %v141_v14 = vld [vmem:[%s5914_s1 + $0x408] sm:$0xff]  ;;  %v384_v33 = vmax.f32 %v156_v43, 0.0 }
 0x13f   :  { %v4832_v47 = vadd.f32 %v2134_v30, %v2066_v39 }
 0x140   :  { %v1929_v53 = vpop.f32.mrf.mxu3 }
 0x141   :  { %v1930_v1 = vadd.f32 %v1929_v53, %v4402_v55  ;;  %v172_v55 = vld [vmem:[%s5914_s1 + $0x500] sm:$0xff] }
 0x142   :  { %v2136_v13 = vpop.f32.mrf.mxu2  ;;  %v2001_v24 = vpop.f32.mrf.mxu0  ;;  %v400_v2 = vmax.f32 %v172_v55, 0.0 }
 0x143   :  { %v1999_v9 = vadd.f32 %v1998_v32, %v1930_v1  ;;  %v2070_v10 = vpop.f32.mrf.mxu1  ;;  %v369_v32 = vmax.f32 %v141_v14, 0.0  ;;  %v3395_v1 = vld [vmem:[%s5915_s0 + $0x4fc] sm:$0xf0] }
 0x144   :  { %v548_v39 = vpack.c.bf16 %v401_v20, %v400_v2  ;;  %v430_v2 = vmax.f32 %v202_v17, 0.0 }
 0x145   :  { %v2068_v60 = vadd.f32 %v2067_v37, %v1999_v9  ;;  %1971 = vmatmul.bf16.gmra.mxu3 %v3330_v3  ;;  %2040 = vmatmul.bf16.gmra.mxu0 %v3334_v4  ;;  %v385_v37 = vmax.f32 %v157_v23, 0.0  ;;  %v532_v22 = vpack.c.bf16 %v369_v32, %v368_v21  ;;  %v3398_v9 = vor.u32 %v3659_v27, %v3395_v1  ;;  %v3673_v32 = vld [vmem:[%s5915_s0 + $0x534] sm:$0xf]  ;;  %v219_v1 = vld [vmem:[%s5914_s1 + $0x678] sm:$0xff] }
 0x146   :  { %2109 = vmatmul.bf16.gmra.mxu1 %v3338_v8  ;;  %2408 = vmatpush.bf16.msra.mxu2 %v548_v39  ;;  %v3461_v39 = vld [vmem:[%s5915_s0 + $0x540] sm:$0xf] }
 0x147   :  { %2178 = vmatmul.bf16.gmra.mxu2 %v3342_v29  ;;  %v4844_v6 = vadd.f32 %v2136_v13, %v2068_v60  ;;  %v540_v44 = vpack.c.bf16 %v385_v37, %v384_v33  ;;  %2270 = vmatpush.bf16.msra.mxu0 %v532_v22  ;;  %v3394_v29 = vor.u32 %v3666_v50, %v3393_v49  ;;  %v3447_v33 = vld [vmem:[%s5915_s0 + $0x56c] sm:$0xf0]  ;;  %v3455_v22 = vld [vmem:[%s5915_s0 + $0x574] sm:$0xf0] }
 0x148   :  { %v1932_v18 = vpop.f32.mrf.mxu3  ;;  %v218_v49 = vld [vmem:[%s5914_s1 + $0x670] sm:$0xff] }
 0x149   :  { %v1933_v28 = vadd.f32 %v1932_v18, %v4424_v31  ;;  %v3387_v31 = vld [vmem:[%s5915_s0 + $0x4f4] sm:$0xf0]  ;;  %2339 = vmatpush.bf16.msra.mxu1 %v540_v44 }
 0x14a   :  { %v2139_v30 = vpop.f32.mrf.mxu2  ;;  %v2003_v38 = vpop.f32.mrf.mxu0 }
 0x14b   :  { %v2002_v26 = vadd.f32 %v2001_v24, %v1933_v28  ;;  %v2072_v41 = vpop.f32.mrf.mxu1  ;;  %v3390_v24 = vor.u32 %v3658_v46, %v3387_v31  ;;  %v238_v46 = vld [vmem:[%s5914_s1 + $0x710] sm:$0xff]  ;;  %v239_v31 = vld [vmem:[%s5914_s1 + $0x718] sm:$0xff] }
 0x14c   :  { %v466_v57 = vmax.f32 %v238_v46, 0.0  ;;  %v467_v27 = vmax.f32 %v239_v31, 0.0  ;;  %v200_v46 = vld [vmem:[%s5914_s1 + $0x5e0] sm:$0xff]  ;;  %v201_v31 = vld [vmem:[%s5914_s1 + $0x5e8] sm:$0xff] }
 0x14d   :  { %v2071_v36 = vadd.f32 %v2070_v10, %v2002_v26  ;;  %v3682_v26 = vld [vmem:[%s5915_s0 + $0x578] sm:$0xf0] }
 0x14e   :  { %v581_v17 = vpack.c.bf16 %v467_v27, %v466_v57 }
 0x14f   :  { %v4880_v53 = vadd.f32 %v2139_v30, %v2071_v36  ;;  %v3450_v36 = vor.u32 %v3673_v32, %v3447_v33 }
 0x150   :  { %v1934_v13 = vpop.f32.mrf.mxu3  ;;  %2683 = vmatpush.bf16.msrb.mxu2 %v581_v17 }
 0x151   :  { %v1935_v3 = vadd.f32 %v1934_v13, %v4452_v48  ;;  %v203_v48 = vld [vmem:[%s5914_s1 + $0x5f8] sm:$0xff]  ;;  %v446_v13 = vmax.f32 %v218_v49, 0.0 }
 0x152   :  { %v2141_v4 = vpop.f32.mrf.mxu2  ;;  %v2006_v8 = vpop.f32.mrf.mxu0  ;;  %v431_v20 = vmax.f32 %v203_v48, 0.0 }
 0x153   :  { %v2004_v10 = vadd.f32 %v2003_v38, %v1935_v3  ;;  %v2075_v60 = vpop.f32.mrf.mxu1  ;;  %v3453_v38 = vld [vmem:[%s5915_s0 + $0x538] sm:$0xf]  ;;  %v234_v3 = vld [vmem:[%s5914_s1 + $0x6f0] sm:$0xff] }
 0x154   :  { %v563_v23 = vpack.c.bf16 %v431_v20, %v430_v2 }
 0x155   :  { %v2073_v55 = vadd.f32 %v2072_v41, %v2004_v10  ;;  %1976 = vmatmul.bf16.gmra.mxu3 %v3390_v24  ;;  %2045 = vmatmul.bf16.gmra.mxu0 %v3394_v29  ;;  %v3674_v41 = vld [vmem:[%s5915_s0 + $0x53c] sm:$0xf] }
 0x156   :  { %2114 = vmatmul.bf16.gmra.mxu1 %v3398_v9  ;;  %2470 = vmatpush.bf16.msrb.mxu3 %v563_v23 }
 0x157   :  { %2183 = vmatmul.bf16.gmra.mxu2 %v3402_v42  ;;  %v4892_v61 = vadd.f32 %v2141_v4, %v2073_v55  ;;  %v235_v4 = vld [vmem:[%s5914_s1 + $0x6f8] sm:$0xff]  ;;  %v462_v42 = vmax.f32 %v234_v3, 0.0  ;;  %v3458_v55 = vor.u32 %v3674_v41, %v3455_v22  ;;  %v3511_v41 = vld [vmem:[%s5915_s0 + $0x24] sm:$0xf] }
 0x158   :  { %v1937_v18 = vpop.f32.mrf.mxu3  ;;  %v463_v9 = vmax.f32 %v235_v4, 0.0 }
 0x159   :  { %v1938_v14 = vadd.f32 %v1937_v18, %v4462_v0  ;;  %v3681_v0 = vld [vmem:[%s5915_s0 + $0x570] sm:$0xf0] }
 0x15a   :  { %v2144_v21 = vpop.f32.mrf.mxu2  ;;  %v2008_v43 = vpop.f32.mrf.mxu0  ;;  %v3454_v52 = vor.u32 %v3681_v0, %v3453_v38  ;;  %v579_v20 = vpack.c.bf16 %v463_v9, %v462_v42  ;;  %v2803_v38 = vld [vmem:[%s5915_s0 + $0x54] sm:$0xf0]  ;;  %v2809_v0 = vld [vmem:[%s5915_s0 + $0x20] sm:$0xf] }
 0x15b   :  { %v2007_v28 = vadd.f32 %v2006_v8, %v1938_v14  ;;  %v2077_v30 = vpop.f32.mrf.mxu1  ;;  %v447_v8 = vmax.f32 %v219_v1, 0.0 }
 0x15c   :  { %2608 = vmatpush.bf16.msrb.mxu1 %v579_v20 }
 0x15d   :  { %v2076_v37 = vadd.f32 %v2075_v60, %v2007_v28  ;;  %v3462_v60 = vor.u32 %v3682_v26, %v3461_v39  ;;  %v571_v2 = vpack.c.bf16 %v447_v8, %v446_v13  ;;  %v2817_v39 = vld [vmem:[%s5915_s0 + $0x28] sm:$0xf]  ;;  %v3519_v26 = vld [vmem:[%s5915_s0 + $0x60] sm:$0xf0] }
 0x15e   :  { %v2818_v4 = vor.u32 %v3519_v26, %v2817_v39  ;;  %v2877_v39 = vld [vmem:[%s5915_s0 + $0xa0] sm:$0xf] }
 0x15f   :  { %v4925_v44 = vadd.f32 %v2144_v21, %v2076_v37  ;;  %2539 = vmatpush.bf16.msrb.mxu0 %v571_v2  ;;  %v3510_v37 = vld [vmem:[%s5915_s0 + $0x1c] sm:$0xf]  ;;  %v233_v2 = vld [vmem:[%s5914_s1 + $0x6e8] sm:$0xff] }
 0x160   :  { %v1939_v50 = vpop.f32.mrf.mxu3  ;;  %v2806_v1 = vor.u32 %v3510_v37, %v2803_v38  ;;  %v3525_v38 = vld [vmem:[%s5915_s0 + $0x94] sm:$0xf] }
 0x161   :  { %v1940_v24 = vadd.f32 %v1939_v50, %v4508_v59  ;;  %v428_v50 = vmax.f32 %v200_v46, 0.0  ;;  %v2871_v46 = vld [vmem:[%s5915_s0 + $0xd4] sm:$0xf0] }
 0x162   :  { %v2146_v29 = vpop.f32.mrf.mxu2  ;;  %v2011_v10 = vpop.f32.mrf.mxu0 }
 0x163   :  { %v2009_v48 = vadd.f32 %v2008_v43, %v1940_v24  ;;  %v2080_v18 = vpop.f32.mrf.mxu1 }
 0x165   :  { %v2078_v14 = vadd.f32 %v2077_v30, %v2009_v48  ;;  %1981 = vmatmul.bf16.gmra.mxu3 %v3450_v36  ;;  %2050 = vmatmul.bf16.gmra.mxu0 %v3454_v52  ;;  %v2811_v36 = vld [vmem:[%s5915_s0 + $0x5c] sm:$0xf0]  ;;  %v429_v52 = vmax.f32 %v201_v31, 0.0 }
 0x166   :  { %2119 = vmatmul.bf16.gmra.mxu1 %v3458_v55  ;;  %v2814_v24 = vor.u32 %v3511_v41, %v2811_v36  ;;  %v232_v55 = vld [vmem:[%s5914_s1 + $0x6e0] sm:$0xff]  ;;  %v3534_v41 = vld [vmem:[%s5915_s0 + $0xd8] sm:$0xf0] }
 0x167   :  { %2188 = vmatmul.bf16.gmra.mxu2 %v3462_v60  ;;  %v4946_v21 = vadd.f32 %v2146_v29, %v2078_v14  ;;  %v562_v29 = vpack.c.bf16 %v429_v52, %v428_v50  ;;  %v217_v60 = vld [vmem:[%s5914_s1 + $0x668] sm:$0xff]  ;;  %v460_v20 = vmax.f32 %v232_v55, 0.0  ;;  %v3526_v36 = vld [vmem:[%s5915_s0 + $0x9c] sm:$0xf] }
 0x168   :  { %v1942_v59 = vpop.f32.mrf.mxu3 }
 0x169   :  { %v1943_v23 = vadd.f32 %v1942_v59, %v4513_v45  ;;  %v3518_v45 = vld [vmem:[%s5915_s0 + $0x58] sm:$0xf0]  ;;  %2471 = vmatpush.bf16.msrb.mxu3 %v562_v29 }
 0x16a   :  { %v2149_v28 = vpop.f32.mrf.mxu2  ;;  %v2013_v32 = vpop.f32.mrf.mxu0  ;;  %v2810_v13 = vor.u32 %v3518_v45, %v2809_v0  ;;  %v2863_v0 = vld [vmem:[%s5915_s0 + $0xcc] sm:$0xf0]  ;;  %v3533_v45 = vld [vmem:[%s5915_s0 + $0xd0] sm:$0xf0] }
 0x16b   :  { %v2012_v33 = vadd.f32 %v2011_v10, %v1943_v23  ;;  %v2082_v43 = vpop.f32.mrf.mxu1  ;;  %v461_v23 = vmax.f32 %v233_v2, 0.0  ;;  %v2866_v52 = vor.u32 %v3525_v38, %v2863_v0  ;;  %v215_v38 = vld [vmem:[%s5914_s1 + $0x658] sm:$0xff]  ;;  %v230_v0 = vld [vmem:[%s5914_s1 + $0x6d0] sm:$0xff] }
 0x16d   :  { %v2081_v30 = vadd.f32 %v2080_v18, %v2012_v33  ;;  %v445_v18 = vmax.f32 %v217_v60, 0.0  ;;  %v578_v37 = vpack.c.bf16 %v461_v23, %v460_v20  ;;  %v3540_v20 = vld [vmem:[%s5915_s0 + $0x10c] sm:$0xf]  ;;  %v2929_v23 = vld [vmem:[%s5915_s0 + $0x110] sm:$0xf] }
 0x16f   :  { %v4970_v22 = vadd.f32 %v2149_v28, %v2081_v30  ;;  %2609 = vmatpush.bf16.msrb.mxu1 %v578_v37 }
 0x170   :  { %v1944_v49 = vpop.f32.mrf.mxu3 }
 0x171   :  { %v1945_v57 = vadd.f32 %v1944_v49, %v4548_v7  ;;  %v216_v7 = vld [vmem:[%s5914_s1 + $0x660] sm:$0xff] }
 0x172   :  { %v2151_v27 = vpop.f32.mrf.mxu2  ;;  %v2016_v3 = vpop.f32.mrf.mxu0  ;;  %v444_v48 = vmax.f32 %v216_v7, 0.0 }
 0x173   :  { %v2014_v8 = vadd.f32 %v2013_v32, %v1945_v57  ;;  %v2085_v42 = vpop.f32.mrf.mxu1 }
 0x174   :  { %v570_v32 = vpack.c.bf16 %v445_v18, %v444_v48 }
 0x175   :  { %v2083_v9 = vadd.f32 %v2082_v43, %v2014_v8  ;;  %2202 = vmatmul.bf16.vlgmr.msra.gmra.mxu3 %v2806_v1  ;;  %2271 = vmatmul.bf16.vlgmr.msra.gmra.mxu0 %v2810_v13  ;;  %v2878_v1 = vor.u32 %v3534_v41, %v2877_v39  ;;  %v2874_v13 = vor.u32 %v3526_v36, %v2871_v46  ;;  %v198_v8 = vld [vmem:[%s5914_s1 + $0x5d0] sm:$0xff]  ;;  %v443_v39 = vmax.f32 %v215_v38, 0.0  ;;  %v231_v41 = vld [vmem:[%s5914_s1 + $0x6d8] sm:$0xff] }
 0x176   :  { %2340 = vmatmul.bf16.vlgmr.msra.gmra.mxu1 %v2814_v24  ;;  %2540 = vmatpush.bf16.msrb.mxu0 %v570_v32  ;;  %v3549_v32 = vld [vmem:[%s5915_s0 + $0x150] sm:$0xf0]  ;;  %v458_v36 = vmax.f32 %v230_v0, 0.0 }
 0x177   :  { %2409 = vmatmul.bf16.vlgmr.msra.gmra.mxu2 %v2818_v4  ;;  %v4982_v10 = vadd.f32 %v2151_v27, %v2083_v9  ;;  %v426_v9 = vmax.f32 %v198_v8, 0.0 }
 0x178   :  { %v1947_v17 = vpop.f32.mrf.mxu3 }
 0x179   :  { %v1948_v14 = vadd.f32 %v1947_v17, %v4571_v34  ;;  %v2869_v34 = vld [vmem:[%s5915_s0 + $0x98] sm:$0xf] }
 0x17a   :  { %v2154_v59 = vpop.f32.mrf.mxu2  ;;  %v2018_v28 = vpop.f32.mrf.mxu0  ;;  %v2870_v57 = vor.u32 %v3533_v45, %v2869_v34 }
 0x17b   :  { %v2017_v33 = vadd.f32 %v2016_v3, %v1948_v14  ;;  %v2087_v43 = vpop.f32.mrf.mxu1  ;;  %v2923_v14 = vld [vmem:[%s5915_s0 + $0x144] sm:$0xf0] }
 0x17d   :  { %v2086_v30 = vadd.f32 %v2085_v42, %v2017_v33  ;;  %v3541_v33 = vld [vmem:[%s5915_s0 + $0x114] sm:$0xf] }
 0x17f   :  { %v5012_v26 = vadd.f32 %v2154_v59, %v2086_v30  ;;  %v214_v30 = vld [vmem:[%s5914_s1 + $0x650] sm:$0xff] }
 0x180   :  { %v1949_v31 = vpop.f32.mrf.mxu3  ;;  %v442_v45 = vmax.f32 %v214_v30, 0.0 }
 0x181   :  { %v1950_v49 = vadd.f32 %v1949_v31, %v4600_v56  ;;  %v199_v56 = vld [vmem:[%s5914_s1 + $0x5d8] sm:$0xff] }
 0x182   :  { %v2156_v50 = vpop.f32.mrf.mxu2  ;;  %v2021_v27 = vpop.f32.mrf.mxu0  ;;  %v427_v7 = vmax.f32 %v199_v56, 0.0 }
 0x183   :  { %v2019_v3 = vadd.f32 %v2018_v28, %v1950_v49  ;;  %v2090_v4 = vpop.f32.mrf.mxu1  ;;  %v2937_v28 = vld [vmem:[%s5915_s0 + $0x118] sm:$0xf]  ;;  %v2926_v49 = vor.u32 %v3540_v20, %v2923_v14  ;;  %v2997_v20 = vld [vmem:[%s5915_s0 + $0x190] sm:$0xf]  ;;  %v3564_v14 = vld [vmem:[%s5915_s0 + $0x1c8] sm:$0xf0] }
 0x184   :  { %v561_v48 = vpack.c.bf16 %v427_v7, %v426_v9 }
 0x185   :  { %v2088_v24 = vadd.f32 %v2087_v43, %v2019_v3  ;;  %2207 = vmatmul.bf16.gmra.mxu3 %v2866_v52  ;;  %2276 = vmatmul.bf16.gmra.mxu0 %v2870_v57  ;;  %v2931_v43 = vld [vmem:[%s5915_s0 + $0x14c] sm:$0xf0]  ;;  %v459_v52 = vmax.f32 %v231_v41, 0.0  ;;  %v2998_v41 = vor.u32 %v3564_v14, %v2997_v20  ;;  %v3057_v20 = vld [vmem:[%s5915_s0 + $0x208] sm:$0xf] }
 0x186   :  { %2345 = vmatmul.bf16.gmra.mxu1 %v2874_v13  ;;  %2472 = vmatpush.bf16.msrb.mxu3 %v561_v48  ;;  %v569_v13 = vpack.c.bf16 %v443_v39, %v442_v45 }
 0x187   :  { %2414 = vmatmul.bf16.gmra.mxu2 %v2878_v1  ;;  %v5024_v29 = vadd.f32 %v2156_v50, %v2088_v24  ;;  %v2934_v1 = vor.u32 %v3541_v33, %v2931_v43  ;;  %v577_v24 = vpack.c.bf16 %v459_v52, %v458_v36 }
 0x188   :  { %v1952_v42 = vpop.f32.mrf.mxu3  ;;  %2541 = vmatpush.bf16.msrb.mxu0 %v569_v13 }
 0x189   :  { %v1953_v60 = vadd.f32 %v1952_v42, %v4611_v40  ;;  %v3548_v40 = vld [vmem:[%s5915_s0 + $0x148] sm:$0xf0]  ;;  %2610 = vmatpush.bf16.msrb.mxu1 %v577_v24 }
 0x18a   :  { %v2159_v55 = vpop.f32.mrf.mxu2  ;;  %v2023_v17 = vpop.f32.mrf.mxu0  ;;  %v2930_v50 = vor.u32 %v3548_v40, %v2929_v23  ;;  %v2991_v40 = vld [vmem:[%s5915_s0 + $0x1c4] sm:$0xf0] }
 0x18b   :  { %v2022_v18 = vadd.f32 %v2021_v27, %v1953_v60  ;;  %v2092_v2 = vpop.f32.mrf.mxu1  ;;  %v2938_v27 = vor.u32 %v3549_v32, %v2937_v28  ;;  %v196_v28 = vld [vmem:[%s5914_s1 + $0x5c0] sm:$0xff]  ;;  %v197_v32 = vld [vmem:[%s5914_s1 + $0x5c8] sm:$0xff] }
 0x18c   :  { %v424_v43 = vmax.f32 %v196_v28, 0.0  ;;  %v425_v30 = vmax.f32 %v197_v32, 0.0  ;;  %v3051_v28 = vld [vmem:[%s5915_s0 + $0x23c] sm:$0xf0] }
 0x18d   :  { %v2091_v59 = vadd.f32 %v2090_v4, %v2022_v18  ;;  %v2983_v18 = vld [vmem:[%s5915_s0 + $0x1bc] sm:$0xf0] }
 0x18f   :  { %v5057_v37 = vadd.f32 %v2159_v55, %v2091_v59  ;;  %v3556_v59 = vld [vmem:[%s5915_s0 + $0x18c] sm:$0xf] }
 0x190   :  { %v1954_v34 = vpop.f32.mrf.mxu3  ;;  %v2994_v36 = vor.u32 %v3556_v59, %v2991_v40  ;;  %v3579_v59 = vld [vmem:[%s5915_s0 + $0x240] sm:$0xf0] }
 0x191   :  { %v1955_v46 = vadd.f32 %v1954_v34, %v4658_v51  ;;  %v3571_v40 = vld [vmem:[%s5915_s0 + $0x204] sm:$0xf] }
 0x192   :  { %v2161_v31 = vpop.f32.mrf.mxu2  ;;  %v2026_v57 = vpop.f32.mrf.mxu0 }
 0x193   :  { %v2024_v3 = vadd.f32 %v2023_v17, %v1955_v46  ;;  %v2095_v4 = vpop.f32.mrf.mxu1  ;;  %v3555_v17 = vld [vmem:[%s5915_s0 + $0x184] sm:$0xf]  ;;  %v560_v46 = vpack.c.bf16 %v425_v30, %v424_v43 }
 0x194   :  { %v2986_v34 = vor.u32 %v3555_v17, %v2983_v18  ;;  %v3570_v18 = vld [vmem:[%s5915_s0 + $0x1fc] sm:$0xf] }
 0x195   :  { %v2093_v8 = vadd.f32 %v2092_v2, %v2024_v3  ;;  %2212 = vmatmul.bf16.gmra.mxu3 %v2926_v49  ;;  %2281 = vmatmul.bf16.gmra.mxu0 %v2930_v50  ;;  %v2989_v2 = vld [vmem:[%s5915_s0 + $0x188] sm:$0xf] }
 0x196   :  { %2350 = vmatmul.bf16.gmra.mxu1 %v2934_v1  ;;  %2473 = vmatpush.bf16.msrb.mxu3 %v560_v46 }
 0x197   :  { %2419 = vmatmul.bf16.gmra.mxu2 %v2938_v27  ;;  %v5072_v56 = vadd.f32 %v2161_v31, %v2093_v8  ;;  %v228_v27 = vld [vmem:[%s5914_s1 + $0x6c0] sm:$0xff] }
 0x198   :  { %v1957_v51 = vpop.f32.mrf.mxu3  ;;  %v456_v24 = vmax.f32 %v228_v27, 0.0 }
 0x199   :  { %v1958_v42 = vadd.f32 %v1957_v51, %v4663_v63  ;;  %v3563_v63 = vld [vmem:[%s5915_s0 + $0x1c0] sm:$0xf0] }
 0x19a   :  { %v2164_v9 = vpop.f32.mrf.mxu2  ;;  %v2028_v7 = vpop.f32.mrf.mxu0  ;;  %v2990_v45 = vor.u32 %v3563_v63, %v2989_v2  ;;  %v3043_v2 = vld [vmem:[%s5915_s0 + $0x234] sm:$0xf0]  ;;  %v3578_v63 = vld [vmem:[%s5915_s0 + $0x238] sm:$0xf0] }
 0x19b   :  { %v2027_v60 = vadd.f32 %v2026_v57, %v1958_v42  ;;  %v2097_v55 = vpop.f32.mrf.mxu1  ;;  %v213_v57 = vld [vmem:[%s5914_s1 + $0x648] sm:$0xff]  ;;  %v3046_v30 = vor.u32 %v3570_v18, %v3043_v2  ;;  %v236_v18 = vld [vmem:[%s5914_s1 + $0x700] sm:$0xff] }
 0x19c   :  { %v441_v3 = vmax.f32 %v213_v57, 0.0  ;;  %v237_v2 = vld [vmem:[%s5914_s1 + $0x708] sm:$0xff] }
 0x19d   :  { %v2096_v48 = vadd.f32 %v2095_v4, %v2027_v60  ;;  %v229_v4 = vld [vmem:[%s5914_s1 + $0x6c8] sm:$0xff] }
 0x19e   :  { %v457_v42 = vmax.f32 %v229_v4, 0.0 }
 0x19f   :  { %v5096_v23 = vadd.f32 %v2164_v9, %v2096_v48 }
 0x1a0   :  { %v1959_v33 = vpop.f32.mrf.mxu3  ;;  %v576_v17 = vpack.c.bf16 %v457_v42, %v456_v24  ;;  %v3585_v24 = vld [vmem:[%s5915_s0 + $0x274] sm:$0xf]  ;;  %v3109_v42 = vld [vmem:[%s5915_s0 + $0x278] sm:$0xf] }
 0x1a1   :  { %v1960_v38 = vadd.f32 %v1959_v33, %v4698_v25  ;;  %v212_v25 = vld [vmem:[%s5914_s1 + $0x640] sm:$0xff] }
 0x1a2   :  { %v2166_v0 = vpop.f32.mrf.mxu2  ;;  %v2031_v39 = vpop.f32.mrf.mxu0  ;;  %v440_v13 = vmax.f32 %v212_v25, 0.0  ;;  %2611 = vmatpush.bf16.msrb.mxu1 %v576_v17 }
 0x1a3   :  { %v2029_v31 = vadd.f32 %v2028_v7, %v1960_v38  ;;  %v2100_v49 = vpop.f32.mrf.mxu1 }
 0x1a4   :  { %v568_v7 = vpack.c.bf16 %v441_v3, %v440_v13 }
 0x1a5   :  { %v2098_v50 = vadd.f32 %v2097_v55, %v2029_v31  ;;  %2217 = vmatmul.bf16.gmra.mxu3 %v2986_v34  ;;  %2286 = vmatmul.bf16.gmra.mxu0 %v2990_v45  ;;  %v3058_v34 = vor.u32 %v3579_v59, %v3057_v20  ;;  %v3054_v45 = vor.u32 %v3571_v40, %v3051_v28  ;;  %v194_v31 = vld [vmem:[%s5914_s1 + $0x5b0] sm:$0xff]  ;;  %v464_v59 = vmax.f32 %v236_v18, 0.0  ;;  %v211_v28 = vld [vmem:[%s5914_s1 + $0x638] sm:$0xff]  ;;  %v192_v18 = vld [vmem:[%s5914_s1 + $0x5a0] sm:$0xff] }
 0x1a6   :  { %2355 = vmatmul.bf16.gmra.mxu1 %v2994_v36  ;;  %2542 = vmatpush.bf16.msrb.mxu0 %v568_v7  ;;  %v3594_v7 = vld [vmem:[%s5915_s0 + $0x2b8] sm:$0xf0]  ;;  %v465_v40 = vmax.f32 %v237_v2, 0.0  ;;  %v193_v2 = vld [vmem:[%s5914_s1 + $0x5a8] sm:$0xff] }
 0x1a7   :  { %2424 = vmatmul.bf16.gmra.mxu2 %v2998_v41  ;;  %v5108_v52 = vadd.f32 %v2166_v0, %v2098_v50  ;;  %v422_v50 = vmax.f32 %v194_v31, 0.0 }
 0x1a8   :  { %v1962_v1 = vpop.f32.mrf.mxu3  ;;  %v580_v31 = vpack.c.bf16 %v465_v40, %v464_v59 }
 0x1a9   :  { %v1963_v8 = vadd.f32 %v1962_v1, %v4721_v58  ;;  %v3049_v58 = vld [vmem:[%s5915_s0 + $0x200] sm:$0xf] }
 0x1aa   :  { %v2169_v51 = vpop.f32.mrf.mxu2  ;;  %v2033_v9 = vpop.f32.mrf.mxu0  ;;  %v3050_v38 = vor.u32 %v3578_v63, %v3049_v58  ;;  %v210_v58 = vld [vmem:[%s5914_s1 + $0x630] sm:$0xff]  ;;  %2684 = vmatpush.bf16.msrb.mxu2 %v580_v31 }
 0x1ab   :  { %v2032_v60 = vadd.f32 %v2031_v39, %v1963_v8  ;;  %v2102_v55 = vpop.f32.mrf.mxu1  ;;  %v3103_v8 = vld [vmem:[%s5915_s0 + $0x2ac] sm:$0xf0] }
 0x1ad   :  { %v2101_v48 = vadd.f32 %v2100_v49, %v2032_v60  ;;  %v3586_v60 = vld [vmem:[%s5915_s0 + $0x27c] sm:$0xf] }
 0x1af   :  { %v5138_v14 = vadd.f32 %v2169_v51, %v2101_v48  ;;  %v3106_v48 = vor.u32 %v3585_v24, %v3103_v8 }
 0x1b0   :  { %v1964_v32 = vpop.f32.mrf.mxu3 }
 0x1b1   :  { %v1965_v33 = vadd.f32 %v1964_v32, %v4750_v16  ;;  %v195_v16 = vld [vmem:[%s5914_s1 + $0x5b8] sm:$0xff]  ;;  %v438_v32 = vmax.f32 %v210_v58, 0.0 }
 0x1b2   :  { %v2171_v43 = vpop.f32.mrf.mxu2  ;;  %v2036_v0 = vpop.f32.mrf.mxu0  ;;  %v423_v25 = vmax.f32 %v195_v16, 0.0 }
 0x1b3   :  { %v2034_v39 = vadd.f32 %v2033_v9, %v1965_v33  ;;  %v2105_v41 = vpop.f32.mrf.mxu1  ;;  %v3117_v9 = vld [vmem:[%s5915_s0 + $0x280] sm:$0xf]  ;;  %v226_v33 = vld [vmem:[%s5914_s1 + $0x6b0] sm:$0xff] }
 0x1b4   :  { %v559_v13 = vpack.c.bf16 %v423_v25, %v422_v50 }
 0x1b5   :  { %v2103_v36 = vadd.f32 %v2102_v55, %v2034_v39  ;;  %2222 = vmatmul.bf16.gmra.mxu3 %v3046_v30  ;;  %2291 = vmatmul.bf16.gmra.mxu0 %v3050_v38  ;;  %v3111_v55 = vld [vmem:[%s5915_s0 + $0x2b4] sm:$0xf0] }
 0x1b6   :  { %2360 = vmatmul.bf16.gmra.mxu1 %v3054_v45  ;;  %2474 = vmatpush.bf16.msrb.mxu3 %v559_v13 }
 0x1b7   :  { %2429 = vmatmul.bf16.gmra.mxu2 %v3058_v34  ;;  %v5150_v46 = vadd.f32 %v2171_v43, %v2103_v36  ;;  %v227_v43 = vld [vmem:[%s5914_s1 + $0x6b8] sm:$0xff]  ;;  %v454_v34 = vmax.f32 %v226_v33, 0.0  ;;  %v3114_v36 = vor.u32 %v3586_v60, %v3111_v55  ;;  %v3601_v60 = vld [vmem:[%s5915_s0 + $0x2f4] sm:$0xf] }
 0x1b8   :  { %v1967_v49 = vpop.f32.mrf.mxu3  ;;  %v455_v45 = vmax.f32 %v227_v43, 0.0 }
 0x1b9   :  { %v1968_v57 = vadd.f32 %v1967_v49, %v4761_v5  ;;  %v3593_v5 = vld [vmem:[%s5915_s0 + $0x2b0] sm:$0xf0] }
 0x1ba   :  { %v2174_v27 = vpop.f32.mrf.mxu2  ;;  %v2038_v1 = vpop.f32.mrf.mxu0  ;;  %v3110_v20 = vor.u32 %v3593_v5, %v3109_v42  ;;  %v575_v25 = vpack.c.bf16 %v455_v45, %v454_v34  ;;  %v3163_v42 = vld [vmem:[%s5915_s0 + $0x324] sm:$0xf0]  ;;  %v3169_v5 = vld [vmem:[%s5915_s0 + $0x2f0] sm:$0xf] }
 0x1bb   :  { %v2037_v3 = vadd.f32 %v2036_v0, %v1968_v57  ;;  %v2107_v4 = vpop.f32.mrf.mxu1  ;;  %v439_v0 = vmax.f32 %v211_v28, 0.0 }
 0x1bc   :  { %2612 = vmatpush.bf16.msrb.mxu1 %v575_v25 }
 0x1bd   :  { %v2106_v51 = vadd.f32 %v2105_v41, %v2037_v3  ;;  %v3118_v41 = vor.u32 %v3594_v7, %v3117_v9  ;;  %v567_v50 = vpack.c.bf16 %v439_v0, %v438_v32  ;;  %v3177_v9 = vld [vmem:[%s5915_s0 + $0x2f8] sm:$0xf]  ;;  %v3609_v7 = vld [vmem:[%s5915_s0 + $0x330] sm:$0xf0] }
 0x1be   :  { %v3178_v43 = vor.u32 %v3609_v7, %v3177_v9  ;;  %v3237_v9 = vld [vmem:[%s5915_s0 + $0x370] sm:$0xf] }
 0x1bf   :  { %v5183_v17 = vadd.f32 %v2174_v27, %v2106_v51  ;;  %2543 = vmatpush.bf16.msrb.mxu0 %v567_v50  ;;  %v3600_v51 = vld [vmem:[%s5915_s0 + $0x2ec] sm:$0xf] }
 0x1c0   :  { %v1969_v63 = vpop.f32.mrf.mxu3  ;;  %v3166_v28 = vor.u32 %v3600_v51, %v3163_v42  ;;  %v225_v50 = vld [vmem:[%s5914_s1 + $0x6a8] sm:$0xff]  ;;  %v3615_v42 = vld [vmem:[%s5915_s0 + $0x364] sm:$0xf] }
 0x1c1   :  { %v1970_v30 = vadd.f32 %v1969_v63, %v4808_v15  ;;  %v420_v63 = vmax.f32 %v192_v18, 0.0  ;;  %v3231_v18 = vld [vmem:[%s5915_s0 + $0x3a4] sm:$0xf0] }
 0x1c2   :  { %v2176_v38 = vpop.f32.mrf.mxu2  ;;  %v2041_v39 = vpop.f32.mrf.mxu0 }
 0x1c3   :  { %v2039_v16 = vadd.f32 %v2038_v1, %v1970_v30  ;;  %v2110_v49 = vpop.f32.mrf.mxu1 }
 0x1c5   :  { %v2108_v57 = vadd.f32 %v2107_v4, %v2039_v16  ;;  %2227 = vmatmul.bf16.gmra.mxu3 %v3106_v48  ;;  %2296 = vmatmul.bf16.gmra.mxu0 %v3110_v20  ;;  %v3171_v48 = vld [vmem:[%s5915_s0 + $0x32c] sm:$0xf0]  ;;  %v421_v20 = vmax.f32 %v193_v2, 0.0 }
 0x1c6   :  { %2365 = vmatmul.bf16.gmra.mxu1 %v3114_v36  ;;  %v3174_v30 = vor.u32 %v3601_v60, %v3171_v48  ;;  %v224_v36 = vld [vmem:[%s5914_s1 + $0x6a0] sm:$0xff]  ;;  %v3624_v60 = vld [vmem:[%s5915_s0 + $0x3a8] sm:$0xf0] }
 0x1c7   :  { %2434 = vmatmul.bf16.gmra.mxu2 %v3118_v41  ;;  %v5204_v27 = vadd.f32 %v2176_v38, %v2108_v57  ;;  %v558_v38 = vpack.c.bf16 %v421_v20, %v420_v63  ;;  %v209_v41 = vld [vmem:[%s5914_s1 + $0x628] sm:$0xff]  ;;  %v452_v25 = vmax.f32 %v224_v36, 0.0 }
 0x1c8   :  { %v1972_v15 = vpop.f32.mrf.mxu3  ;;  %v3616_v48 = vld [vmem:[%s5915_s0 + $0x36c] sm:$0xf] }
 0x1c9   :  { %v1973_v13 = vadd.f32 %v1972_v15, %v4661_v62  ;;  %v3608_v62 = vld [vmem:[%s5915_s0 + $0x328] sm:$0xf0]  ;;  %2475 = vmatpush.bf16.msrb.mxu3 %v558_v38 }
 0x1ca   :  { %v2179_v3 = vpop.f32.mrf.mxu2  ;;  %v2043_v24 = vpop.f32.mrf.mxu0  ;;  %v3170_v32 = vor.u32 %v3608_v62, %v3169_v5  ;;  %v3223_v5 = vld [vmem:[%s5915_s0 + $0x39c] sm:$0xf0]  ;;  %v3623_v62 = vld [vmem:[%s5915_s0 + $0x3a0] sm:$0xf0] }
 0x1cb   :  { %v2042_v8 = vadd.f32 %v2041_v39, %v1973_v13  ;;  %v2112_v1 = vpop.f32.mrf.mxu1  ;;  %v453_v13 = vmax.f32 %v225_v50, 0.0  ;;  %v3226_v20 = vor.u32 %v3615_v42, %v3223_v5  ;;  %v207_v42 = vld [vmem:[%s5914_s1 + $0x618] sm:$0xff]  ;;  %v222_v5 = vld [vmem:[%s5914_s1 + $0x690] sm:$0xff] }
 0x1cd   :  { %v2111_v4 = vadd.f32 %v2110_v49, %v2042_v8  ;;  %v437_v49 = vmax.f32 %v209_v41, 0.0  ;;  %v574_v51 = vpack.c.bf16 %v453_v13, %v452_v25  ;;  %v3630_v25 = vld [vmem:[%s5915_s0 + $0x3dc] sm:$0xf]  ;;  %v3289_v13 = vld [vmem:[%s5915_s0 + $0x3e0] sm:$0xf] }
 0x1cf   :  { %v5228_v55 = vadd.f32 %v2179_v3, %v2111_v4  ;;  %2613 = vmatpush.bf16.msrb.mxu1 %v574_v51 }
 0x1d0   :  { %v1974_v58 = vpop.f32.mrf.mxu3 }
 0x1d1   :  { %v1975_v59 = vadd.f32 %v1974_v58, %v4696_v19  ;;  %v208_v19 = vld [vmem:[%s5914_s1 + $0x620] sm:$0xff] }
 0x1d2   :  { %v2181_v40 = vpop.f32.mrf.mxu2  ;;  %v2046_v33 = vpop.f32.mrf.mxu0  ;;  %v436_v16 = vmax.f32 %v208_v19, 0.0 }
 0x1d3   :  { %v2044_v0 = vadd.f32 %v2043_v24, %v1975_v59  ;;  %v2115_v34 = vpop.f32.mrf.mxu1 }
 0x1d4   :  { %v566_v24 = vpack.c.bf16 %v437_v49, %v436_v16 }
 0x1d5   :  { %v2113_v45 = vadd.f32 %v2112_v1, %v2044_v0  ;;  %2232 = vmatmul.bf16.gmra.mxu3 %v3166_v28  ;;  %2301 = vmatmul.bf16.gmra.mxu0 %v3170_v32  ;;  %v3238_v28 = vor.u32 %v3624_v60, %v3237_v9  ;;  %v3234_v32 = vor.u32 %v3616_v48, %v3231_v18  ;;  %v190_v0 = vld [vmem:[%s5914_s1 + $0x590] sm:$0xff]  ;;  %v435_v9 = vmax.f32 %v207_v42, 0.0  ;;  %v223_v60 = vld [vmem:[%s5914_s1 + $0x698] sm:$0xff] }
 0x1d6   :  { %2370 = vmatmul.bf16.gmra.mxu1 %v3174_v30  ;;  %2544 = vmatpush.bf16.msrb.mxu0 %v566_v24  ;;  %v3639_v24 = vld [vmem:[%s5915_s0 + $0x420] sm:$0xf0]  ;;  %v450_v48 = vmax.f32 %v222_v5, 0.0 }
 0x1d7   :  { %2439 = vmatmul.bf16.gmra.mxu2 %v3178_v43  ;;  %v5240_v39 = vadd.f32 %v2181_v40, %v2113_v45  ;;  %v418_v45 = vmax.f32 %v190_v0, 0.0 }
 0x1d8   :  { %v1977_v31 = vpop.f32.mrf.mxu3 }
 0x1d9   :  { %v1978_v57 = vadd.f32 %v1977_v31, %v4719_v54  ;;  %v3229_v54 = vld [vmem:[%s5915_s0 + $0x368] sm:$0xf] }
 0x1da   :  { %v2184_v15 = vpop.f32.mrf.mxu2  ;;  %v2048_v3 = vpop.f32.mrf.mxu0  ;;  %v3230_v59 = vor.u32 %v3623_v62, %v3229_v54 }
 0x1db   :  { %v2047_v8 = vadd.f32 %v2046_v33, %v1978_v57  ;;  %v2117_v1 = vpop.f32.mrf.mxu1  ;;  %v3283_v57 = vld [vmem:[%s5915_s0 + $0x414] sm:$0xf0] }
 0x1dd   :  { %v2116_v4 = vadd.f32 %v2115_v34, %v2047_v8  ;;  %v3631_v8 = vld [vmem:[%s5915_s0 + $0x3e4] sm:$0xf] }
 0x1df   :  { %v5270_v7 = vadd.f32 %v2184_v15, %v2116_v4  ;;  %v206_v4 = vld [vmem:[%s5914_s1 + $0x610] sm:$0xff] }
 0x1e0   :  { %v1979_v2 = vpop.f32.mrf.mxu3  ;;  %v434_v62 = vmax.f32 %v206_v4, 0.0 }
 0x1e1   :  { %v1980_v58 = vadd.f32 %v1979_v2, %v4748_v12  ;;  %v191_v12 = vld [vmem:[%s5914_s1 + $0x598] sm:$0xff] }
 0x1e2   :  { %v2186_v63 = vpop.f32.mrf.mxu2  ;;  %v2051_v40 = vpop.f32.mrf.mxu0  ;;  %v419_v19 = vmax.f32 %v191_v12, 0.0 }
 0x1e3   :  { %v2049_v33 = vadd.f32 %v2048_v3, %v1980_v58  ;;  %v2120_v43 = vpop.f32.mrf.mxu1  ;;  %v3297_v3 = vld [vmem:[%s5915_s0 + $0x3e8] sm:$0xf]  ;;  %v3286_v58 = vor.u32 %v3630_v25, %v3283_v57  ;;  %v3357_v25 = vld [vmem:[%s5915_s0 + $0x460] sm:$0xf]  ;;  %v3654_v57 = vld [vmem:[%s5915_s0 + $0x498] sm:$0xf0] }
 0x1e4   :  { %v557_v16 = vpack.c.bf16 %v419_v19, %v418_v45 }
 0x1e5   :  { %v2118_v30 = vadd.f32 %v2117_v1, %v2049_v33  ;;  %2237 = vmatmul.bf16.gmra.mxu3 %v3226_v20  ;;  %2306 = vmatmul.bf16.gmra.mxu0 %v3230_v59  ;;  %v3291_v1 = vld [vmem:[%s5915_s0 + $0x41c] sm:$0xf0]  ;;  %v451_v20 = vmax.f32 %v223_v60, 0.0  ;;  %v3358_v60 = vor.u32 %v3654_v57, %v3357_v25  ;;  %v3417_v25 = vld [vmem:[%s5915_s0 + $0x4d8] sm:$0xf] }
 0x1e6   :  { %2375 = vmatmul.bf16.gmra.mxu1 %v3234_v32  ;;  %2476 = vmatpush.bf16.msrb.mxu3 %v557_v16  ;;  %v565_v32 = vpack.c.bf16 %v435_v9, %v434_v62 }
 0x1e7   :  { %2444 = vmatmul.bf16.gmra.mxu2 %v3238_v28  ;;  %v5282_v38 = vadd.f32 %v2186_v63, %v2118_v30  ;;  %v3294_v28 = vor.u32 %v3631_v8, %v3291_v1  ;;  %v573_v30 = vpack.c.bf16 %v451_v20, %v450_v48 }
 0x1e8   :  { %v1982_v34 = vpop.f32.mrf.mxu3  ;;  %2545 = vmatpush.bf16.msrb.mxu0 %v565_v32 }
 0x1e9   :  { %v1983_v41 = vadd.f32 %v1982_v34, %v4759_v35  ;;  %v3638_v35 = vld [vmem:[%s5915_s0 + $0x418] sm:$0xf0]  ;;  %2614 = vmatpush.bf16.msrb.mxu1 %v573_v30 }
 0x1ea   :  { %v2189_v36 = vpop.f32.mrf.mxu2  ;;  %v2053_v31 = vpop.f32.mrf.mxu0  ;;  %v3290_v63 = vor.u32 %v3638_v35, %v3289_v13  ;;  %v3351_v35 = vld [vmem:[%s5915_s0 + $0x494] sm:$0xf0] }
 0x1eb   :  { %v2052_v49 = vadd.f32 %v2051_v40, %v1983_v41  ;;  %v2122_v50 = vpop.f32.mrf.mxu1  ;;  %v3298_v40 = vor.u32 %v3639_v24, %v3297_v3  ;;  %v188_v3 = vld [vmem:[%s5914_s1 + $0x580] sm:$0xff]  ;;  %v189_v24 = vld [vmem:[%s5914_s1 + $0x588] sm:$0xff] }
 0x1ec   :  { %v416_v1 = vmax.f32 %v188_v3, 0.0  ;;  %v417_v4 = vmax.f32 %v189_v24, 0.0  ;;  %v3411_v3 = vld [vmem:[%s5915_s0 + $0x50c] sm:$0xf0] }
 0x1ed   :  { %v2121_v15 = vadd.f32 %v2120_v43, %v2052_v49  ;;  %v3343_v49 = vld [vmem:[%s5915_s0 + $0x48c] sm:$0xf0] }
 0x1ef   :  { %v5315_v51 = vadd.f32 %v2189_v36, %v2121_v15  ;;  %v3646_v15 = vld [vmem:[%s5915_s0 + $0x45c] sm:$0xf] }
 0x1f0   :  { %v1984_v54 = vpop.f32.mrf.mxu3  ;;  %v3354_v48 = vor.u32 %v3646_v15, %v3351_v35  ;;  %v3669_v15 = vld [vmem:[%s5915_s0 + $0x510] sm:$0xf0] }
 0x1f1   :  { %v1985_v18 = vadd.f32 %v1984_v54, %v4806_v11  ;;  %v3661_v35 = vld [vmem:[%s5915_s0 + $0x4d4] sm:$0xf] }
 0x1f2   :  { %v2191_v2 = vpop.f32.mrf.mxu2  ;;  %v2272_v59 = vpop.f32.mrf.mxu0 }
 0x1f3   :  { %v2054_v33 = vadd.f32 %v2053_v31, %v1985_v18  ;;  %v2341_v43 = vpop.f32.mrf.mxu1  ;;  %v3645_v31 = vld [vmem:[%s5915_s0 + $0x454] sm:$0xf]  ;;  %v556_v18 = vpack.c.bf16 %v417_v4, %v416_v1 }
 0x1f4   :  { %v3346_v54 = vor.u32 %v3645_v31, %v3343_v49  ;;  %v3660_v49 = vld [vmem:[%s5915_s0 + $0x4cc] sm:$0xf] }
 0x1f5   :  { %v2123_v0 = vadd.f32 %v2122_v50, %v2054_v33  ;;  %2242 = vmatmul.bf16.gmra.mxu3 %v3286_v58  ;;  %2311 = vmatmul.bf16.gmra.mxu0 %v3290_v63  ;;  %v3349_v50 = vld [vmem:[%s5915_s0 + $0x458] sm:$0xf] }
 0x1f6   :  { %2380 = vmatmul.bf16.gmra.mxu1 %v3294_v28  ;;  %2477 = vmatpush.bf16.msrb.mxu3 %v556_v18 }
 0x1f7   :  { %2449 = vmatmul.bf16.gmra.mxu2 %v3298_v40  ;;  %v5330_v12 = vadd.f32 %v2191_v2, %v2123_v0  ;;  %v220_v40 = vld [vmem:[%s5914_s1 + $0x680] sm:$0xff] }
 0x1f8   :  { %v2203_v11 = vpop.f32.mrf.mxu3  ;;  %v448_v30 = vmax.f32 %v220_v40, 0.0 }
 0x1f9   :  { %v2204_v34 = vadd.f32 %v2203_v11, %v4832_v47  ;;  %v3653_v47 = vld [vmem:[%s5915_s0 + $0x490] sm:$0xf0] }
 0x1fa   :  { %v2410_v45 = vpop.f32.mrf.mxu2  ;;  %v2274_v19 = vpop.f32.mrf.mxu0  ;;  %v3350_v62 = vor.u32 %v3653_v47, %v3349_v50  ;;  %v3403_v50 = vld [vmem:[%s5915_s0 + $0x504] sm:$0xf0]  ;;  %v3668_v47 = vld [vmem:[%s5915_s0 + $0x508] sm:$0xf0] }
 0x1fb   :  { %v2273_v41 = vadd.f32 %v2272_v59, %v2204_v34  ;;  %v2343_v36 = vpop.f32.mrf.mxu1  ;;  %v205_v59 = vld [vmem:[%s5914_s1 + $0x608] sm:$0xff]  ;;  %v3406_v4 = vor.u32 %v3660_v49, %v3403_v50 }
 0x1fc   :  { %v433_v33 = vmax.f32 %v205_v59, 0.0 }
 0x1fd   :  { %v2342_v16 = vadd.f32 %v2341_v43, %v2273_v41  ;;  %v221_v43 = vld [vmem:[%s5914_s1 + $0x688] sm:$0xff] }
 0x1fe   :  { %v449_v34 = vmax.f32 %v221_v43, 0.0  ;;  %v3477_v43 = vld [vmem:[%s5915_s0 + $0x550] sm:$0xf] }
 0x1ff   :  { %v5354_v13 = vadd.f32 %v2410_v45, %v2342_v16 }
 0x200   :  { %v2205_v8 = vpop.f32.mrf.mxu3  ;;  %v572_v31 = vpack.c.bf16 %v449_v34, %v448_v30  ;;  %v3471_v34 = vld [vmem:[%s5915_s0 + $0x584] sm:$0xf0] }
 0x201   :  { %v2206_v42 = vadd.f32 %v2205_v8, %v4844_v6  ;;  %v204_v6 = vld [vmem:[%s5914_s1 + $0x600] sm:$0xff] }
 0x202   :  { %v2412_v5 = vpop.f32.mrf.mxu2  ;;  %v2277_v9 = vpop.f32.mrf.mxu0  ;;  %v432_v32 = vmax.f32 %v204_v6, 0.0  ;;  %2615 = vmatpush.bf16.msrb.mxu1 %v572_v31 }
 0x203   :  { %v2275_v2 = vadd.f32 %v2274_v19, %v2206_v42  ;;  %v2346_v58 = vpop.f32.mrf.mxu1 }
 0x204   :  { %v564_v19 = vpack.c.bf16 %v433_v33, %v432_v32  ;;  %v3463_v32 = vld [vmem:[%s5915_s0 + $0x57c] sm:$0xf0]  ;;  %v3469_v33 = vld [vmem:[%s5915_s0 + $0x548] sm:$0xf] }
 0x205   :  { %v2344_v63 = vadd.f32 %v2343_v36, %v2275_v2  ;;  %2247 = vmatmul.bf16.gmra.mxu3 %v3346_v54  ;;  %2316 = vmatmul.bf16.gmra.mxu0 %v3350_v62  ;;  %v3418_v54 = vor.u32 %v3669_v15, %v3417_v25  ;;  %v3414_v62 = vor.u32 %v3661_v35, %v3411_v3 }
 0x206   :  { %2385 = vmatmul.bf16.gmra.mxu1 %v3354_v48  ;;  %2546 = vmatpush.bf16.msrb.mxu0 %v564_v19 }
 0x207   :  { %2454 = vmatmul.bf16.gmra.mxu2 %v3358_v60  ;;  %v5366_v20 = vadd.f32 %v2412_v5, %v2344_v63 }
 0x208   :  { %v2208_v28 = vpop.f32.mrf.mxu3 }
 0x209   :  { %v2209_v0 = vadd.f32 %v2208_v28, %v4880_v53  ;;  %v3409_v53 = vld [vmem:[%s5915_s0 + $0x4d0] sm:$0xf]  ;;  %v3675_v28 = vld [vmem:[%s5915_s0 + $0x544] sm:$0xf] }
 0x20a   :  { %v2415_v11 = vpop.f32.mrf.mxu2  ;;  %v2279_v45 = vpop.f32.mrf.mxu0  ;;  %v3410_v42 = vor.u32 %v3668_v47, %v3409_v53 }
 0x20b   :  { %v2278_v41 = vadd.f32 %v2277_v9, %v2209_v0  ;;  %v2348_v36 = vpop.f32.mrf.mxu1  ;;  %v3684_v0 = vld [vmem:[%s5915_s0 + $0x588] sm:$0xf0] }
 0x20c   :  { %v3478_v49 = vor.u32 %v3684_v0, %v3477_v43 }
 0x20d   :  { %v2347_v16 = vadd.f32 %v2346_v58, %v2278_v41 }
 0x20f   :  { %v5396_v57 = vadd.f32 %v2415_v11, %v2347_v16  ;;  %v3676_v11 = vld [vmem:[%s5915_s0 + $0x54c] sm:$0xf] }
 0x210   :  { %v2210_v24 = vpop.f32.mrf.mxu3  ;;  %v3474_v50 = vor.u32 %v3676_v11, %v3471_v34 }
 0x211   :  { %v2211_v8 = vadd.f32 %v2210_v24, %v4892_v61 }
 0x212   :  { %v2417_v1 = vpop.f32.mrf.mxu2  ;;  %v2282_v5 = vpop.f32.mrf.mxu0 }
 0x213   :  { %v2280_v9 = vadd.f32 %v2279_v45, %v2211_v8  ;;  %v2351_v60 = vpop.f32.mrf.mxu1 }
 0x215   :  { %v2349_v48 = vadd.f32 %v2348_v36, %v2280_v9  ;;  %2252 = vmatmul.bf16.gmra.mxu3 %v3406_v4  ;;  %2321 = vmatmul.bf16.gmra.mxu0 %v3410_v42  ;;  %v3466_v36 = vor.u32 %v3675_v28, %v3463_v32  ;;  %v3512_v42 = vld [vmem:[%s5915_s0 + $0x2c] sm:$0xf] }
 0x216   :  { %2390 = vmatmul.bf16.gmra.mxu1 %v3414_v62  ;;  %v2833_v62 = vld [vmem:[%s5915_s0 + $0x38] sm:$0xf] }
 0x217   :  { %2459 = vmatmul.bf16.gmra.mxu2 %v3418_v54  ;;  %v5408_v18 = vadd.f32 %v2417_v1, %v2349_v48  ;;  %v2825_v54 = vld [vmem:[%s5915_s0 + $0x30] sm:$0xf]  ;;  %v3513_v48 = vld [vmem:[%s5915_s0 + $0x34] sm:$0xf] }
 0x218   :  { %v2213_v2 = vpop.f32.mrf.mxu3 }
 0x219   :  { %v2214_v58 = vadd.f32 %v2213_v2, %v4925_v44  ;;  %v3683_v44 = vld [vmem:[%s5915_s0 + $0x580] sm:$0xf0]  ;;  %v2827_v2 = vld [vmem:[%s5915_s0 + $0x6c] sm:$0xf0] }
 0x21a   :  { %v2420_v63 = vpop.f32.mrf.mxu2  ;;  %v2284_v61 = vpop.f32.mrf.mxu0  ;;  %v3470_v31 = vor.u32 %v3683_v44, %v3469_v33  ;;  %v2830_v32 = vor.u32 %v3513_v48, %v2827_v2 }
 0x21b   :  { %v2283_v6 = vadd.f32 %v2282_v5, %v2214_v58  ;;  %v2353_v59 = vpop.f32.mrf.mxu1  ;;  %v2819_v5 = vld [vmem:[%s5915_s0 + $0x64] sm:$0xf0] }
 0x21d   :  { %v2352_v40 = vadd.f32 %v2351_v60, %v2283_v6  ;;  %v3521_v60 = vld [vmem:[%s5915_s0 + $0x70] sm:$0xf0]  ;;  %v2822_v6 = vor.u32 %v3512_v42, %v2819_v5 }
 0x21e   :  { %v2834_v28 = vor.u32 %v3521_v60, %v2833_v62 }
 0x21f   :  { %v5426_v30 = vadd.f32 %v2420_v63, %v2352_v40 }
 0x220   :  { %v2215_v45 = vpop.f32.mrf.mxu3 }
 0x221   :  { %v2216_v19 = vadd.f32 %v2215_v45, %v4946_v21 }
 0x222   :  { %v2422_v41 = vpop.f32.mrf.mxu2  ;;  %v2287_v16 = vpop.f32.mrf.mxu0 }
 0x223   :  { %v2285_v53 = vadd.f32 %v2284_v61, %v2216_v19  ;;  %v2356_v47 = vpop.f32.mrf.mxu1 }
 0x225   :  { %v2354_v25 = vadd.f32 %v2353_v59, %v2285_v53  ;;  %2257 = vmatmul.bf16.gmra.mxu3 %v3466_v36  ;;  %2326 = vmatmul.bf16.gmra.mxu0 %v3470_v31  ;;  %v3527_v31 = vld [vmem:[%s5915_s0 + $0xa4] sm:$0xf] }
 0x226   :  { %2395 = vmatmul.bf16.gmra.mxu1 %v3474_v50  ;;  %v2893_v50 = vld [vmem:[%s5915_s0 + $0xb0] sm:$0xf] }
 0x227   :  { %2464 = vmatmul.bf16.gmra.mxu2 %v3478_v49  ;;  %v5438_v15 = vadd.f32 %v2422_v41, %v2354_v25  ;;  %v2885_v49 = vld [vmem:[%s5915_s0 + $0xa8] sm:$0xf]  ;;  %v3528_v25 = vld [vmem:[%s5915_s0 + $0xac] sm:$0xf] }
 0x228   :  { %v2218_v35 = vpop.f32.mrf.mxu3 }
 0x229   :  { %v2219_v3 = vadd.f32 %v2218_v35, %v4970_v22  ;;  %v3520_v22 = vld [vmem:[%s5915_s0 + $0x68] sm:$0xf0]  ;;  %v2887_v35 = vld [vmem:[%s5915_s0 + $0xe4] sm:$0xf0] }
 0x22a   :  { %v2425_v24 = vpop.f32.mrf.mxu2  ;;  %v2289_v21 = vpop.f32.mrf.mxu0  ;;  %v2826_v59 = vor.u32 %v3520_v22, %v2825_v54  ;;  %v2890_v5 = vor.u32 %v3528_v25, %v2887_v35 }
 0x22b   :  { %v2288_v8 = vadd.f32 %v2287_v16, %v2219_v3  ;;  %v2358_v1 = vpop.f32.mrf.mxu1  ;;  %v2879_v16 = vld [vmem:[%s5915_s0 + $0xdc] sm:$0xf0] }
 0x22d   :  { %v2357_v4 = vadd.f32 %v2356_v47, %v2288_v8  ;;  %v3536_v47 = vld [vmem:[%s5915_s0 + $0xe8] sm:$0xf0]  ;;  %v2882_v8 = vor.u32 %v3527_v31, %v2879_v16 }
 0x22e   :  { %v2894_v42 = vor.u32 %v3536_v47, %v2893_v50 }
 0x22f   :  { %v5456_v9 = vadd.f32 %v2425_v24, %v2357_v4 }
 0x230   :  { %v2220_v58 = vpop.f32.mrf.mxu3 }
 0x231   :  { %v2221_v63 = vadd.f32 %v2220_v58, %v4982_v10 }
 0x232   :  { %v2427_v61 = vpop.f32.mrf.mxu2  ;;  %v2292_v40 = vpop.f32.mrf.mxu0 }
 0x233   :  { %v2290_v33 = vadd.f32 %v2289_v21, %v2221_v63  ;;  %v2361_v44 = vpop.f32.mrf.mxu1 }
 0x235   :  { %v2359_v43 = vadd.f32 %v2358_v1, %v2290_v33  ;;  %2478 = vmatmul.bf16.vlgmr.msrb.gmra.mxu3 %v2822_v6  ;;  %2547 = vmatmul.bf16.vlgmr.msrb.gmra.mxu0 %v2826_v59  ;;  %v3542_v59 = vld [vmem:[%s5915_s0 + $0x11c] sm:$0xf] }
 0x236   :  { %2616 = vmatmul.bf16.vlgmr.msrb.gmra.mxu1 %v2830_v32  ;;  %v2953_v32 = vld [vmem:[%s5915_s0 + $0x128] sm:$0xf] }
 0x237   :  { %3495 = vmatmul.msk.bf16.vlgmr.msrb.gmra.mxu2 %vm1674_vm0, %v2834_v28  ;;  %v5469_v0 = vadd.f32 %v2427_v61, %v2359_v43  ;;  %v2945_v28 = vld [vmem:[%s5915_s0 + $0x120] sm:$0xf]  ;;  %v3543_v43 = vld [vmem:[%s5915_s0 + $0x124] sm:$0xf] }
 0x238   :  { %v2223_v11 = vpop.f32.mrf.mxu3 }
 0x239   :  { %v2224_v10 = vadd.f32 %v2223_v11, %v5012_v26  ;;  %v3535_v26 = vld [vmem:[%s5915_s0 + $0xe0] sm:$0xf0]  ;;  %v2947_v11 = vld [vmem:[%s5915_s0 + $0x15c] sm:$0xf0] }
 0x23a   :  { %v2430_v34 = vpop.f32.mrf.mxu2  ;;  %v2294_v45 = vpop.f32.mrf.mxu0  ;;  %v2886_v1 = vor.u32 %v3535_v26, %v2885_v49  ;;  %v2950_v16 = vor.u32 %v3543_v43, %v2947_v11 }
 0x23b   :  { %v2293_v19 = vadd.f32 %v2292_v40, %v2224_v10  ;;  %v2363_v41 = vpop.f32.mrf.mxu1  ;;  %v2939_v40 = vld [vmem:[%s5915_s0 + $0x154] sm:$0xf0] }
 0x23d   :  { %v2362_v36 = vadd.f32 %v2361_v44, %v2293_v19  ;;  %v3551_v44 = vld [vmem:[%s5915_s0 + $0x160] sm:$0xf0]  ;;  %v2942_v19 = vor.u32 %v3542_v59, %v2939_v40 }
 0x23e   :  { %v2954_v31 = vor.u32 %v3551_v44, %v2953_v32 }
 0x23f   :  { %v5487_v53 = vadd.f32 %v2430_v34, %v2362_v36 }
 0x240   :  { %v2225_v3 = vpop.f32.mrf.mxu3 }
 0x241   :  { %v2226_v24 = vadd.f32 %v2225_v3, %v5024_v29 }
 0x242   :  { %v2432_v21 = vpop.f32.mrf.mxu2  ;;  %v2297_v4 = vpop.f32.mrf.mxu0 }
 0x243   :  { %v2295_v54 = vadd.f32 %v2294_v45, %v2226_v24  ;;  %v2366_v22 = vpop.f32.mrf.mxu1 }
 0x245   :  { %v2364_v62 = vadd.f32 %v2363_v41, %v2295_v54  ;;  %2483 = vmatmul.bf16.gmra.mxu3 %v2882_v8  ;;  %2552 = vmatmul.bf16.gmra.mxu0 %v2886_v1  ;;  %v3557_v1 = vld [vmem:[%s5915_s0 + $0x194] sm:$0xf] }
 0x246   :  { %2621 = vmatmul.bf16.gmra.mxu1 %v2890_v5  ;;  %v3013_v5 = vld [vmem:[%s5915_s0 + $0x1a0] sm:$0xf] }
 0x247   :  { %3496 = vmatmul.msk.bf16.gmra.mxu2 %vm1674_vm0, %v2894_v42  ;;  %v5500_v60 = vadd.f32 %v2432_v21, %v2364_v62  ;;  %v3005_v42 = vld [vmem:[%s5915_s0 + $0x198] sm:$0xf]  ;;  %v3558_v62 = vld [vmem:[%s5915_s0 + $0x19c] sm:$0xf] }
 0x248   :  { %v2228_v48 = vpop.f32.mrf.mxu3 }
 0x249   :  { %v2229_v2 = vadd.f32 %v2228_v48, %v5057_v37  ;;  %v3550_v37 = vld [vmem:[%s5915_s0 + $0x158] sm:$0xf0]  ;;  %v3007_v48 = vld [vmem:[%s5915_s0 + $0x1d4] sm:$0xf0] }
 0x24a   :  { %v2435_v29 = vpop.f32.mrf.mxu2  ;;  %v2299_v58 = vpop.f32.mrf.mxu0  ;;  %v2946_v41 = vor.u32 %v3550_v37, %v2945_v28  ;;  %v3010_v40 = vor.u32 %v3558_v62, %v3007_v48 }
 0x24b   :  { %v2298_v63 = vadd.f32 %v2297_v4, %v2229_v2  ;;  %v2368_v61 = vpop.f32.mrf.mxu1  ;;  %v2999_v4 = vld [vmem:[%s5915_s0 + $0x1cc] sm:$0xf0] }
 0x24d   :  { %v2367_v6 = vadd.f32 %v2366_v22, %v2298_v63  ;;  %v3566_v22 = vld [vmem:[%s5915_s0 + $0x1d8] sm:$0xf0]  ;;  %v3002_v63 = vor.u32 %v3557_v1, %v2999_v4 }
 0x24e   :  { %v3014_v59 = vor.u32 %v3566_v22, %v3013_v5 }
 0x24f   :  { %v5518_v33 = vadd.f32 %v2435_v29, %v2367_v6 }
 0x250   :  { %v2230_v10 = vpop.f32.mrf.mxu3 }
 0x251   :  { %v2231_v34 = vadd.f32 %v2230_v10, %v5072_v56 }
 0x252   :  { %v2437_v45 = vpop.f32.mrf.mxu2  ;;  %v2302_v36 = vpop.f32.mrf.mxu0 }
 0x253   :  { %v2300_v49 = vadd.f32 %v2299_v58, %v2231_v34  ;;  %v2371_v26 = vpop.f32.mrf.mxu1 }
 0x255   :  { %v2369_v50 = vadd.f32 %v2368_v61, %v2300_v49  ;;  %2488 = vmatmul.bf16.gmra.mxu3 %v2942_v19  ;;  %2557 = vmatmul.bf16.gmra.mxu0 %v2946_v41  ;;  %v3572_v41 = vld [vmem:[%s5915_s0 + $0x20c] sm:$0xf] }
 0x256   :  { %2626 = vmatmul.bf16.gmra.mxu1 %v2950_v16  ;;  %v3073_v16 = vld [vmem:[%s5915_s0 + $0x218] sm:$0xf] }
 0x257   :  { %3497 = vmatmul.msk.bf16.gmra.mxu2 %vm1674_vm0, %v2954_v31  ;;  %v5531_v47 = vadd.f32 %v2437_v45, %v2369_v50  ;;  %v3065_v31 = vld [vmem:[%s5915_s0 + $0x210] sm:$0xf]  ;;  %v3573_v50 = vld [vmem:[%s5915_s0 + $0x214] sm:$0xf] }
 0x258   :  { %v2233_v25 = vpop.f32.mrf.mxu3 }
 0x259   :  { %v2234_v35 = vadd.f32 %v2233_v25, %v5096_v23  ;;  %v3565_v23 = vld [vmem:[%s5915_s0 + $0x1d0] sm:$0xf0]  ;;  %v3067_v25 = vld [vmem:[%s5915_s0 + $0x24c] sm:$0xf0] }
 0x25a   :  { %v2440_v56 = vpop.f32.mrf.mxu2  ;;  %v2304_v3 = vpop.f32.mrf.mxu0  ;;  %v3006_v61 = vor.u32 %v3565_v23, %v3005_v42  ;;  %v3070_v4 = vor.u32 %v3573_v50, %v3067_v25 }
 0x25b   :  { %v2303_v24 = vadd.f32 %v2302_v36, %v2234_v35  ;;  %v2373_v21 = vpop.f32.mrf.mxu1  ;;  %v3059_v36 = vld [vmem:[%s5915_s0 + $0x244] sm:$0xf0] }
 0x25d   :  { %v2372_v8 = vadd.f32 %v2371_v26, %v2303_v24  ;;  %v3581_v26 = vld [vmem:[%s5915_s0 + $0x250] sm:$0xf0]  ;;  %v3062_v24 = vor.u32 %v3572_v41, %v3059_v36 }
 0x25e   :  { %v3074_v1 = vor.u32 %v3581_v26, %v3073_v16 }
 0x25f   :  { %v5549_v54 = vadd.f32 %v2440_v56, %v2372_v8 }
 0x260   :  { %v2235_v2 = vpop.f32.mrf.mxu3 }
 0x261   :  { %v2236_v29 = vadd.f32 %v2235_v2, %v5108_v52 }
 0x262   :  { %v2442_v58 = vpop.f32.mrf.mxu2  ;;  %v2307_v6 = vpop.f32.mrf.mxu0 }
 0x263   :  { %v2305_v28 = vadd.f32 %v2304_v3, %v2236_v29  ;;  %v2376_v37 = vpop.f32.mrf.mxu1 }
 0x265   :  { %v2374_v32 = vadd.f32 %v2373_v21, %v2305_v28  ;;  %2493 = vmatmul.bf16.gmra.mxu3 %v3002_v63  ;;  %2562 = vmatmul.bf16.gmra.mxu0 %v3006_v61  ;;  %v3587_v61 = vld [vmem:[%s5915_s0 + $0x284] sm:$0xf] }
 0x266   :  { %2631 = vmatmul.bf16.gmra.mxu1 %v3010_v40  ;;  %v3133_v40 = vld [vmem:[%s5915_s0 + $0x290] sm:$0xf] }
 0x267   :  { %3498 = vmatmul.msk.bf16.gmra.mxu2 %vm1674_vm0, %v3014_v59  ;;  %v5562_v44 = vadd.f32 %v2442_v58, %v2374_v32  ;;  %v3125_v59 = vld [vmem:[%s5915_s0 + $0x288] sm:$0xf]  ;;  %v3588_v32 = vld [vmem:[%s5915_s0 + $0x28c] sm:$0xf] }
 0x268   :  { %v2238_v43 = vpop.f32.mrf.mxu3 }
 0x269   :  { %v2239_v11 = vadd.f32 %v2238_v43, %v5138_v14  ;;  %v3580_v14 = vld [vmem:[%s5915_s0 + $0x248] sm:$0xf0]  ;;  %v3127_v43 = vld [vmem:[%s5915_s0 + $0x2c4] sm:$0xf0] }
 0x26a   :  { %v2445_v52 = vpop.f32.mrf.mxu2  ;;  %v2309_v10 = vpop.f32.mrf.mxu0  ;;  %v3066_v21 = vor.u32 %v3580_v14, %v3065_v31  ;;  %v3130_v36 = vor.u32 %v3588_v32, %v3127_v43 }
 0x26b   :  { %v2308_v34 = vadd.f32 %v2307_v6, %v2239_v11  ;;  %v2378_v45 = vpop.f32.mrf.mxu1  ;;  %v3119_v6 = vld [vmem:[%s5915_s0 + $0x2bc] sm:$0xf0] }
 0x26d   :  { %v2377_v19 = vadd.f32 %v2376_v37, %v2308_v34  ;;  %v3596_v37 = vld [vmem:[%s5915_s0 + $0x2c8] sm:$0xf0]  ;;  %v3122_v34 = vor.u32 %v3587_v61, %v3119_v6 }
 0x26e   :  { %v3134_v41 = vor.u32 %v3596_v37, %v3133_v40 }
 0x26f   :  { %v5580_v49 = vadd.f32 %v2445_v52, %v2377_v19 }
 0x270   :  { %v2240_v35 = vpop.f32.mrf.mxu3 }
 0x271   :  { %v2241_v56 = vadd.f32 %v2240_v35, %v5150_v46 }
 0x272   :  { %v2447_v3 = vpop.f32.mrf.mxu2  ;;  %v2312_v8 = vpop.f32.mrf.mxu0 }
 0x273   :  { %v2310_v42 = vadd.f32 %v2309_v10, %v2241_v56  ;;  %v2381_v23 = vpop.f32.mrf.mxu1 }
 0x275   :  { %v2379_v5 = vadd.f32 %v2378_v45, %v2310_v42  ;;  %2498 = vmatmul.bf16.gmra.mxu3 %v3062_v24  ;;  %2567 = vmatmul.bf16.gmra.mxu0 %v3066_v21  ;;  %v3602_v21 = vld [vmem:[%s5915_s0 + $0x2fc] sm:$0xf] }
 0x276   :  { %2636 = vmatmul.bf16.gmra.mxu1 %v3070_v4  ;;  %v3193_v4 = vld [vmem:[%s5915_s0 + $0x308] sm:$0xf] }
 0x277   :  { %3499 = vmatmul.msk.bf16.gmra.mxu2 %vm1674_vm0, %v3074_v1  ;;  %v5593_v22 = vadd.f32 %v2447_v3, %v2379_v5  ;;  %v3185_v1 = vld [vmem:[%s5915_s0 + $0x300] sm:$0xf]  ;;  %v3603_v5 = vld [vmem:[%s5915_s0 + $0x304] sm:$0xf] }
 0x278   :  { %v2243_v62 = vpop.f32.mrf.mxu3 }
 0x279   :  { %v2244_v48 = vadd.f32 %v2243_v62, %v5183_v17  ;;  %v3595_v17 = vld [vmem:[%s5915_s0 + $0x2c0] sm:$0xf0]  ;;  %v3187_v62 = vld [vmem:[%s5915_s0 + $0x33c] sm:$0xf0] }
 0x27a   :  { %v2450_v46 = vpop.f32.mrf.mxu2  ;;  %v2314_v2 = vpop.f32.mrf.mxu0  ;;  %v3126_v45 = vor.u32 %v3595_v17, %v3125_v59  ;;  %v3190_v6 = vor.u32 %v3603_v5, %v3187_v62 }
 0x27b   :  { %v2313_v29 = vadd.f32 %v2312_v8, %v2244_v48  ;;  %v2383_v58 = vpop.f32.mrf.mxu1  ;;  %v3179_v8 = vld [vmem:[%s5915_s0 + $0x334] sm:$0xf0] }
 0x27d   :  { %v2382_v63 = vadd.f32 %v2381_v23, %v2313_v29  ;;  %v3611_v23 = vld [vmem:[%s5915_s0 + $0x340] sm:$0xf0]  ;;  %v3182_v29 = vor.u32 %v3602_v21, %v3179_v8 }
 0x27e   :  { %v3194_v61 = vor.u32 %v3611_v23, %v3193_v4 }
 0x27f   :  { %v5611_v28 = vadd.f32 %v2450_v46, %v2382_v63 }
 0x280   :  { %v2245_v11 = vpop.f32.mrf.mxu3 }
 0x281   :  { %v2246_v52 = vadd.f32 %v2245_v11, %v5204_v27 }
 0x282   :  { %v2452_v10 = vpop.f32.mrf.mxu2  ;;  %v2317_v19 = vpop.f32.mrf.mxu0 }
 0x283   :  { %v2315_v31 = vadd.f32 %v2314_v2, %v2246_v52  ;;  %v2386_v14 = vpop.f32.mrf.mxu1 }
 0x285   :  { %v2384_v16 = vadd.f32 %v2383_v58, %v2315_v31  ;;  %2503 = vmatmul.bf16.gmra.mxu3 %v3122_v34  ;;  %2572 = vmatmul.bf16.gmra.mxu0 %v3126_v45  ;;  %v3617_v45 = vld [vmem:[%s5915_s0 + $0x374] sm:$0xf] }
 0x286   :  { %2641 = vmatmul.bf16.gmra.mxu1 %v3130_v36  ;;  %v3253_v36 = vld [vmem:[%s5915_s0 + $0x380] sm:$0xf] }
 0x287   :  { %3500 = vmatmul.msk.bf16.gmra.mxu2 %vm1674_vm0, %v3134_v41  ;;  %v5624_v26 = vadd.f32 %v2452_v10, %v2384_v16  ;;  %v3245_v41 = vld [vmem:[%s5915_s0 + $0x378] sm:$0xf]  ;;  %v3618_v16 = vld [vmem:[%s5915_s0 + $0x37c] sm:$0xf] }
 0x288   :  { %v2248_v50 = vpop.f32.mrf.mxu3 }
 0x289   :  { %v2249_v25 = vadd.f32 %v2248_v50, %v5228_v55  ;;  %v3610_v55 = vld [vmem:[%s5915_s0 + $0x338] sm:$0xf0]  ;;  %v3247_v50 = vld [vmem:[%s5915_s0 + $0x3b4] sm:$0xf0] }
 0x28a   :  { %v2455_v27 = vpop.f32.mrf.mxu2  ;;  %v2319_v35 = vpop.f32.mrf.mxu0  ;;  %v3186_v58 = vor.u32 %v3610_v55, %v3185_v1  ;;  %v3250_v8 = vor.u32 %v3618_v16, %v3247_v50 }
 0x28b   :  { %v2318_v56 = vadd.f32 %v2317_v19, %v2249_v25  ;;  %v2388_v3 = vpop.f32.mrf.mxu1  ;;  %v3239_v19 = vld [vmem:[%s5915_s0 + $0x3ac] sm:$0xf0] }
 0x28d   :  { %v2387_v24 = vadd.f32 %v2386_v14, %v2318_v56  ;;  %v3626_v14 = vld [vmem:[%s5915_s0 + $0x3b8] sm:$0xf0]  ;;  %v3242_v56 = vor.u32 %v3617_v45, %v3239_v19 }
 0x28e   :  { %v3254_v21 = vor.u32 %v3626_v14, %v3253_v36 }
 0x28f   :  { %v5642_v42 = vadd.f32 %v2455_v27, %v2387_v24 }
 0x290   :  { %v2250_v48 = vpop.f32.mrf.mxu3 }
 0x291   :  { %v2251_v46 = vadd.f32 %v2250_v48, %v5240_v39 }
 0x292   :  { %v2457_v2 = vpop.f32.mrf.mxu2  ;;  %v2322_v63 = vpop.f32.mrf.mxu0 }
 0x293   :  { %v2320_v59 = vadd.f32 %v2319_v35, %v2251_v46  ;;  %v2391_v17 = vpop.f32.mrf.mxu1 }
 0x295   :  { %v2389_v40 = vadd.f32 %v2388_v3, %v2320_v59  ;;  %2508 = vmatmul.bf16.gmra.mxu3 %v3182_v29  ;;  %2577 = vmatmul.bf16.gmra.mxu0 %v3186_v58  ;;  %v3632_v58 = vld [vmem:[%s5915_s0 + $0x3ec] sm:$0xf] }
 0x296   :  { %2646 = vmatmul.bf16.gmra.mxu1 %v3190_v6  ;;  %v3313_v6 = vld [vmem:[%s5915_s0 + $0x3f8] sm:$0xf] }
 0x297   :  { %3501 = vmatmul.msk.bf16.gmra.mxu2 %vm1674_vm0, %v3194_v61  ;;  %v5655_v37 = vadd.f32 %v2457_v2, %v2389_v40  ;;  %v3305_v61 = vld [vmem:[%s5915_s0 + $0x3f0] sm:$0xf]  ;;  %v3633_v40 = vld [vmem:[%s5915_s0 + $0x3f4] sm:$0xf] }
 0x298   :  { %v2253_v32 = vpop.f32.mrf.mxu3 }
 0x299   :  { %v2254_v43 = vadd.f32 %v2253_v32, %v5270_v7  ;;  %v3625_v7 = vld [vmem:[%s5915_s0 + $0x3b0] sm:$0xf0]  ;;  %v3307_v32 = vld [vmem:[%s5915_s0 + $0x42c] sm:$0xf0] }
 0x29a   :  { %v2460_v39 = vpop.f32.mrf.mxu2  ;;  %v2324_v11 = vpop.f32.mrf.mxu0  ;;  %v3246_v3 = vor.u32 %v3625_v7, %v3245_v41  ;;  %v3310_v19 = vor.u32 %v3633_v40, %v3307_v32 }
 0x29b   :  { %v2323_v52 = vadd.f32 %v2322_v63, %v2254_v43  ;;  %v2393_v10 = vpop.f32.mrf.mxu1  ;;  %v3299_v63 = vld [vmem:[%s5915_s0 + $0x424] sm:$0xf0] }
 0x29d   :  { %v2392_v34 = vadd.f32 %v2391_v17, %v2323_v52  ;;  %v3641_v17 = vld [vmem:[%s5915_s0 + $0x430] sm:$0xf0]  ;;  %v3302_v52 = vor.u32 %v3632_v58, %v3299_v63 }
 0x29e   :  { %v3314_v45 = vor.u32 %v3641_v17, %v3313_v6 }
 0x29f   :  { %v5673_v31 = vadd.f32 %v2460_v39, %v2392_v34 }
 0x2a0   :  { %v2255_v25 = vpop.f32.mrf.mxu3 }
 0x2a1   :  { %v2256_v27 = vadd.f32 %v2255_v25, %v5282_v38 }
 0x2a2   :  { %v2462_v35 = vpop.f32.mrf.mxu2  ;;  %v2327_v24 = vpop.f32.mrf.mxu0 }
 0x2a3   :  { %v2325_v1 = vadd.f32 %v2324_v11, %v2256_v27  ;;  %v2396_v55 = vpop.f32.mrf.mxu1 }
 0x2a5   :  { %v2394_v4 = vadd.f32 %v2393_v10, %v2325_v1  ;;  %2513 = vmatmul.bf16.gmra.mxu3 %v3242_v56  ;;  %2582 = vmatmul.bf16.gmra.mxu0 %v3246_v3  ;;  %v3647_v3 = vld [vmem:[%s5915_s0 + $0x464] sm:$0xf] }
 0x2a6   :  { %2651 = vmatmul.bf16.gmra.mxu1 %v3250_v8  ;;  %v3373_v8 = vld [vmem:[%s5915_s0 + $0x470] sm:$0xf] }
 0x2a7   :  { %3502 = vmatmul.msk.bf16.gmra.mxu2 %vm1674_vm0, %v3254_v21  ;;  %v5686_v23 = vadd.f32 %v2462_v35, %v2394_v4  ;;  %v3365_v21 = vld [vmem:[%s5915_s0 + $0x468] sm:$0xf]  ;;  %v3648_v4 = vld [vmem:[%s5915_s0 + $0x46c] sm:$0xf] }
 0x2a8   :  { %v2258_v5 = vpop.f32.mrf.mxu3 }
 0x2a9   :  { %v2259_v62 = vadd.f32 %v2258_v5, %v5315_v51  ;;  %v3640_v51 = vld [vmem:[%s5915_s0 + $0x428] sm:$0xf0]  ;;  %v3367_v5 = vld [vmem:[%s5915_s0 + $0x4a4] sm:$0xf0] }
 0x2aa   :  { %v2465_v38 = vpop.f32.mrf.mxu2  ;;  %v2329_v48 = vpop.f32.mrf.mxu0  ;;  %v3306_v10 = vor.u32 %v3640_v51, %v3305_v61  ;;  %v3370_v63 = vor.u32 %v3648_v4, %v3367_v5 }
 0x2ab   :  { %v2328_v46 = vadd.f32 %v2327_v24, %v2259_v62  ;;  %v2398_v2 = vpop.f32.mrf.mxu1  ;;  %v3359_v24 = vld [vmem:[%s5915_s0 + $0x49c] sm:$0xf0] }
 0x2ad   :  { %v2397_v29 = vadd.f32 %v2396_v55, %v2328_v46  ;;  %v3656_v55 = vld [vmem:[%s5915_s0 + $0x4a8] sm:$0xf0]  ;;  %v3362_v46 = vor.u32 %v3647_v3, %v3359_v24 }
 0x2ae   :  { %v3374_v58 = vor.u32 %v3656_v55, %v3373_v8 }
 0x2af   :  { %v5704_v59 = vadd.f32 %v2465_v38, %v2397_v29 }
 0x2b0   :  { %v2260_v43 = vpop.f32.mrf.mxu3 }
 0x2b1   :  { %v2261_v39 = vadd.f32 %v2260_v43, %v5330_v12 }
 0x2b2   :  { %v2467_v11 = vpop.f32.mrf.mxu2  ;;  %v2548_v34 = vpop.f32.mrf.mxu0 }
 0x2b3   :  { %v2330_v41 = vadd.f32 %v2329_v48, %v2261_v39  ;;  %v2617_v7 = vpop.f32.mrf.mxu1 }
 0x2b5   :  { %v2399_v36 = vadd.f32 %v2398_v2, %v2330_v41  ;;  %2518 = vmatmul.bf16.gmra.mxu3 %v3302_v52  ;;  %2587 = vmatmul.bf16.gmra.mxu0 %v3306_v10  ;;  %v3662_v10 = vld [vmem:[%s5915_s0 + $0x4dc] sm:$0xf] }
 0x2b6   :  { %2656 = vmatmul.bf16.gmra.mxu1 %v3310_v19  ;;  %v3433_v19 = vld [vmem:[%s5915_s0 + $0x4e8] sm:$0xf] }
 0x2b7   :  { %3503 = vmatmul.msk.bf16.gmra.mxu2 %vm1674_vm0, %v3314_v45  ;;  %v5717_v14 = vadd.f32 %v2467_v11, %v2399_v36  ;;  %v3425_v45 = vld [vmem:[%s5915_s0 + $0x4e0] sm:$0xf]  ;;  %v3663_v36 = vld [vmem:[%s5915_s0 + $0x4e4] sm:$0xf] }
 0x2b8   :  { %v2479_v16 = vpop.f32.mrf.mxu3 }
 0x2b9   :  { %v2480_v50 = vadd.f32 %v2479_v16, %v5354_v13  ;;  %v3655_v13 = vld [vmem:[%s5915_s0 + $0x4a0] sm:$0xf0]  ;;  %v3427_v16 = vld [vmem:[%s5915_s0 + $0x51c] sm:$0xf0] }
 0x2ba   :  { %v2686_v12 = vpop.f32.mrf.mxu2  ;;  %v2550_v25 = vpop.f32.mrf.mxu0  ;;  %v3366_v2 = vor.u32 %v3655_v13, %v3365_v21  ;;  %v3430_v24 = vor.u32 %v3663_v36, %v3427_v16 }
 0x2bb   :  { %v2549_v27 = vadd.f32 %v2548_v34, %v2480_v50  ;;  %v2619_v35 = vpop.f32.mrf.mxu1  ;;  %v3419_v34 = vld [vmem:[%s5915_s0 + $0x514] sm:$0xf0] }
 0x2bd   :  { %v2618_v56 = vadd.f32 %v2617_v7, %v2549_v27  ;;  %v3671_v7 = vld [vmem:[%s5915_s0 + $0x520] sm:$0xf0]  ;;  %v3422_v27 = vor.u32 %v3662_v10, %v3419_v34 }
 0x2be   :  { %v3434_v3 = vor.u32 %v3671_v7, %v3433_v19 }
 0x2bf   :  { %v2687_v1 = vadd.f32 %v2686_v12, %v2618_v56 }
 0x2c0   :  { %v2481_v62 = vpop.f32.mrf.mxu3 }
 0x2c1   :  { %2747 = vst.msk [vmem:[%s5916_s2] sm:$0xff] %vm2746_vm1, %v2687_v1  ;;  %v2482_v38 = vadd.f32 %v2481_v62, %v5366_v20 }
 0x2c2   :  { %v2688_v48 = vpop.f32.mrf.mxu2  ;;  %v2553_v29 = vpop.f32.mrf.mxu0 }
 0x2c3   :  { %v2551_v61 = vadd.f32 %v2550_v25, %v2482_v38  ;;  %v2622_v51 = vpop.f32.mrf.mxu1 }
 0x2c5   :  { %v2620_v6 = vadd.f32 %v2619_v35, %v2551_v61  ;;  %2523 = vmatmul.bf16.gmra.mxu3 %v3362_v46  ;;  %2592 = vmatmul.bf16.gmra.mxu0 %v3366_v2  ;;  %v3677_v46 = vld [vmem:[%s5915_s0 + $0x554] sm:$0xf]  ;;  %v3479_v2 = vld [vmem:[%s5915_s0 + $0x58c] sm:$0xf0]  ;;  %v3686_v61 = vld [vmem:[%s5915_s0 + $0x598] sm:$0xf0] }
 0x2c6   :  { %2661 = vmatmul.bf16.gmra.mxu1 %v3370_v63 }
 0x2c7   :  { %3504 = vmatmul.msk.bf16.gmra.mxu2 %vm1674_vm0, %v3374_v58  ;;  %v2689_v17 = vadd.f32 %v2688_v48, %v2620_v6  ;;  %v3493_v58 = vld [vmem:[%s5915_s0 + $0x560] sm:$0xf]  ;;  %v3487_v6 = vld [vmem:[%s5915_s0 + $0x594] sm:$0xf0] }
 0x2c8   :  { %v2484_v40 = vpop.f32.mrf.mxu3 }
 0x2c9   :  { %2748 = vst.msk [vmem:[%s5916_s2 + $0x8] sm:$0xff] %vm2746_vm1, %v2689_v17  ;;  %v2485_v20 = vadd.f32 %v2484_v40, %v5396_v57  ;;  %v3670_v57 = vld [vmem:[%s5915_s0 + $0x518] sm:$0xf0] }
 0x2ca   :  { %v2691_v32 = vpop.f32.mrf.mxu2  ;;  %v2555_v43 = vpop.f32.mrf.mxu0  ;;  %v3426_v35 = vor.u32 %v3670_v57, %v3425_v45 }
 0x2cb   :  { %v2554_v39 = vadd.f32 %v2553_v29, %v2485_v20  ;;  %v2624_v11 = vpop.f32.mrf.mxu1  ;;  %v3485_v29 = vld [vmem:[%s5915_s0 + $0x558] sm:$0xf] }
 0x2cd   :  { %v2623_v52 = vadd.f32 %v2622_v51, %v2554_v39  ;;  %v3678_v51 = vld [vmem:[%s5915_s0 + $0x55c] sm:$0xf] }
 0x2cf   :  { %v2692_v41 = vadd.f32 %v2691_v32, %v2623_v52  ;;  %v3482_v32 = vor.u32 %v3677_v46, %v3479_v2  ;;  %v3490_v52 = vor.u32 %v3678_v51, %v3487_v6 }
 0x2d0   :  { %v2486_v50 = vpop.f32.mrf.mxu3 }
 0x2d1   :  { %2749 = vst.msk [vmem:[%s5916_s2 + $0x10] sm:$0xff] %vm2746_vm1, %v2692_v41  ;;  %v2487_v12 = vadd.f32 %v2486_v50, %v5408_v18 }
 0x2d2   :  { %v2693_v25 = vpop.f32.mrf.mxu2  ;;  %v2558_v56 = vpop.f32.mrf.mxu0 }
 0x2d3   :  { %v2556_v21 = vadd.f32 %v2555_v43, %v2487_v12  ;;  %v2627_v13 = vpop.f32.mrf.mxu1 }
 0x2d5   :  { %v2625_v8 = vadd.f32 %v2624_v11, %v2556_v21  ;;  %2528 = vmatmul.bf16.gmra.mxu3 %v3422_v27  ;;  %2597 = vmatmul.bf16.gmra.mxu0 %v3426_v35  ;;  %v3494_v11 = vor.u32 %v3686_v61, %v3493_v58 }
 0x2d6   :  { %2666 = vmatmul.bf16.gmra.mxu1 %v3430_v24 }
 0x2d7   :  { %3505 = vmatmul.msk.bf16.gmra.mxu2 %vm1674_vm0, %v3434_v3  ;;  %v2694_v1 = vadd.f32 %v2693_v25, %v2625_v8 }
 0x2d8   :  { %v2489_v55 = vpop.f32.mrf.mxu3 }
 0x2d9   :  { %2750 = vst.msk [vmem:[%s5916_s2 + $0x18] sm:$0xff] %vm2746_vm1, %v2694_v1  ;;  %v2490_v18 = vadd.f32 %v2489_v55, %v5426_v30  ;;  %v3685_v30 = vld [vmem:[%s5915_s0 + $0x590] sm:$0xf0] }
 0x2da   :  { %v2696_v4 = vpop.f32.mrf.mxu2  ;;  %v2560_v5 = vpop.f32.mrf.mxu0  ;;  %v3486_v43 = vor.u32 %v3685_v30, %v3485_v29 }
 0x2db   :  { %v2559_v62 = vadd.f32 %v2558_v56, %v2490_v18  ;;  %v2629_v38 = vpop.f32.mrf.mxu1 }
 0x2dd   :  { %v2628_v48 = vadd.f32 %v2627_v13, %v2559_v62 }
 0x2df   :  { %v2697_v63 = vadd.f32 %v2696_v4, %v2628_v48 }
 0x2e0   :  { %v2491_v17 = vpop.f32.mrf.mxu3 }
 0x2e1   :  { %2751 = vst.msk [vmem:[%s5916_s2 + $0x20] sm:$0xff] %vm2746_vm1, %v2697_v63  ;;  %v2492_v40 = vadd.f32 %v2491_v17, %v5438_v15 }
 0x2e2   :  { %v2698_v20 = vpop.f32.mrf.mxu2  ;;  %v2563_v39 = vpop.f32.mrf.mxu0 }
 0x2e3   :  { %v2561_v10 = vadd.f32 %v2560_v5, %v2492_v40  ;;  %v2632_v34 = vpop.f32.mrf.mxu1 }
 0x2e5   :  { %v2630_v45 = vadd.f32 %v2629_v38, %v2561_v10  ;;  %2533 = vmatmul.bf16.gmra.mxu3 %v3482_v32  ;;  %2602 = vmatmul.bf16.gmra.mxu0 %v3486_v43 }
 0x2e6   :  { %2671 = vmatmul.bf16.gmra.mxu1 %v3490_v52 }
 0x2e7   :  { %3506 = vmatmul.msk.bf16.gmra.mxu2 %vm1674_vm0, %v3494_v11  ;;  %v2699_v57 = vadd.f32 %v2698_v20, %v2630_v45 }
 0x2e8   :  { %v2494_v19 = vpop.f32.mrf.mxu3 }
 0x2e9   :  { %2752 = vst.msk [vmem:[%s5916_s2 + $0x28] sm:$0xff] %vm2746_vm1, %v2699_v57  ;;  %v2495_v15 = vadd.f32 %v2494_v19, %v5456_v9 }
 0x2ea   :  { %v2701_v41 = vpop.f32.mrf.mxu2  ;;  %v2565_v7 = vpop.f32.mrf.mxu0 }
 0x2eb   :  { %v2564_v36 = vadd.f32 %v2563_v39, %v2495_v15  ;;  %v2634_v16 = vpop.f32.mrf.mxu1 }
 0x2ed   :  { %v2633_v50 = vadd.f32 %v2632_v34, %v2564_v36 }
 0x2ef   :  { %v2702_v12 = vadd.f32 %v2701_v41, %v2633_v50 }
 0x2f0   :  { %v2496_v25 = vpop.f32.mrf.mxu3 }
 0x2f1   :  { %2753 = vst.msk [vmem:[%s5916_s2 + $0x30] sm:$0xff] %vm2746_vm1, %v2702_v12  ;;  %v2497_v27 = vadd.f32 %v2496_v25, %v5469_v0 }
 0x2f2   :  { %v2703_v35 = vpop.f32.mrf.mxu2  ;;  %v2568_v56 = vpop.f32.mrf.mxu0 }
 0x2f3   :  { %v2566_v3 = vadd.f32 %v2565_v7, %v2497_v27  ;;  %v2637_v24 = vpop.f32.mrf.mxu1 }
 0x2f5   :  { %v2635_v21 = vadd.f32 %v2634_v16, %v2566_v3 }
 0x2f7   :  { %v2704_v9 = vadd.f32 %v2703_v35, %v2635_v21 }
 0x2f8   :  { %v2499_v13 = vpop.f32.mrf.mxu3 }
 0x2f9   :  { %2754 = vst.msk [vmem:[%s5916_s2 + $0x38] sm:$0xff] %vm2746_vm1, %v2704_v9  ;;  %v2500_v8 = vadd.f32 %v2499_v13, %v5487_v53 }
 0x2fa   :  { %v2706_v1 = vpop.f32.mrf.mxu2  ;;  %v2570_v55 = vpop.f32.mrf.mxu0 }
 0x2fb   :  { %v2569_v18 = vadd.f32 %v2568_v56, %v2500_v8  ;;  %v2639_v4 = vpop.f32.mrf.mxu1 }
 0x2fd   :  { %v2638_v5 = vadd.f32 %v2637_v24, %v2569_v18 }
 0x2ff   :  { %v2707_v0 = vadd.f32 %v2706_v1, %v2638_v5 }
 0x300   :  { %v2501_v62 = vpop.f32.mrf.mxu3 }
 0x301   :  { %2755 = vst.msk [vmem:[%s5916_s2 + $0x40] sm:$0xff] %vm2746_vm1, %v2707_v0  ;;  %v2502_v38 = vadd.f32 %v2501_v62, %v5500_v60 }
 0x302   :  { %v2708_v48 = vpop.f32.mrf.mxu2  ;;  %v2573_v46 = vpop.f32.mrf.mxu0 }
 0x303   :  { %v2571_v2 = vadd.f32 %v2570_v55, %v2502_v38  ;;  %v2642_v29 = vpop.f32.mrf.mxu1 }
 0x305   :  { %v2640_v30 = vadd.f32 %v2639_v4, %v2571_v2 }
 0x307   :  { %v2709_v53 = vadd.f32 %v2708_v48, %v2640_v30 }
 0x308   :  { %v2504_v58 = vpop.f32.mrf.mxu3 }
 0x309   :  { %2756 = vst.msk [vmem:[%s5916_s2 + $0x48] sm:$0xff] %vm2746_vm1, %v2709_v53  ;;  %v2505_v63 = vadd.f32 %v2504_v58, %v5518_v33 }
 0x30a   :  { %v2711_v61 = vpop.f32.mrf.mxu2  ;;  %v2575_v51 = vpop.f32.mrf.mxu0 }
 0x30b   :  { %v2574_v6 = vadd.f32 %v2573_v46, %v2505_v63  ;;  %v2644_v17 = vpop.f32.mrf.mxu1 }
 0x30d   :  { %v2643_v40 = vadd.f32 %v2642_v29, %v2574_v6 }
 0x30f   :  { %v2712_v60 = vadd.f32 %v2711_v61, %v2643_v40 }
 0x310   :  { %v2506_v20 = vpop.f32.mrf.mxu3 }
 0x311   :  { %2757 = vst.msk [vmem:[%s5916_s2 + $0x50] sm:$0xff] %vm2746_vm1, %v2712_v60  ;;  %v2507_v32 = vadd.f32 %v2506_v20, %v5531_v47 }
 0x312   :  { %v2713_v43 = vpop.f32.mrf.mxu2  ;;  %v2578_v39 = vpop.f32.mrf.mxu0 }
 0x313   :  { %v2576_v11 = vadd.f32 %v2575_v51, %v2507_v32  ;;  %v2647_v52 = vpop.f32.mrf.mxu1 }
 0x315   :  { %v2645_v10 = vadd.f32 %v2644_v17, %v2576_v11 }
 0x317   :  { %v2714_v33 = vadd.f32 %v2713_v43, %v2645_v10 }
 0x318   :  { %v2509_v34 = vpop.f32.mrf.mxu3 }
 0x319   :  { %2758 = vst.msk [vmem:[%s5916_s2 + $0x58] sm:$0xff] %vm2746_vm1, %v2714_v33  ;;  %v2510_v45 = vadd.f32 %v2509_v34, %v5549_v54 }
 0x31a   :  { %v2716_v57 = vpop.f32.mrf.mxu2  ;;  %v2580_v19 = vpop.f32.mrf.mxu0 }
 0x31b   :  { %v2579_v15 = vadd.f32 %v2578_v39, %v2510_v45  ;;  %v2649_v41 = vpop.f32.mrf.mxu1 }
 0x31d   :  { %v2648_v7 = vadd.f32 %v2647_v52, %v2579_v15 }
 0x31f   :  { %v2717_v47 = vadd.f32 %v2716_v57, %v2648_v7 }
 0x320   :  { %v2511_v36 = vpop.f32.mrf.mxu3 }
 0x321   :  { %2759 = vst.msk [vmem:[%s5916_s2 + $0x60] sm:$0xff] %vm2746_vm1, %v2717_v47  ;;  %v2512_v16 = vadd.f32 %v2511_v36, %v5562_v44 }
 0x322   :  { %v2718_v50 = vpop.f32.mrf.mxu2  ;;  %v2583_v12 = vpop.f32.mrf.mxu0 }
 0x323   :  { %v2581_v25 = vadd.f32 %v2580_v19, %v2512_v16  ;;  %v2652_v27 = vpop.f32.mrf.mxu1 }
 0x325   :  { %v2650_v35 = vadd.f32 %v2649_v41, %v2581_v25 }
 0x327   :  { %v2719_v54 = vadd.f32 %v2718_v50, %v2650_v35 }
 0x328   :  { %v2514_v56 = vpop.f32.mrf.mxu3 }
 0x329   :  { %2760 = vst.msk [vmem:[%s5916_s2 + $0x68] sm:$0xff] %vm2746_vm1, %v2719_v54  ;;  %v2515_v3 = vadd.f32 %v2514_v56, %v5580_v49 }
 0x32a   :  { %v2721_v24 = vpop.f32.mrf.mxu2  ;;  %v2585_v21 = vpop.f32.mrf.mxu0 }
 0x32b   :  { %v2584_v9 = vadd.f32 %v2583_v12, %v2515_v3  ;;  %v2654_v13 = vpop.f32.mrf.mxu1 }
 0x32d   :  { %v2653_v8 = vadd.f32 %v2652_v27, %v2584_v9 }
 0x32f   :  { %v2722_v44 = vadd.f32 %v2721_v24, %v2653_v8 }
 0x330   :  { %v2516_v1 = vpop.f32.mrf.mxu3 }
 0x331   :  { %2761 = vst.msk [vmem:[%s5916_s2 + $0x70] sm:$0xff] %vm2746_vm1, %v2722_v44  ;;  %v2517_v55 = vadd.f32 %v2516_v1, %v5593_v22 }
 0x332   :  { %v2723_v18 = vpop.f32.mrf.mxu2  ;;  %v2588_v4 = vpop.f32.mrf.mxu0 }
 0x333   :  { %v2586_v5 = vadd.f32 %v2585_v21, %v2517_v55  ;;  %v2657_v0 = vpop.f32.mrf.mxu1 }
 0x335   :  { %v2655_v62 = vadd.f32 %v2654_v13, %v2586_v5 }
 0x337   :  { %v2724_v49 = vadd.f32 %v2723_v18, %v2655_v62 }
 0x338   :  { %v2519_v38 = vpop.f32.mrf.mxu3 }
 0x339   :  { %2762 = vst.msk [vmem:[%s5916_s2 + $0x78] sm:$0xff] %vm2746_vm1, %v2724_v49  ;;  %v2520_v48 = vadd.f32 %v2519_v38, %v5611_v28 }
 0x33a   :  { %v2726_v46 = vpop.f32.mrf.mxu2  ;;  %v2590_v2 = vpop.f32.mrf.mxu0 }
 0x33b   :  { %v2589_v29 = vadd.f32 %v2588_v4, %v2520_v48  ;;  %v2659_v30 = vpop.f32.mrf.mxu1 }
 0x33d   :  { %v2658_v53 = vadd.f32 %v2657_v0, %v2589_v29 }
 0x33f   :  { %v2727_v22 = vadd.f32 %v2726_v46, %v2658_v53 }
 0x340   :  { %v2521_v58 = vpop.f32.mrf.mxu3 }
 0x341   :  { %2763 = vst.msk [vmem:[%s5916_s2 + $0x80] sm:$0xff] %vm2746_vm1, %v2727_v22  ;;  %v2522_v63 = vadd.f32 %v2521_v58, %v5624_v26 }
 0x342   :  { %v2728_v61 = vpop.f32.mrf.mxu2  ;;  %v2593_v51 = vpop.f32.mrf.mxu0 }
 0x343   :  { %v2591_v6 = vadd.f32 %v2590_v2, %v2522_v63  ;;  %v2662_v17 = vpop.f32.mrf.mxu1 }
 0x345   :  { %v2660_v40 = vadd.f32 %v2659_v30, %v2591_v6 }
 0x347   :  { %v2729_v28 = vadd.f32 %v2728_v61, %v2660_v40 }
 0x348   :  { %v2524_v60 = vpop.f32.mrf.mxu3 }
 0x349   :  { %2764 = vst.msk [vmem:[%s5916_s2 + $0x88] sm:$0xff] %vm2746_vm1, %v2729_v28  ;;  %v2525_v20 = vadd.f32 %v2524_v60, %v5642_v42 }
 0x34a   :  { %v2731_v32 = vpop.f32.mrf.mxu2  ;;  %v2595_v43 = vpop.f32.mrf.mxu0 }
 0x34b   :  { %v2594_v39 = vadd.f32 %v2593_v51, %v2525_v20  ;;  %v2664_v11 = vpop.f32.mrf.mxu1 }
 0x34d   :  { %v2663_v52 = vadd.f32 %v2662_v17, %v2594_v39 }
 0x34f   :  { %v2732_v26 = vadd.f32 %v2731_v32, %v2663_v52 }
 0x350   :  { %v2526_v10 = vpop.f32.mrf.mxu3 }
 0x351   :  { %2765 = vst.msk [vmem:[%s5916_s2 + $0x90] sm:$0xff] %vm2746_vm1, %v2732_v26  ;;  %v2527_v33 = vadd.f32 %v2526_v10, %v5655_v37 }
 0x352   :  { %v2733_v34 = vpop.f32.mrf.mxu2  ;;  %v2598_v57 = vpop.f32.mrf.mxu0 }
 0x353   :  { %v2596_v45 = vadd.f32 %v2595_v43, %v2527_v33  ;;  %v2667_v15 = vpop.f32.mrf.mxu1 }
 0x355   :  { %v2665_v19 = vadd.f32 %v2664_v11, %v2596_v45 }
 0x357   :  { %v2734_v42 = vadd.f32 %v2733_v34, %v2665_v19 }
 0x358   :  { %v2529_v41 = vpop.f32.mrf.mxu3 }
 0x359   :  { %2766 = vst.msk [vmem:[%s5916_s2 + $0x98] sm:$0xff] %vm2746_vm1, %v2734_v42  ;;  %v2530_v7 = vadd.f32 %v2529_v41, %v5673_v31 }
 0x35a   :  { %v2736_v47 = vpop.f32.mrf.mxu2  ;;  %v2600_v50 = vpop.f32.mrf.mxu0 }
 0x35b   :  { %v2599_v36 = vadd.f32 %v2598_v57, %v2530_v7  ;;  %v2669_v37 = vpop.f32.mrf.mxu1 }
 0x35d   :  { %v2668_v16 = vadd.f32 %v2667_v15, %v2599_v36 }
 0x35f   :  { %v2737_v12 = vadd.f32 %v2736_v47, %v2668_v16 }
 0x360   :  { %v2531_v25 = vpop.f32.mrf.mxu3 }
 0x361   :  { %2767 = vst.msk [vmem:[%s5916_s2 + $0xa0] sm:$0xff] %vm2746_vm1, %v2737_v12  ;;  %v2532_v27 = vadd.f32 %v2531_v25, %v5686_v23 }
 0x362   :  { %v2738_v35 = vpop.f32.mrf.mxu2  ;;  %v2603_v24 = vpop.f32.mrf.mxu0 }
 0x363   :  { %v2601_v54 = vadd.f32 %v2600_v50, %v2532_v27  ;;  %v2672_v9 = vpop.f32.mrf.mxu1 }
 0x365   :  { %v2670_v56 = vadd.f32 %v2669_v37, %v2601_v54 }
 0x367   :  { %v2739_v3 = vadd.f32 %v2738_v35, %v2670_v56 }
 0x368   :  { %v2534_v31 = vpop.f32.mrf.mxu3 }
 0x369   :  { %2768 = vst.msk [vmem:[%s5916_s2 + $0xa8] sm:$0xff] %vm2746_vm1, %v2739_v3  ;;  %v2535_v21 = vadd.f32 %v2534_v31, %v5704_v59 }
 0x36a   :  { %v2741_v8 = vpop.f32.mrf.mxu2  ;;  %v2605_v18 = vpop.f32.mrf.mxu0 }
 0x36b   :  { %v2604_v13 = vadd.f32 %v2603_v24, %v2535_v21  ;;  %v2674_v5 = vpop.f32.mrf.mxu1 }
 0x36d   :  { %v2673_v44 = vadd.f32 %v2672_v9, %v2604_v13 }
 0x36f   :  { %v2742_v1 = vadd.f32 %v2741_v8, %v2673_v44 }
 0x370   :  { %v2536_v55 = vpop.f32.mrf.mxu3 }
 0x371   :  { %2769 = vst.msk [vmem:[%s5916_s2 + $0xb0] sm:$0xff] %vm2746_vm1, %v2742_v1  ;;  %v2537_v23 = vadd.f32 %v2536_v55, %v5717_v14 }
 0x372   :  { %v2743_v62 = vpop.f32.mrf.mxu2 }
 0x373   :  { %v2606_v4 = vadd.f32 %v2605_v18, %v2537_v23 }
 0x375   :  { %v2675_v0 = vadd.f32 %v2674_v5, %v2606_v4 }
 0x377   :  { %v2744_v49 = vadd.f32 %v2743_v62, %v2675_v0 }
 0x379   :  { %2770 = vst.msk [vmem:[%s5916_s2 + $0xb8] sm:$0xff] %vm2746_vm1, %v2744_v49 }

</bundles_post_ra>
